<compile_context>
chip_gen: v5e
topology: v5e:2x2
jax: 0.10.0
libtpu: 0.0.40
codegen_flags: <defaults>
</compile_context>

<pallas_src>
import jax
import jax.numpy as jnp
from jax.experimental import pallas as pl
from jax.experimental.pallas import tpu as pltpu


def _sigmoid(x):
    # 1 / (1 + exp(-x)): exp on the EUP; approx reciprocal also lands on the EUP
    # slot instead of a multi-op VPU divide inside the serial recurrence.
    return pl.reciprocal(1.0 + jnp.exp(-x), approx=True)


def _gru_kernel(x_ref,
                wih0_ref, whh0_ref, bih0_ref, bhh0_ref,
                wih1_ref, whh1_ref, bih1_ref, bhh1_ref,
                h_ref, gi0_ref):
    T, TB, I = x_ref.shape
    H = whh0_ref.shape[0]
    G = 3 * H

    # ---- Layer-0 input projection, hoisted out of the recurrence ----------
    # One (T*TB, I) @ (I, 3H) matmul (M = T*TB fills the MXU far better than
    # T separate (TB, I) dots with K=5); results parked in VMEM scratch.
    x_flat = x_ref[...].reshape(T * TB, I)
    gi0 = jnp.dot(x_flat, wih0_ref[...],
                  preferred_element_type=jnp.float32) + bih0_ref[...]
    gi0_ref[...] = gi0.reshape(T, TB, G)

    def gru_update(pre_i, pre_h, h_prev):
        # PyTorch gate order [r, z, n] along the fused 3H lane axis.
        r = _sigmoid(pre_i[:, 0:H] + pre_h[:, 0:H])
        z = _sigmoid(pre_i[:, H:2 * H] + pre_h[:, H:2 * H])
        n = jnp.tanh(pre_i[:, 2 * H:G] + r * pre_h[:, 2 * H:G])
        return (1.0 - z) * n + z * h_prev

    def step(t, carry):
        h0, h1 = carry
        # Weight refs are read inside the loop body (not hoisted into vregs up
        # front) so regalloc can reload from VMEM cheaply instead of pinning
        # registers across the fully unrolled T loop.
        gh0 = jnp.dot(h0, whh0_ref[...],
                      preferred_element_type=jnp.float32) + bhh0_ref[...]
        h0 = gru_update(gi0_ref[t], gh0, h0)
        # TODO(synk): training-mode dropout (p=0.2) between GRU layers / before
        # the fc head is not implemented; inference (identity) semantics used.
        gi1 = jnp.dot(h0, wih1_ref[...],
                      preferred_element_type=jnp.float32) + bih1_ref[...]
        gh1 = jnp.dot(h1, whh1_ref[...],
                      preferred_element_type=jnp.float32) + bhh1_ref[...]
        h1 = gru_update(gi1, gh1, h1)
        return (h0, h1)

    h_init = (jnp.zeros((TB, H), jnp.float32),
              jnp.zeros((TB, H), jnp.float32))      # h0 = zeros, as in forward()
    _, h_last = jax.lax.fori_loop(0, T, step, h_init, unroll=True)

    # Lane-dense (TB, H) output; the H -> 1 projection happens in the wrapper.
    h_ref[...] = h_last.astype(h_ref.dtype)


def gru_forward(x, params, *, block_b=None):
    """Fused 2-layer GRU + Linear(H, 1) head. x: (B, T, input_size) f32 (batch_first)."""
    (wih0, whh0, bih0, bhh0, wih1, whh1, bih1, bhh1, wfc, bfc) = params
    B, T, I = x.shape
    H = whh0.shape[0]

    if block_b is None:
        if B % 16 == 0:
            block_b = min(B // 2, 256)   # grid >= 2: both TensorCores busy on v7x
        else:
            block_b = min(B, 256)        # single grid step on small odd batches
    assert B % block_b == 0 and block_b % 8 == 0, (B, block_b)

    # Time-major layout so the kernel indexes per-timestep slabs on the leading axis.
    x_tm = jnp.transpose(x, (1, 0, 2))              # (T, B, I)

    def full(a):
        nd = a.ndim
        return pl.BlockSpec(a.shape, lambda i, _nd=nd: (0,) * _nd)

    h_last = pl.pallas_call(
        _gru_kernel,
        out_shape=jax.ShapeDtypeStruct((B, H), jnp.float32),
        grid=(B // block_b,),
        in_specs=[
            pl.BlockSpec((T, block_b, I), lambda i: (0, i, 0)),
            full(wih0), full(whh0), full(bih0), full(bhh0),
            full(wih1), full(whh1), full(bih1), full(bhh1),
        ],
        out_specs=pl.BlockSpec((block_b, H), lambda i: (i, 0)),
        scratch_shapes=[pltpu.VMEM((T, block_b, 3 * H), jnp.float32)],
        compiler_params=pltpu.CompilerParams(
            dimension_semantics=("parallel",)),     # batch tiles shard across TCs on v7x
    )(x_tm, wih0, whh0, bih0, bhh0, wih1, whh1, bih1, bhh1)

    # fc head (H -> 1): 1-lane output, tiny; kept in XLA so the kernel's output
    # stays lane-dense (per perf review).
    return jnp.dot(h_last, wfc) + bfc


def init_params(key, input_size=5, hidden_size=64):
    """PyTorch-style init: weights/biases ~ U(-1/sqrt(H), 1/sqrt(H)).
    Gate order [r, z, n], gate-FUSED storage: W_ih (in, 3H), W_hh (H, 3H)."""
    H = hidden_size
    k = 1.0 / float(jnp.sqrt(jnp.float32(H)))
    keys = jax.random.split(key, 10)

    def u(kk, shape, bound):
        return jax.random.uniform(kk, shape, jnp.float32, -bound, bound)

    # layer 0
    wih0 = u(keys[0], (input_size, 3 * H), k)
    whh0 = u(keys[1], (H, 3 * H), k)
    bih0 = u(keys[2], (1, 3 * H), k)
    bhh0 = u(keys[3], (1, 3 * H), k)
    # layer 1 (input is layer-0 hidden state)
    wih1 = u(keys[4], (H, 3 * H), k)
    whh1 = u(keys[5], (H, 3 * H), k)
    bih1 = u(keys[6], (1, 3 * H), k)
    bhh1 = u(keys[7], (1, 3 * H), k)
    # fc head: Linear(H, 1)
    wfc = u(keys[8], (H, 1), k)
    bfc = u(keys[9], (1, 1), k)
    return (wih0, whh0, bih0, bhh0, wih1, whh1, bih1, bhh1, wfc, bfc)


def gru_reference(x, params):
    """Pure-JAX reference (same equations, exact sigmoid, HIGHEST-precision matmuls)."""
    (wih0, whh0, bih0, bhh0, wih1, whh1, bih1, bhh1, wfc, bfc) = params
    hp = jax.lax.Precision.HIGHEST
    H = whh0.shape[0]

    def sig(v):
        return 1.0 / (1.0 + jnp.exp(-v))

    def cell(x_t, h, wih, whh, bih, bhh):
        gi = jnp.dot(x_t, wih, precision=hp) + bih
        gh = jnp.dot(h, whh, precision=hp) + bhh
        r = sig(gi[:, :H] + gh[:, :H])
        z = sig(gi[:, H:2 * H] + gh[:, H:2 * H])
        n = jnp.tanh(gi[:, 2 * H:] + r * gh[:, 2 * H:])
        return (1.0 - z) * n + z * h

    B, T, _ = x.shape
    h0 = jnp.zeros((B, H), jnp.float32)
    h1 = jnp.zeros((B, H), jnp.float32)
    for t in range(T):
        h0 = cell(x[:, t, :], h0, wih0, whh0, bih0, bhh0)
        h1 = cell(h0, h1, wih1, whh1, bih1, bhh1)
    return jnp.dot(h1, wfc, precision=hp) + bfc


if __name__ == "__main__":
    key = jax.random.PRNGKey(0)
    kp, kx = jax.random.split(key)

    input_size, hidden_size = 5, 64      # GRUModel config (hidden rounded to lane-friendly 64)
    batch, seq = 16, 12

    params = init_params(kp, input_size, hidden_size)
    x = jax.random.normal(kx, (batch, seq, input_size), jnp.float32)

    out = gru_forward(x, params, block_b=8)   # grid=(2,), parallel batch tiles
    out = jax.block_until_ready(out)

    ref = gru_reference(x, params)
    assert out.shape == (batch, 1), out.shape
    # Tolerance 2e-3: approx (EUP) reciprocal in the kernel's sigmoid and MXU
    # f32 passes vs. the HIGHEST-precision reference compound over T=12 steps.
    err = float(jnp.max(jnp.abs(out - ref)))
    assert jnp.allclose(out, ref, atol=2e-3, rtol=2e-3), f"mismatch vs reference: {err}"

    print("KERNEL_OK")
</pallas_src>

<mosaic_0001>
module attributes {stable_mosaic.version = 11 : i64} {
  func.func @_gru_kernel(%arg0: i32, %arg1: memref<12x8x5xf32, #tpu.memory_space<vmem>>, %arg2: memref<5x192xf32, #tpu.memory_space<vmem>>, %arg3: memref<64x192xf32, #tpu.memory_space<vmem>>, %arg4: memref<1x192xf32, #tpu.memory_space<vmem>>, %arg5: memref<1x192xf32, #tpu.memory_space<vmem>>, %arg6: memref<64x192xf32, #tpu.memory_space<vmem>>, %arg7: memref<64x192xf32, #tpu.memory_space<vmem>>, %arg8: memref<1x192xf32, #tpu.memory_space<vmem>>, %arg9: memref<1x192xf32, #tpu.memory_space<vmem>>, %arg10: memref<8x64xf32, #tpu.memory_space<vmem>>, %arg11: memref<12x8x192xf32, #tpu.memory_space<vmem>>) attributes {dimension_semantics = [#tpu.dimension_semantics<parallel>], iteration_bounds = array<i64: 2>, scalar_prefetch = 0 : i64, scratch_operands = 1 : i64, tpu.core_type = #tpu.core_type<tc>, window_params = [{transform_indices = @transform_0, window_bounds = array<i64: 12, 8, 5>}, {pipeline_mode = #tpu.pipeline_mode<synchronous>, transform_indices = @transform_1, window_bounds = array<i64: 5, 192>}, {pipeline_mode = #tpu.pipeline_mode<synchronous>, transform_indices = @transform_2, window_bounds = array<i64: 64, 192>}, {pipeline_mode = #tpu.pipeline_mode<synchronous>, transform_indices = @transform_3, window_bounds = array<i64: 1, 192>}, {pipeline_mode = #tpu.pipeline_mode<synchronous>, transform_indices = @transform_4, window_bounds = array<i64: 1, 192>}, {pipeline_mode = #tpu.pipeline_mode<synchronous>, transform_indices = @transform_5, window_bounds = array<i64: 64, 192>}, {pipeline_mode = #tpu.pipeline_mode<synchronous>, transform_indices = @transform_6, window_bounds = array<i64: 64, 192>}, {pipeline_mode = #tpu.pipeline_mode<synchronous>, transform_indices = @transform_7, window_bounds = array<i64: 1, 192>}, {pipeline_mode = #tpu.pipeline_mode<synchronous>, transform_indices = @transform_8, window_bounds = array<i64: 1, 192>}, {transform_indices = @transform_9, window_bounds = array<i64: 8, 64>}]} {
    %c0 = arith.constant 0 : index
    %c0_0 = arith.constant 0 : index
    %c0_1 = arith.constant 0 : index
    %0 = vector.load %arg1[%c0, %c0_0, %c0_1] : memref<12x8x5xf32, #tpu.memory_space<vmem>>, vector<12x8x5xf32>
    %1 = vector.shape_cast %0 : vector<12x8x5xf32> to vector<96x5xf32>
    %c0_2 = arith.constant 0 : index
    %c0_3 = arith.constant 0 : index
    %2 = vector.load %arg2[%c0_2, %c0_3] : memref<5x192xf32, #tpu.memory_space<vmem>>, vector<5x192xf32>
    %cst = arith.constant dense<0.000000e+00> : vector<96x192xf32>
    %3 = tpu.matmul %1, %2, %cst {dimension_numbers = #tpu.dot_dimension_numbers<[1], [0], [0], [1], [0, 0, 1, 1], [], []>} : vector<96x5xf32>, vector<5x192xf32>, vector<96x192xf32> -> vector<96x192xf32>
    %c0_4 = arith.constant 0 : index
    %c0_5 = arith.constant 0 : index
    %4 = vector.load %arg4[%c0_4, %c0_5] : memref<1x192xf32, #tpu.memory_space<vmem>>, vector<1x192xf32>
    %5 = vector.broadcast %4 : vector<1x192xf32> to vector<96x192xf32>
    %6 = arith.addf %3, %5 : vector<96x192xf32>
    %7 = vector.shape_cast %6 : vector<96x192xf32> to vector<12x8x192xf32>
    %c0_6 = arith.constant 0 : index
    %c0_7 = arith.constant 0 : index
    %c0_8 = arith.constant 0 : index
    %8 = vector.load %arg11[%c0_6, %c0_7, %c0_8] : memref<12x8x192xf32, #tpu.memory_space<vmem>>, vector<12x8x192xf32>
    tpu.vector_store %arg11[%c0_6, %c0_7, %c0_8], %7 {strides = array<i32>} : memref<12x8x192xf32, #tpu.memory_space<vmem>>, vector<12x8x192xf32>,
    %cst_9 = arith.constant 0.000000e+00 : f32
    %9 = vector.broadcast %cst_9 : f32 to vector<8x64xf32>
    %cst_10 = arith.constant 0.000000e+00 : f32
    %10 = vector.broadcast %cst_10 : f32 to vector<8x64xf32>
    %c0_i32 = arith.constant 0 : i32
    %c0_11 = arith.constant 0 : index
    %c0_12 = arith.constant 0 : index
    %11 = vector.load %arg3[%c0_11, %c0_12] : memref<64x192xf32, #tpu.memory_space<vmem>>, vector<64x192xf32>
    %cst_13 = arith.constant dense<0.000000e+00> : vector<8x192xf32>
    %12 = tpu.matmul %9, %11, %cst_13 {dimension_numbers = #tpu.dot_dimension_numbers<[1], [0], [0], [1], [0, 0, 1, 1], [], []>} : vector<8x64xf32>, vector<64x192xf32>, vector<8x192xf32> -> vector<8x192xf32>
    %c0_14 = arith.constant 0 : index
    %c0_15 = arith.constant 0 : index
    %13 = vector.load %arg5[%c0_14, %c0_15] : memref<1x192xf32, #tpu.memory_space<vmem>>, vector<1x192xf32>
    %14 = vector.broadcast %13 : vector<1x192xf32> to vector<8x192xf32>
    %15 = arith.addf %12, %14 : vector<8x192xf32>
    %16 = arith.index_cast %c0_i32 : i32 to index
    %c0_16 = arith.constant 0 : index
    %c0_17 = arith.constant 0 : index
    %17 = vector.load %arg11[%16, %c0_16, %c0_17] : memref<12x8x192xf32, #tpu.memory_space<vmem>>, vector<1x8x192xf32>
    %18 = vector.shape_cast %17 : vector<1x8x192xf32> to vector<8x192xf32>
    %19 = vector.extract_strided_slice %18 {offsets = [0, 0], sizes = [8, 64], strides = [1, 1]} : vector<8x192xf32> to vector<8x64xf32>
    %20 = vector.extract_strided_slice %15 {offsets = [0, 0], sizes = [8, 64], strides = [1, 1]} : vector<8x192xf32> to vector<8x64xf32>
    %21 = arith.addf %19, %20 : vector<8x64xf32>
    %cst_18 = arith.constant 0.000000e+00 : f32
    %22 = vector.broadcast %cst_18 : f32 to vector<8x64xf32>
    %23 = arith.subf %22, %21 : vector<8x64xf32>
    %24 = math.exp %23 : vector<8x64xf32>
    %cst_19 = arith.constant 1.000000e+00 : f32
    %25 = vector.broadcast %cst_19 : f32 to vector<8x64xf32>
    %26 = arith.addf %25, %24 : vector<8x64xf32>
    %27 = tpu.reciprocal %26 {approx = true} : vector<8x64xf32> -> vector<8x64xf32>
    %28 = vector.extract_strided_slice %18 {offsets = [0, 64], sizes = [8, 64], strides = [1, 1]} : vector<8x192xf32> to vector<8x64xf32>
    %29 = vector.extract_strided_slice %15 {offsets = [0, 64], sizes = [8, 64], strides = [1, 1]} : vector<8x192xf32> to vector<8x64xf32>
    %30 = arith.addf %28, %29 : vector<8x64xf32>
    %cst_20 = arith.constant 0.000000e+00 : f32
    %31 = vector.broadcast %cst_20 : f32 to vector<8x64xf32>
    %32 = arith.subf %31, %30 : vector<8x64xf32>
    %33 = math.exp %32 : vector<8x64xf32>
    %cst_21 = arith.constant 1.000000e+00 : f32
    %34 = vector.broadcast %cst_21 : f32 to vector<8x64xf32>
    %35 = arith.addf %34, %33 : vector<8x64xf32>
    %36 = tpu.reciprocal %35 {approx = true} : vector<8x64xf32> -> vector<8x64xf32>
    %37 = vector.extract_strided_slice %18 {offsets = [0, 128], sizes = [8, 64], strides = [1, 1]} : vector<8x192xf32> to vector<8x64xf32>
    %38 = vector.extract_strided_slice %15 {offsets = [0, 128], sizes = [8, 64], strides = [1, 1]} : vector<8x192xf32> to vector<8x64xf32>
    %39 = arith.mulf %27, %38 : vector<8x64xf32>
    %40 = arith.addf %37, %39 : vector<8x64xf32>
    %41 = math.tanh %40 : vector<8x64xf32>
    %cst_22 = arith.constant 1.000000e+00 : f32
    %42 = vector.broadcast %cst_22 : f32 to vector<8x64xf32>
    %43 = arith.subf %42, %36 : vector<8x64xf32>
    %44 = arith.mulf %43, %41 : vector<8x64xf32>
    %45 = arith.mulf %36, %9 : vector<8x64xf32>
    %46 = arith.addf %44, %45 : vector<8x64xf32>
    %c0_23 = arith.constant 0 : index
    %c0_24 = arith.constant 0 : index
    %47 = vector.load %arg6[%c0_23, %c0_24] : memref<64x192xf32, #tpu.memory_space<vmem>>, vector<64x192xf32>
    %cst_25 = arith.constant dense<0.000000e+00> : vector<8x192xf32>
    %48 = tpu.matmul %46, %47, %cst_25 {dimension_numbers = #tpu.dot_dimension_numbers<[1], [0], [0], [1], [0, 0, 1, 1], [], []>} : vector<8x64xf32>, vector<64x192xf32>, vector<8x192xf32> -> vector<8x192xf32>
    %c0_26 = arith.constant 0 : index
    %c0_27 = arith.constant 0 : index
    %49 = vector.load %arg8[%c0_26, %c0_27] : memref<1x192xf32, #tpu.memory_space<vmem>>, vector<1x192xf32>
    %50 = vector.broadcast %49 : vector<1x192xf32> to vector<8x192xf32>
    %51 = arith.addf %48, %50 : vector<8x192xf32>
    %c0_28 = arith.constant 0 : index
    %c0_29 = arith.constant 0 : index
    %52 = vector.load %arg7[%c0_28, %c0_29] : memref<64x192xf32, #tpu.memory_space<vmem>>, vector<64x192xf32>
    %cst_30 = arith.constant dense<0.000000e+00> : vector<8x192xf32>
    %53 = tpu.matmul %10, %52, %cst_30 {dimension_numbers = #tpu.dot_dimension_numbers<[1], [0], [0], [1], [0, 0, 1, 1], [], []>} : vector<8x64xf32>, vector<64x192xf32>, vector<8x192xf32> -> vector<8x192xf32>
    %c0_31 = arith.constant 0 : index
    %c0_32 = arith.constant 0 : index
    %54 = vector.load %arg9[%c0_31, %c0_32] : memref<1x192xf32, #tpu.memory_space<vmem>>, vector<1x192xf32>
    %55 = vector.broadcast %54 : vector<1x192xf32> to vector<8x192xf32>
    %56 = arith.addf %53, %55 : vector<8x192xf32>
    %57 = vector.extract_strided_slice %51 {offsets = [0, 0], sizes = [8, 64], strides = [1, 1]} : vector<8x192xf32> to vector<8x64xf32>
    %58 = vector.extract_strided_slice %56 {offsets = [0, 0], sizes = [8, 64], strides = [1, 1]} : vector<8x192xf32> to vector<8x64xf32>
    %59 = arith.addf %57, %58 : vector<8x64xf32>
    %cst_33 = arith.constant 0.000000e+00 : f32
    %60 = vector.broadcast %cst_33 : f32 to vector<8x64xf32>
    %61 = arith.subf %60, %59 : vector<8x64xf32>
    %62 = math.exp %61 : vector<8x64xf32>
    %cst_34 = arith.constant 1.000000e+00 : f32
    %63 = vector.broadcast %cst_34 : f32 to vector<8x64xf32>
    %64 = arith.addf %63, %62 : vector<8x64xf32>
    %65 = tpu.reciprocal %64 {approx = true} : vector<8x64xf32> -> vector<8x64xf32>
    %66 = vector.extract_strided_slice %51 {offsets = [0, 64], sizes = [8, 64], strides = [1, 1]} : vector<8x192xf32> to vector<8x64xf32>
    %67 = vector.extract_strided_slice %56 {offsets = [0, 64], sizes = [8, 64], strides = [1, 1]} : vector<8x192xf32> to vector<8x64xf32>
    %68 = arith.addf %66, %67 : vector<8x64xf32>
    %cst_35 = arith.constant 0.000000e+00 : f32
    %69 = vector.broadcast %cst_35 : f32 to vector<8x64xf32>
    %70 = arith.subf %69, %68 : vector<8x64xf32>
    %71 = math.exp %70 : vector<8x64xf32>
    %cst_36 = arith.constant 1.000000e+00 : f32
    %72 = vector.broadcast %cst_36 : f32 to vector<8x64xf32>
    %73 = arith.addf %72, %71 : vector<8x64xf32>
    %74 = tpu.reciprocal %73 {approx = true} : vector<8x64xf32> -> vector<8x64xf32>
    %75 = vector.extract_strided_slice %51 {offsets = [0, 128], sizes = [8, 64], strides = [1, 1]} : vector<8x192xf32> to vector<8x64xf32>
    %76 = vector.extract_strided_slice %56 {offsets = [0, 128], sizes = [8, 64], strides = [1, 1]} : vector<8x192xf32> to vector<8x64xf32>
    %77 = arith.mulf %65, %76 : vector<8x64xf32>
    %78 = arith.addf %75, %77 : vector<8x64xf32>
    %79 = math.tanh %78 : vector<8x64xf32>
    %cst_37 = arith.constant 1.000000e+00 : f32
    %80 = vector.broadcast %cst_37 : f32 to vector<8x64xf32>
    %81 = arith.subf %80, %74 : vector<8x64xf32>
    %82 = arith.mulf %81, %79 : vector<8x64xf32>
    %83 = arith.mulf %74, %10 : vector<8x64xf32>
    %84 = arith.addf %82, %83 : vector<8x64xf32>
    %c1_i32 = arith.constant 1 : i32
    %c0_38 = arith.constant 0 : index
    %c0_39 = arith.constant 0 : index
    %85 = vector.load %arg3[%c0_38, %c0_39] : memref<64x192xf32, #tpu.memory_space<vmem>>, vector<64x192xf32>
    %cst_40 = arith.constant dense<0.000000e+00> : vector<8x192xf32>
    %86 = tpu.matmul %46, %85, %cst_40 {dimension_numbers = #tpu.dot_dimension_numbers<[1], [0], [0], [1], [0, 0, 1, 1], [], []>} : vector<8x64xf32>, vector<64x192xf32>, vector<8x192xf32> -> vector<8x192xf32>
    %c0_41 = arith.constant 0 : index
    %c0_42 = arith.constant 0 : index
    %87 = vector.load %arg5[%c0_41, %c0_42] : memref<1x192xf32, #tpu.memory_space<vmem>>, vector<1x192xf32>
    %88 = vector.broadcast %87 : vector<1x192xf32> to vector<8x192xf32>
    %89 = arith.addf %86, %88 : vector<8x192xf32>
    %90 = arith.index_cast %c1_i32 : i32 to index
    %c0_43 = arith.constant 0 : index
    %c0_44 = arith.constant 0 : index
    %91 = vector.load %arg11[%90, %c0_43, %c0_44] : memref<12x8x192xf32, #tpu.memory_space<vmem>>, vector<1x8x192xf32>
    %92 = vector.shape_cast %91 : vector<1x8x192xf32> to vector<8x192xf32>
    %93 = vector.extract_strided_slice %92 {offsets = [0, 0], sizes = [8, 64], strides = [1, 1]} : vector<8x192xf32> to vector<8x64xf32>
    %94 = vector.extract_strided_slice %89 {offsets = [0, 0], sizes = [8, 64], strides = [1, 1]} : vector<8x192xf32> to vector<8x64xf32>
    %95 = arith.addf %93, %94 : vector<8x64xf32>
    %cst_45 = arith.constant 0.000000e+00 : f32
    %96 = vector.broadcast %cst_45 : f32 to vector<8x64xf32>
    %97 = arith.subf %96, %95 : vector<8x64xf32>
    %98 = math.exp %97 : vector<8x64xf32>
    %cst_46 = arith.constant 1.000000e+00 : f32
    %99 = vector.broadcast %cst_46 : f32 to vector<8x64xf32>
    %100 = arith.addf %99, %98 : vector<8x64xf32>
    %101 = tpu.reciprocal %100 {approx = true} : vector<8x64xf32> -> vector<8x64xf32>
    %102 = vector.extract_strided_slice %92 {offsets = [0, 64], sizes = [8, 64], strides = [1, 1]} : vector<8x192xf32> to vector<8x64xf32>
    %103 = vector.extract_strided_slice %89 {offsets = [0, 64], sizes = [8, 64], strides = [1, 1]} : vector<8x192xf32> to vector<8x64xf32>
    %104 = arith.addf %102, %103 : vector<8x64xf32>
    %cst_47 = arith.constant 0.000000e+00 : f32
    %105 = vector.broadcast %cst_47 : f32 to vector<8x64xf32>
    %106 = arith.subf %105, %104 : vector<8x64xf32>
    %107 = math.exp %106 : vector<8x64xf32>
    %cst_48 = arith.constant 1.000000e+00 : f32
    %108 = vector.broadcast %cst_48 : f32 to vector<8x64xf32>
    %109 = arith.addf %108, %107 : vector<8x64xf32>
    %110 = tpu.reciprocal %109 {approx = true} : vector<8x64xf32> -> vector<8x64xf32>
    %111 = vector.extract_strided_slice %92 {offsets = [0, 128], sizes = [8, 64], strides = [1, 1]} : vector<8x192xf32> to vector<8x64xf32>
    %112 = vector.extract_strided_slice %89 {offsets = [0, 128], sizes = [8, 64], strides = [1, 1]} : vector<8x192xf32> to vector<8x64xf32>
    %113 = arith.mulf %101, %112 : vector<8x64xf32>
    %114 = arith.addf %111, %113 : vector<8x64xf32>
    %115 = math.tanh %114 : vector<8x64xf32>
    %cst_49 = arith.constant 1.000000e+00 : f32
    %116 = vector.broadcast %cst_49 : f32 to vector<8x64xf32>
    %117 = arith.subf %116, %110 : vector<8x64xf32>
    %118 = arith.mulf %117, %115 : vector<8x64xf32>
    %119 = arith.mulf %110, %46 : vector<8x64xf32>
    %120 = arith.addf %118, %119 : vector<8x64xf32>
    %c0_50 = arith.constant 0 : index
    %c0_51 = arith.constant 0 : index
    %121 = vector.load %arg6[%c0_50, %c0_51] : memref<64x192xf32, #tpu.memory_space<vmem>>, vector<64x192xf32>
    %cst_52 = arith.constant dense<0.000000e+00> : vector<8x192xf32>
    %122 = tpu.matmul %120, %121, %cst_52 {dimension_numbers = #tpu.dot_dimension_numbers<[1], [0], [0], [1], [0, 0, 1, 1], [], []>} : vector<8x64xf32>, vector<64x192xf32>, vector<8x192xf32> -> vector<8x192xf32>
    %c0_53 = arith.constant 0 : index
    %c0_54 = arith.constant 0 : index
    %123 = vector.load %arg8[%c0_53, %c0_54] : memref<1x192xf32, #tpu.memory_space<vmem>>, vector<1x192xf32>
    %124 = vector.broadcast %123 : vector<1x192xf32> to vector<8x192xf32>
    %125 = arith.addf %122, %124 : vector<8x192xf32>
    %c0_55 = arith.constant 0 : index
    %c0_56 = arith.constant 0 : index
    %126 = vector.load %arg7[%c0_55, %c0_56] : memref<64x192xf32, #tpu.memory_space<vmem>>, vector<64x192xf32>
    %cst_57 = arith.constant dense<0.000000e+00> : vector<8x192xf32>
    %127 = tpu.matmul %84, %126, %cst_57 {dimension_numbers = #tpu.dot_dimension_numbers<[1], [0], [0], [1], [0, 0, 1, 1], [], []>} : vector<8x64xf32>, vector<64x192xf32>, vector<8x192xf32> -> vector<8x192xf32>
    %c0_58 = arith.constant 0 : index
    %c0_59 = arith.constant 0 : index
    %128 = vector.load %arg9[%c0_58, %c0_59] : memref<1x192xf32, #tpu.memory_space<vmem>>, vector<1x192xf32>
    %129 = vector.broadcast %128 : vector<1x192xf32> to vector<8x192xf32>
    %130 = arith.addf %127, %129 : vector<8x192xf32>
    %131 = vector.extract_strided_slice %125 {offsets = [0, 0], sizes = [8, 64], strides = [1, 1]} : vector<8x192xf32> to vector<8x64xf32>
    %132 = vector.extract_strided_slice %130 {offsets = [0, 0], sizes = [8, 64], strides = [1, 1]} : vector<8x192xf32> to vector<8x64xf32>
    %133 = arith.addf %131, %132 : vector<8x64xf32>
    %cst_60 = arith.constant 0.000000e+00 : f32
    %134 = vector.broadcast %cst_60 : f32 to vector<8x64xf32>
    %135 = arith.subf %134, %133 : vector<8x64xf32>
    %136 = math.exp %135 : vector<8x64xf32>
    %cst_61 = arith.constant 1.000000e+00 : f32
    %137 = vector.broadcast %cst_61 : f32 to vector<8x64xf32>
    %138 = arith.addf %137, %136 : vector<8x64xf32>
    %139 = tpu.reciprocal %138 {approx = true} : vector<8x64xf32> -> vector<8x64xf32>
    %140 = vector.extract_strided_slice %125 {offsets = [0, 64], sizes = [8, 64], strides = [1, 1]} : vector<8x192xf32> to vector<8x64xf32>
    %141 = vector.extract_strided_slice %130 {offsets = [0, 64], sizes = [8, 64], strides = [1, 1]} : vector<8x192xf32> to vector<8x64xf32>
    %142 = arith.addf %140, %141 : vector<8x64xf32>
    %cst_62 = arith.constant 0.000000e+00 : f32
    %143 = vector.broadcast %cst_62 : f32 to vector<8x64xf32>
    %144 = arith.subf %143, %142 : vector<8x64xf32>
    %145 = math.exp %144 : vector<8x64xf32>
    %cst_63 = arith.constant 1.000000e+00 : f32
    %146 = vector.broadcast %cst_63 : f32 to vector<8x64xf32>
    %147 = arith.addf %146, %145 : vector<8x64xf32>
    %148 = tpu.reciprocal %147 {approx = true} : vector<8x64xf32> -> vector<8x64xf32>
    %149 = vector.extract_strided_slice %125 {offsets = [0, 128], sizes = [8, 64], strides = [1, 1]} : vector<8x192xf32> to vector<8x64xf32>
    %150 = vector.extract_strided_slice %130 {offsets = [0, 128], sizes = [8, 64], strides = [1, 1]} : vector<8x192xf32> to vector<8x64xf32>
    %151 = arith.mulf %139, %150 : vector<8x64xf32>
    %152 = arith.addf %149, %151 : vector<8x64xf32>
    %153 = math.tanh %152 : vector<8x64xf32>
    %cst_64 = arith.constant 1.000000e+00 : f32
    %154 = vector.broadcast %cst_64 : f32 to vector<8x64xf32>
    %155 = arith.subf %154, %148 : vector<8x64xf32>
    %156 = arith.mulf %155, %153 : vector<8x64xf32>
    %157 = arith.mulf %148, %84 : vector<8x64xf32>
    %158 = arith.addf %156, %157 : vector<8x64xf32>
    %c2_i32 = arith.constant 2 : i32
    %c0_65 = arith.constant 0 : index
    %c0_66 = arith.constant 0 : index
    %159 = vector.load %arg3[%c0_65, %c0_66] : memref<64x192xf32, #tpu.memory_space<vmem>>, vector<64x192xf32>
    %cst_67 = arith.constant dense<0.000000e+00> : vector<8x192xf32>
    %160 = tpu.matmul %120, %159, %cst_67 {dimension_numbers = #tpu.dot_dimension_numbers<[1], [0], [0], [1], [0, 0, 1, 1], [], []>} : vector<8x64xf32>, vector<64x192xf32>, vector<8x192xf32> -> vector<8x192xf32>
    %c0_68 = arith.constant 0 : index
    %c0_69 = arith.constant 0 : index
    %161 = vector.load %arg5[%c0_68, %c0_69] : memref<1x192xf32, #tpu.memory_space<vmem>>, vector<1x192xf32>
    %162 = vector.broadcast %161 : vector<1x192xf32> to vector<8x192xf32>
    %163 = arith.addf %160, %162 : vector<8x192xf32>
    %164 = arith.index_cast %c2_i32 : i32 to index
    %c0_70 = arith.constant 0 : index
    %c0_71 = arith.constant 0 : index
    %165 = vector.load %arg11[%164, %c0_70, %c0_71] : memref<12x8x192xf32, #tpu.memory_space<vmem>>, vector<1x8x192xf32>
    %166 = vector.shape_cast %165 : vector<1x8x192xf32> to vector<8x192xf32>
    %167 = vector.extract_strided_slice %166 {offsets = [0, 0], sizes = [8, 64], strides = [1, 1]} : vector<8x192xf32> to vector<8x64xf32>
    %168 = vector.extract_strided_slice %163 {offsets = [0, 0], sizes = [8, 64], strides = [1, 1]} : vector<8x192xf32> to vector<8x64xf32>
    %169 = arith.addf %167, %168 : vector<8x64xf32>
    %cst_72 = arith.constant 0.000000e+00 : f32
    %170 = vector.broadcast %cst_72 : f32 to vector<8x64xf32>
    %171 = arith.subf %170, %169 : vector<8x64xf32>
    %172 = math.exp %171 : vector<8x64xf32>
    %cst_73 = arith.constant 1.000000e+00 : f32
    %173 = vector.broadcast %cst_73 : f32 to vector<8x64xf32>
    %174 = arith.addf %173, %172 : vector<8x64xf32>
    %175 = tpu.reciprocal %174 {approx = true} : vector<8x64xf32> -> vector<8x64xf32>
    %176 = vector.extract_strided_slice %166 {offsets = [0, 64], sizes = [8, 64], strides = [1, 1]} : vector<8x192xf32> to vector<8x64xf32>
    %177 = vector.extract_strided_slice %163 {offsets = [0, 64], sizes = [8, 64], strides = [1, 1]} : vector<8x192xf32> to vector<8x64xf32>
    %178 = arith.addf %176, %177 : vector<8x64xf32>
    %cst_74 = arith.constant 0.000000e+00 : f32
    %179 = vector.broadcast %cst_74 : f32 to vector<8x64xf32>
    %180 = arith.subf %179, %178 : vector<8x64xf32>
    %181 = math.exp %180 : vector<8x64xf32>
    %cst_75 = arith.constant 1.000000e+00 : f32
    %182 = vector.broadcast %cst_75 : f32 to vector<8x64xf32>
    %183 = arith.addf %182, %181 : vector<8x64xf32>
    %184 = tpu.reciprocal %183 {approx = true} : vector<8x64xf32> -> vector<8x64xf32>
    %185 = vector.extract_strided_slice %166 {offsets = [0, 128], sizes = [8, 64], strides = [1, 1]} : vector<8x192xf32> to vector<8x64xf32>
    %186 = vector.extract_strided_slice %163 {offsets = [0, 128], sizes = [8, 64], strides = [1, 1]} : vector<8x192xf32> to vector<8x64xf32>
    %187 = arith.mulf %175, %186 : vector<8x64xf32>
    %188 = arith.addf %185, %187 : vector<8x64xf32>
    %189 = math.tanh %188 : vector<8x64xf32>
    %cst_76 = arith.constant 1.000000e+00 : f32
    %190 = vector.broadcast %cst_76 : f32 to vector<8x64xf32>
    %191 = arith.subf %190, %184 : vector<8x64xf32>
    %192 = arith.mulf %191, %189 : vector<8x64xf32>
    %193 = arith.mulf %184, %120 : vector<8x64xf32>
    %194 = arith.addf %192, %193 : vector<8x64xf32>
    %c0_77 = arith.constant 0 : index
    %c0_78 = arith.constant 0 : index
    %195 = vector.load %arg6[%c0_77, %c0_78] : memref<64x192xf32, #tpu.memory_space<vmem>>, vector<64x192xf32>
    %cst_79 = arith.constant dense<0.000000e+00> : vector<8x192xf32>
    %196 = tpu.matmul %194, %195, %cst_79 {dimension_numbers = #tpu.dot_dimension_numbers<[1], [0], [0], [1], [0, 0, 1, 1], [], []>} : vector<8x64xf32>, vector<64x192xf32>, vector<8x192xf32> -> vector<8x192xf32>
    %c0_80 = arith.constant 0 : index
    %c0_81 = arith.constant 0 : index
    %197 = vector.load %arg8[%c0_80, %c0_81] : memref<1x192xf32, #tpu.memory_space<vmem>>, vector<1x192xf32>
    %198 = vector.broadcast %197 : vector<1x192xf32> to vector<8x192xf32>
    %199 = arith.addf %196, %198 : vector<8x192xf32>
    %c0_82 = arith.constant 0 : index
    %c0_83 = arith.constant 0 : index
    %200 = vector.load %arg7[%c0_82, %c0_83] : memref<64x192xf32, #tpu.memory_space<vmem>>, vector<64x192xf32>
    %cst_84 = arith.constant dense<0.000000e+00> : vector<8x192xf32>
    %201 = tpu.matmul %158, %200, %cst_84 {dimension_numbers = #tpu.dot_dimension_numbers<[1], [0], [0], [1], [0, 0, 1, 1], [], []>} : vector<8x64xf32>, vector<64x192xf32>, vector<8x192xf32> -> vector<8x192xf32>
    %c0_85 = arith.constant 0 : index
    %c0_86 = arith.constant 0 : index
    %202 = vector.load %arg9[%c0_85, %c0_86] : memref<1x192xf32, #tpu.memory_space<vmem>>, vector<1x192xf32>
    %203 = vector.broadcast %202 : vector<1x192xf32> to vector<8x192xf32>
    %204 = arith.addf %201, %203 : vector<8x192xf32>
    %205 = vector.extract_strided_slice %199 {offsets = [0, 0], sizes = [8, 64], strides = [1, 1]} : vector<8x192xf32> to vector<8x64xf32>
    %206 = vector.extract_strided_slice %204 {offsets = [0, 0], sizes = [8, 64], strides = [1, 1]} : vector<8x192xf32> to vector<8x64xf32>
    %207 = arith.addf %205, %206 : vector<8x64xf32>
    %cst_87 = arith.constant 0.000000e+00 : f32
    %208 = vector.broadcast %cst_87 : f32 to vector<8x64xf32>
    %209 = arith.subf %208, %207 : vector<8x64xf32>
    %210 = math.exp %209 : vector<8x64xf32>
    %cst_88 = arith.constant 1.000000e+00 : f32
    %211 = vector.broadcast %cst_88 : f32 to vector<8x64xf32>
    %212 = arith.addf %211, %210 : vector<8x64xf32>
    %213 = tpu.reciprocal %212 {approx = true} : vector<8x64xf32> -> vector<8x64xf32>
    %214 = vector.extract_strided_slice %199 {offsets = [0, 64], sizes = [8, 64], strides = [1, 1]} : vector<8x192xf32> to vector<8x64xf32>
    %215 = vector.extract_strided_slice %204 {offsets = [0, 64], sizes = [8, 64], strides = [1, 1]} : vector<8x192xf32> to vector<8x64xf32>
    %216 = arith.addf %214, %215 : vector<8x64xf32>
    %cst_89 = arith.constant 0.000000e+00 : f32
    %217 = vector.broadcast %cst_89 : f32 to vector<8x64xf32>
    %218 = arith.subf %217, %216 : vector<8x64xf32>
    %219 = math.exp %218 : vector<8x64xf32>
    %cst_90 = arith.constant 1.000000e+00 : f32
    %220 = vector.broadcast %cst_90 : f32 to vector<8x64xf32>
    %221 = arith.addf %220, %219 : vector<8x64xf32>
    %222 = tpu.reciprocal %221 {approx = true} : vector<8x64xf32> -> vector<8x64xf32>
    %223 = vector.extract_strided_slice %199 {offsets = [0, 128], sizes = [8, 64], strides = [1, 1]} : vector<8x192xf32> to vector<8x64xf32>
    %224 = vector.extract_strided_slice %204 {offsets = [0, 128], sizes = [8, 64], strides = [1, 1]} : vector<8x192xf32> to vector<8x64xf32>
    %225 = arith.mulf %213, %224 : vector<8x64xf32>
    %226 = arith.addf %223, %225 : vector<8x64xf32>
    %227 = math.tanh %226 : vector<8x64xf32>
    %cst_91 = arith.constant 1.000000e+00 : f32
    %228 = vector.broadcast %cst_91 : f32 to vector<8x64xf32>
    %229 = arith.subf %228, %222 : vector<8x64xf32>
    %230 = arith.mulf %229, %227 : vector<8x64xf32>
    %231 = arith.mulf %222, %158 : vector<8x64xf32>
    %232 = arith.addf %230, %231 : vector<8x64xf32>
    %c3_i32 = arith.constant 3 : i32
    %c0_92 = arith.constant 0 : index
    %c0_93 = arith.constant 0 : index
    %233 = vector.load %arg3[%c0_92, %c0_93] : memref<64x192xf32, #tpu.memory_space<vmem>>, vector<64x192xf32>
    %cst_94 = arith.constant dense<0.000000e+00> : vector<8x192xf32>
    %234 = tpu.matmul %194, %233, %cst_94 {dimension_numbers = #tpu.dot_dimension_numbers<[1], [0], [0], [1], [0, 0, 1, 1], [], []>} : vector<8x64xf32>, vector<64x192xf32>, vector<8x192xf32> -> vector<8x192xf32>
    %c0_95 = arith.constant 0 : index
    %c0_96 = arith.constant 0 : index
    %235 = vector.load %arg5[%c0_95, %c0_96] : memref<1x192xf32, #tpu.memory_space<vmem>>, vector<1x192xf32>
    %236 = vector.broadcast %235 : vector<1x192xf32> to vector<8x192xf32>
    %237 = arith.addf %234, %236 : vector<8x192xf32>
    %238 = arith.index_cast %c3_i32 : i32 to index
    %c0_97 = arith.constant 0 : index
    %c0_98 = arith.constant 0 : index
    %239 = vector.load %arg11[%238, %c0_97, %c0_98] : memref<12x8x192xf32, #tpu.memory_space<vmem>>, vector<1x8x192xf32>
    %240 = vector.shape_cast %239 : vector<1x8x192xf32> to vector<8x192xf32>
    %241 = vector.extract_strided_slice %240 {offsets = [0, 0], sizes = [8, 64], strides = [1, 1]} : vector<8x192xf32> to vector<8x64xf32>
    %242 = vector.extract_strided_slice %237 {offsets = [0, 0], sizes = [8, 64], strides = [1, 1]} : vector<8x192xf32> to vector<8x64xf32>
    %243 = arith.addf %241, %242 : vector<8x64xf32>
    %cst_99 = arith.constant 0.000000e+00 : f32
    %244 = vector.broadcast %cst_99 : f32 to vector<8x64xf32>
    %245 = arith.subf %244, %243 : vector<8x64xf32>
    %246 = math.exp %245 : vector<8x64xf32>
    %cst_100 = arith.constant 1.000000e+00 : f32
    %247 = vector.broadcast %cst_100 : f32 to vector<8x64xf32>
    %248 = arith.addf %247, %246 : vector<8x64xf32>
    %249 = tpu.reciprocal %248 {approx = true} : vector<8x64xf32> -> vector<8x64xf32>
    %250 = vector.extract_strided_slice %240 {offsets = [0, 64], sizes = [8, 64], strides = [1, 1]} : vector<8x192xf32> to vector<8x64xf32>
    %251 = vector.extract_strided_slice %237 {offsets = [0, 64], sizes = [8, 64], strides = [1, 1]} : vector<8x192xf32> to vector<8x64xf32>
    %252 = arith.addf %250, %251 : vector<8x64xf32>
    %cst_101 = arith.constant 0.000000e+00 : f32
    %253 = vector.broadcast %cst_101 : f32 to vector<8x64xf32>
    %254 = arith.subf %253, %252 : vector<8x64xf32>
    %255 = math.exp %254 : vector<8x64xf32>
    %cst_102 = arith.constant 1.000000e+00 : f32
    %256 = vector.broadcast %cst_102 : f32 to vector<8x64xf32>
    %257 = arith.addf %256, %255 : vector<8x64xf32>
    %258 = tpu.reciprocal %257 {approx = true} : vector<8x64xf32> -> vector<8x64xf32>
    %259 = vector.extract_strided_slice %240 {offsets = [0, 128], sizes = [8, 64], strides = [1, 1]} : vector<8x192xf32> to vector<8x64xf32>
    %260 = vector.extract_strided_slice %237 {offsets = [0, 128], sizes = [8, 64], strides = [1, 1]} : vector<8x192xf32> to vector<8x64xf32>
    %261 = arith.mulf %249, %260 : vector<8x64xf32>
    %262 = arith.addf %259, %261 : vector<8x64xf32>
    %263 = math.tanh %262 : vector<8x64xf32>
    %cst_103 = arith.constant 1.000000e+00 : f32
    %264 = vector.broadcast %cst_103 : f32 to vector<8x64xf32>
    %265 = arith.subf %264, %258 : vector<8x64xf32>
    %266 = arith.mulf %265, %263 : vector<8x64xf32>
    %267 = arith.mulf %258, %194 : vector<8x64xf32>
    %268 = arith.addf %266, %267 : vector<8x64xf32>
    %c0_104 = arith.constant 0 : index
    %c0_105 = arith.constant 0 : index
    %269 = vector.load %arg6[%c0_104, %c0_105] : memref<64x192xf32, #tpu.memory_space<vmem>>, vector<64x192xf32>
    %cst_106 = arith.constant dense<0.000000e+00> : vector<8x192xf32>
    %270 = tpu.matmul %268, %269, %cst_106 {dimension_numbers = #tpu.dot_dimension_numbers<[1], [0], [0], [1], [0, 0, 1, 1], [], []>} : vector<8x64xf32>, vector<64x192xf32>, vector<8x192xf32> -> vector<8x192xf32>
    %c0_107 = arith.constant 0 : index
    %c0_108 = arith.constant 0 : index
    %271 = vector.load %arg8[%c0_107, %c0_108] : memref<1x192xf32, #tpu.memory_space<vmem>>, vector<1x192xf32>
    %272 = vector.broadcast %271 : vector<1x192xf32> to vector<8x192xf32>
    %273 = arith.addf %270, %272 : vector<8x192xf32>
    %c0_109 = arith.constant 0 : index
    %c0_110 = arith.constant 0 : index
    %274 = vector.load %arg7[%c0_109, %c0_110] : memref<64x192xf32, #tpu.memory_space<vmem>>, vector<64x192xf32>
    %cst_111 = arith.constant dense<0.000000e+00> : vector<8x192xf32>
    %275 = tpu.matmul %232, %274, %cst_111 {dimension_numbers = #tpu.dot_dimension_numbers<[1], [0], [0], [1], [0, 0, 1, 1], [], []>} : vector<8x64xf32>, vector<64x192xf32>, vector<8x192xf32> -> vector<8x192xf32>
    %c0_112 = arith.constant 0 : index
    %c0_113 = arith.constant 0 : index
    %276 = vector.load %arg9[%c0_112, %c0_113] : memref<1x192xf32, #tpu.memory_space<vmem>>, vector<1x192xf32>
    %277 = vector.broadcast %276 : vector<1x192xf32> to vector<8x192xf32>
    %278 = arith.addf %275, %277 : vector<8x192xf32>
    %279 = vector.extract_strided_slice %273 {offsets = [0, 0], sizes = [8, 64], strides = [1, 1]} : vector<8x192xf32> to vector<8x64xf32>
    %280 = vector.extract_strided_slice %278 {offsets = [0, 0], sizes = [8, 64], strides = [1, 1]} : vector<8x192xf32> to vector<8x64xf32>
    %281 = arith.addf %279, %280 : vector<8x64xf32>
    %cst_114 = arith.constant 0.000000e+00 : f32
    %282 = vector.broadcast %cst_114 : f32 to vector<8x64xf32>
    %283 = arith.subf %282, %281 : vector<8x64xf32>
    %284 = math.exp %283 : vector<8x64xf32>
    %cst_115 = arith.constant 1.000000e+00 : f32
    %285 = vector.broadcast %cst_115 : f32 to vector<8x64xf32>
    %286 = arith.addf %285, %284 : vector<8x64xf32>
    %287 = tpu.reciprocal %286 {approx = true} : vector<8x64xf32> -> vector<8x64xf32>
    %288 = vector.extract_strided_slice %273 {offsets = [0, 64], sizes = [8, 64], strides = [1, 1]} : vector<8x192xf32> to vector<8x64xf32>
    %289 = vector.extract_strided_slice %278 {offsets = [0, 64], sizes = [8, 64], strides = [1, 1]} : vector<8x192xf32> to vector<8x64xf32>
    %290 = arith.addf %288, %289 : vector<8x64xf32>
    %cst_116 = arith.constant 0.000000e+00 : f32
    %291 = vector.broadcast %cst_116 : f32 to vector<8x64xf32>
    %292 = arith.subf %291, %290 : vector<8x64xf32>
    %293 = math.exp %292 : vector<8x64xf32>
    %cst_117 = arith.constant 1.000000e+00 : f32
    %294 = vector.broadcast %cst_117 : f32 to vector<8x64xf32>
    %295 = arith.addf %294, %293 : vector<8x64xf32>
    %296 = tpu.reciprocal %295 {approx = true} : vector<8x64xf32> -> vector<8x64xf32>
    %297 = vector.extract_strided_slice %273 {offsets = [0, 128], sizes = [8, 64], strides = [1, 1]} : vector<8x192xf32> to vector<8x64xf32>
    %298 = vector.extract_strided_slice %278 {offsets = [0, 128], sizes = [8, 64], strides = [1, 1]} : vector<8x192xf32> to vector<8x64xf32>
    %299 = arith.mulf %287, %298 : vector<8x64xf32>
    %300 = arith.addf %297, %299 : vector<8x64xf32>
    %301 = math.tanh %300 : vector<8x64xf32>
    %cst_118 = arith.constant 1.000000e+00 : f32
    %302 = vector.broadcast %cst_118 : f32 to vector<8x64xf32>
    %303 = arith.subf %302, %296 : vector<8x64xf32>
    %304 = arith.mulf %303, %301 : vector<8x64xf32>
    %305 = arith.mulf %296, %232 : vector<8x64xf32>
    %306 = arith.addf %304, %305 : vector<8x64xf32>
    %c4_i32 = arith.constant 4 : i32
    %c0_119 = arith.constant 0 : index
    %c0_120 = arith.constant 0 : index
    %307 = vector.load %arg3[%c0_119, %c0_120] : memref<64x192xf32, #tpu.memory_space<vmem>>, vector<64x192xf32>
    %cst_121 = arith.constant dense<0.000000e+00> : vector<8x192xf32>
    %308 = tpu.matmul %268, %307, %cst_121 {dimension_numbers = #tpu.dot_dimension_numbers<[1], [0], [0], [1], [0, 0, 1, 1], [], []>} : vector<8x64xf32>, vector<64x192xf32>, vector<8x192xf32> -> vector<8x192xf32>
    %c0_122 = arith.constant 0 : index
    %c0_123 = arith.constant 0 : index
    %309 = vector.load %arg5[%c0_122, %c0_123] : memref<1x192xf32, #tpu.memory_space<vmem>>, vector<1x192xf32>
    %310 = vector.broadcast %309 : vector<1x192xf32> to vector<8x192xf32>
    %311 = arith.addf %308, %310 : vector<8x192xf32>
    %312 = arith.index_cast %c4_i32 : i32 to index
    %c0_124 = arith.constant 0 : index
    %c0_125 = arith.constant 0 : index
    %313 = vector.load %arg11[%312, %c0_124, %c0_125] : memref<12x8x192xf32, #tpu.memory_space<vmem>>, vector<1x8x192xf32>
    %314 = vector.shape_cast %313 : vector<1x8x192xf32> to vector<8x192xf32>
    %315 = vector.extract_strided_slice %314 {offsets = [0, 0], sizes = [8, 64], strides = [1, 1]} : vector<8x192xf32> to vector<8x64xf32>
    %316 = vector.extract_strided_slice %311 {offsets = [0, 0], sizes = [8, 64], strides = [1, 1]} : vector<8x192xf32> to vector<8x64xf32>
    %317 = arith.addf %315, %316 : vector<8x64xf32>
    %cst_126 = arith.constant 0.000000e+00 : f32
    %318 = vector.broadcast %cst_126 : f32 to vector<8x64xf32>
    %319 = arith.subf %318, %317 : vector<8x64xf32>
    %320 = math.exp %319 : vector<8x64xf32>
    %cst_127 = arith.constant 1.000000e+00 : f32
    %321 = vector.broadcast %cst_127 : f32 to vector<8x64xf32>
    %322 = arith.addf %321, %320 : vector<8x64xf32>
    %323 = tpu.reciprocal %322 {approx = true} : vector<8x64xf32> -> vector<8x64xf32>
    %324 = vector.extract_strided_slice %314 {offsets = [0, 64], sizes = [8, 64], strides = [1, 1]} : vector<8x192xf32> to vector<8x64xf32>
    %325 = vector.extract_strided_slice %311 {offsets = [0, 64], sizes = [8, 64], strides = [1, 1]} : vector<8x192xf32> to vector<8x64xf32>
    %326 = arith.addf %324, %325 : vector<8x64xf32>
    %cst_128 = arith.constant 0.000000e+00 : f32
    %327 = vector.broadcast %cst_128 : f32 to vector<8x64xf32>
    %328 = arith.subf %327, %326 : vector<8x64xf32>
    %329 = math.exp %328 : vector<8x64xf32>
    %cst_129 = arith.constant 1.000000e+00 : f32
    %330 = vector.broadcast %cst_129 : f32 to vector<8x64xf32>
    %331 = arith.addf %330, %329 : vector<8x64xf32>
    %332 = tpu.reciprocal %331 {approx = true} : vector<8x64xf32> -> vector<8x64xf32>
    %333 = vector.extract_strided_slice %314 {offsets = [0, 128], sizes = [8, 64], strides = [1, 1]} : vector<8x192xf32> to vector<8x64xf32>
    %334 = vector.extract_strided_slice %311 {offsets = [0, 128], sizes = [8, 64], strides = [1, 1]} : vector<8x192xf32> to vector<8x64xf32>
    %335 = arith.mulf %323, %334 : vector<8x64xf32>
    %336 = arith.addf %333, %335 : vector<8x64xf32>
    %337 = math.tanh %336 : vector<8x64xf32>
    %cst_130 = arith.constant 1.000000e+00 : f32
    %338 = vector.broadcast %cst_130 : f32 to vector<8x64xf32>
    %339 = arith.subf %338, %332 : vector<8x64xf32>
    %340 = arith.mulf %339, %337 : vector<8x64xf32>
    %341 = arith.mulf %332, %268 : vector<8x64xf32>
    %342 = arith.addf %340, %341 : vector<8x64xf32>
    %c0_131 = arith.constant 0 : index
    %c0_132 = arith.constant 0 : index
    %343 = vector.load %arg6[%c0_131, %c0_132] : memref<64x192xf32, #tpu.memory_space<vmem>>, vector<64x192xf32>
    %cst_133 = arith.constant dense<0.000000e+00> : vector<8x192xf32>
    %344 = tpu.matmul %342, %343, %cst_133 {dimension_numbers = #tpu.dot_dimension_numbers<[1], [0], [0], [1], [0, 0, 1, 1], [], []>} : vector<8x64xf32>, vector<64x192xf32>, vector<8x192xf32> -> vector<8x192xf32>
    %c0_134 = arith.constant 0 : index
    %c0_135 = arith.constant 0 : index
    %345 = vector.load %arg8[%c0_134, %c0_135] : memref<1x192xf32, #tpu.memory_space<vmem>>, vector<1x192xf32>
    %346 = vector.broadcast %345 : vector<1x192xf32> to vector<8x192xf32>
    %347 = arith.addf %344, %346 : vector<8x192xf32>
    %c0_136 = arith.constant 0 : index
    %c0_137 = arith.constant 0 : index
    %348 = vector.load %arg7[%c0_136, %c0_137] : memref<64x192xf32, #tpu.memory_space<vmem>>, vector<64x192xf32>
    %cst_138 = arith.constant dense<0.000000e+00> : vector<8x192xf32>
    %349 = tpu.matmul %306, %348, %cst_138 {dimension_numbers = #tpu.dot_dimension_numbers<[1], [0], [0], [1], [0, 0, 1, 1], [], []>} : vector<8x64xf32>, vector<64x192xf32>, vector<8x192xf32> -> vector<8x192xf32>
    %c0_139 = arith.constant 0 : index
    %c0_140 = arith.constant 0 : index
    %350 = vector.load %arg9[%c0_139, %c0_140] : memref<1x192xf32, #tpu.memory_space<vmem>>, vector<1x192xf32>
    %351 = vector.broadcast %350 : vector<1x192xf32> to vector<8x192xf32>
    %352 = arith.addf %349, %351 : vector<8x192xf32>
    %353 = vector.extract_strided_slice %347 {offsets = [0, 0], sizes = [8, 64], strides = [1, 1]} : vector<8x192xf32> to vector<8x64xf32>
    %354 = vector.extract_strided_slice %352 {offsets = [0, 0], sizes = [8, 64], strides = [1, 1]} : vector<8x192xf32> to vector<8x64xf32>
    %355 = arith.addf %353, %354 : vector<8x64xf32>
    %cst_141 = arith.constant 0.000000e+00 : f32
    %356 = vector.broadcast %cst_141 : f32 to vector<8x64xf32>
    %357 = arith.subf %356, %355 : vector<8x64xf32>
    %358 = math.exp %357 : vector<8x64xf32>
    %cst_142 = arith.constant 1.000000e+00 : f32
    %359 = vector.broadcast %cst_142 : f32 to vector<8x64xf32>
    %360 = arith.addf %359, %358 : vector<8x64xf32>
    %361 = tpu.reciprocal %360 {approx = true} : vector<8x64xf32> -> vector<8x64xf32>
    %362 = vector.extract_strided_slice %347 {offsets = [0, 64], sizes = [8, 64], strides = [1, 1]} : vector<8x192xf32> to vector<8x64xf32>
    %363 = vector.extract_strided_slice %352 {offsets = [0, 64], sizes = [8, 64], strides = [1, 1]} : vector<8x192xf32> to vector<8x64xf32>
    %364 = arith.addf %362, %363 : vector<8x64xf32>
    %cst_143 = arith.constant 0.000000e+00 : f32
    %365 = vector.broadcast %cst_143 : f32 to vector<8x64xf32>
    %366 = arith.subf %365, %364 : vector<8x64xf32>
    %367 = math.exp %366 : vector<8x64xf32>
    %cst_144 = arith.constant 1.000000e+00 : f32
    %368 = vector.broadcast %cst_144 : f32 to vector<8x64xf32>
    %369 = arith.addf %368, %367 : vector<8x64xf32>
    %370 = tpu.reciprocal %369 {approx = true} : vector<8x64xf32> -> vector<8x64xf32>
    %371 = vector.extract_strided_slice %347 {offsets = [0, 128], sizes = [8, 64], strides = [1, 1]} : vector<8x192xf32> to vector<8x64xf32>
    %372 = vector.extract_strided_slice %352 {offsets = [0, 128], sizes = [8, 64], strides = [1, 1]} : vector<8x192xf32> to vector<8x64xf32>
    %373 = arith.mulf %361, %372 : vector<8x64xf32>
    %374 = arith.addf %371, %373 : vector<8x64xf32>
    %375 = math.tanh %374 : vector<8x64xf32>
    %cst_145 = arith.constant 1.000000e+00 : f32
    %376 = vector.broadcast %cst_145 : f32 to vector<8x64xf32>
    %377 = arith.subf %376, %370 : vector<8x64xf32>
    %378 = arith.mulf %377, %375 : vector<8x64xf32>
    %379 = arith.mulf %370, %306 : vector<8x64xf32>
    %380 = arith.addf %378, %379 : vector<8x64xf32>
    %c5_i32 = arith.constant 5 : i32
    %c0_146 = arith.constant 0 : index
    %c0_147 = arith.constant 0 : index
    %381 = vector.load %arg3[%c0_146, %c0_147] : memref<64x192xf32, #tpu.memory_space<vmem>>, vector<64x192xf32>
    %cst_148 = arith.constant dense<0.000000e+00> : vector<8x192xf32>
    %382 = tpu.matmul %342, %381, %cst_148 {dimension_numbers = #tpu.dot_dimension_numbers<[1], [0], [0], [1], [0, 0, 1, 1], [], []>} : vector<8x64xf32>, vector<64x192xf32>, vector<8x192xf32> -> vector<8x192xf32>
    %c0_149 = arith.constant 0 : index
    %c0_150 = arith.constant 0 : index
    %383 = vector.load %arg5[%c0_149, %c0_150] : memref<1x192xf32, #tpu.memory_space<vmem>>, vector<1x192xf32>
    %384 = vector.broadcast %383 : vector<1x192xf32> to vector<8x192xf32>
    %385 = arith.addf %382, %384 : vector<8x192xf32>
    %386 = arith.index_cast %c5_i32 : i32 to index
    %c0_151 = arith.constant 0 : index
    %c0_152 = arith.constant 0 : index
    %387 = vector.load %arg11[%386, %c0_151, %c0_152] : memref<12x8x192xf32, #tpu.memory_space<vmem>>, vector<1x8x192xf32>
    %388 = vector.shape_cast %387 : vector<1x8x192xf32> to vector<8x192xf32>
    %389 = vector.extract_strided_slice %388 {offsets = [0, 0], sizes = [8, 64], strides = [1, 1]} : vector<8x192xf32> to vector<8x64xf32>
    %390 = vector.extract_strided_slice %385 {offsets = [0, 0], sizes = [8, 64], strides = [1, 1]} : vector<8x192xf32> to vector<8x64xf32>
    %391 = arith.addf %389, %390 : vector<8x64xf32>
    %cst_153 = arith.constant 0.000000e+00 : f32
    %392 = vector.broadcast %cst_153 : f32 to vector<8x64xf32>
    %393 = arith.subf %392, %391 : vector<8x64xf32>
    %394 = math.exp %393 : vector<8x64xf32>
    %cst_154 = arith.constant 1.000000e+00 : f32
    %395 = vector.broadcast %cst_154 : f32 to vector<8x64xf32>
    %396 = arith.addf %395, %394 : vector<8x64xf32>
    %397 = tpu.reciprocal %396 {approx = true} : vector<8x64xf32> -> vector<8x64xf32>
    %398 = vector.extract_strided_slice %388 {offsets = [0, 64], sizes = [8, 64], strides = [1, 1]} : vector<8x192xf32> to vector<8x64xf32>
    %399 = vector.extract_strided_slice %385 {offsets = [0, 64], sizes = [8, 64], strides = [1, 1]} : vector<8x192xf32> to vector<8x64xf32>
    %400 = arith.addf %398, %399 : vector<8x64xf32>
    %cst_155 = arith.constant 0.000000e+00 : f32
    %401 = vector.broadcast %cst_155 : f32 to vector<8x64xf32>
    %402 = arith.subf %401, %400 : vector<8x64xf32>
    %403 = math.exp %402 : vector<8x64xf32>
    %cst_156 = arith.constant 1.000000e+00 : f32
    %404 = vector.broadcast %cst_156 : f32 to vector<8x64xf32>
    %405 = arith.addf %404, %403 : vector<8x64xf32>
    %406 = tpu.reciprocal %405 {approx = true} : vector<8x64xf32> -> vector<8x64xf32>
    %407 = vector.extract_strided_slice %388 {offsets = [0, 128], sizes = [8, 64], strides = [1, 1]} : vector<8x192xf32> to vector<8x64xf32>
    %408 = vector.extract_strided_slice %385 {offsets = [0, 128], sizes = [8, 64], strides = [1, 1]} : vector<8x192xf32> to vector<8x64xf32>
    %409 = arith.mulf %397, %408 : vector<8x64xf32>
    %410 = arith.addf %407, %409 : vector<8x64xf32>
    %411 = math.tanh %410 : vector<8x64xf32>
    %cst_157 = arith.constant 1.000000e+00 : f32
    %412 = vector.broadcast %cst_157 : f32 to vector<8x64xf32>
    %413 = arith.subf %412, %406 : vector<8x64xf32>
    %414 = arith.mulf %413, %411 : vector<8x64xf32>
    %415 = arith.mulf %406, %342 : vector<8x64xf32>
    %416 = arith.addf %414, %415 : vector<8x64xf32>
    %c0_158 = arith.constant 0 : index
    %c0_159 = arith.constant 0 : index
    %417 = vector.load %arg6[%c0_158, %c0_159] : memref<64x192xf32, #tpu.memory_space<vmem>>, vector<64x192xf32>
    %cst_160 = arith.constant dense<0.000000e+00> : vector<8x192xf32>
    %418 = tpu.matmul %416, %417, %cst_160 {dimension_numbers = #tpu.dot_dimension_numbers<[1], [0], [0], [1], [0, 0, 1, 1], [], []>} : vector<8x64xf32>, vector<64x192xf32>, vector<8x192xf32> -> vector<8x192xf32>
    %c0_161 = arith.constant 0 : index
    %c0_162 = arith.constant 0 : index
    %419 = vector.load %arg8[%c0_161, %c0_162] : memref<1x192xf32, #tpu.memory_space<vmem>>, vector<1x192xf32>
    %420 = vector.broadcast %419 : vector<1x192xf32> to vector<8x192xf32>
    %421 = arith.addf %418, %420 : vector<8x192xf32>
    %c0_163 = arith.constant 0 : index
    %c0_164 = arith.constant 0 : index
    %422 = vector.load %arg7[%c0_163, %c0_164] : memref<64x192xf32, #tpu.memory_space<vmem>>, vector<64x192xf32>
    %cst_165 = arith.constant dense<0.000000e+00> : vector<8x192xf32>
    %423 = tpu.matmul %380, %422, %cst_165 {dimension_numbers = #tpu.dot_dimension_numbers<[1], [0], [0], [1], [0, 0, 1, 1], [], []>} : vector<8x64xf32>, vector<64x192xf32>, vector<8x192xf32> -> vector<8x192xf32>
    %c0_166 = arith.constant 0 : index
    %c0_167 = arith.constant 0 : index
    %424 = vector.load %arg9[%c0_166, %c0_167] : memref<1x192xf32, #tpu.memory_space<vmem>>, vector<1x192xf32>
    %425 = vector.broadcast %424 : vector<1x192xf32> to vector<8x192xf32>
    %426 = arith.addf %423, %425 : vector<8x192xf32>
    %427 = vector.extract_strided_slice %421 {offsets = [0, 0], sizes = [8, 64], strides = [1, 1]} : vector<8x192xf32> to vector<8x64xf32>
    %428 = vector.extract_strided_slice %426 {offsets = [0, 0], sizes = [8, 64], strides = [1, 1]} : vector<8x192xf32> to vector<8x64xf32>
    %429 = arith.addf %427, %428 : vector<8x64xf32>
    %cst_168 = arith.constant 0.000000e+00 : f32
    %430 = vector.broadcast %cst_168 : f32 to vector<8x64xf32>
    %431 = arith.subf %430, %429 : vector<8x64xf32>
    %432 = math.exp %431 : vector<8x64xf32>
    %cst_169 = arith.constant 1.000000e+00 : f32
    %433 = vector.broadcast %cst_169 : f32 to vector<8x64xf32>
    %434 = arith.addf %433, %432 : vector<8x64xf32>
    %435 = tpu.reciprocal %434 {approx = true} : vector<8x64xf32> -> vector<8x64xf32>
    %436 = vector.extract_strided_slice %421 {offsets = [0, 64], sizes = [8, 64], strides = [1, 1]} : vector<8x192xf32> to vector<8x64xf32>
    %437 = vector.extract_strided_slice %426 {offsets = [0, 64], sizes = [8, 64], strides = [1, 1]} : vector<8x192xf32> to vector<8x64xf32>
    %438 = arith.addf %436, %437 : vector<8x64xf32>
    %cst_170 = arith.constant 0.000000e+00 : f32
    %439 = vector.broadcast %cst_170 : f32 to vector<8x64xf32>
    %440 = arith.subf %439, %438 : vector<8x64xf32>
    %441 = math.exp %440 : vector<8x64xf32>
    %cst_171 = arith.constant 1.000000e+00 : f32
    %442 = vector.broadcast %cst_171 : f32 to vector<8x64xf32>
    %443 = arith.addf %442, %441 : vector<8x64xf32>
    %444 = tpu.reciprocal %443 {approx = true} : vector<8x64xf32> -> vector<8x64xf32>
    %445 = vector.extract_strided_slice %421 {offsets = [0, 128], sizes = [8, 64], strides = [1, 1]} : vector<8x192xf32> to vector<8x64xf32>
    %446 = vector.extract_strided_slice %426 {offsets = [0, 128], sizes = [8, 64], strides = [1, 1]} : vector<8x192xf32> to vector<8x64xf32>
    %447 = arith.mulf %435, %446 : vector<8x64xf32>
    %448 = arith.addf %445, %447 : vector<8x64xf32>
    %449 = math.tanh %448 : vector<8x64xf32>
    %cst_172 = arith.constant 1.000000e+00 : f32
    %450 = vector.broadcast %cst_172 : f32 to vector<8x64xf32>
    %451 = arith.subf %450, %444 : vector<8x64xf32>
    %452 = arith.mulf %451, %449 : vector<8x64xf32>
    %453 = arith.mulf %444, %380 : vector<8x64xf32>
    %454 = arith.addf %452, %453 : vector<8x64xf32>
    %c6_i32 = arith.constant 6 : i32
    %c0_173 = arith.constant 0 : index
    %c0_174 = arith.constant 0 : index
    %455 = vector.load %arg3[%c0_173, %c0_174] : memref<64x192xf32, #tpu.memory_space<vmem>>, vector<64x192xf32>
    %cst_175 = arith.constant dense<0.000000e+00> : vector<8x192xf32>
    %456 = tpu.matmul %416, %455, %cst_175 {dimension_numbers = #tpu.dot_dimension_numbers<[1], [0], [0], [1], [0, 0, 1, 1], [], []>} : vector<8x64xf32>, vector<64x192xf32>, vector<8x192xf32> -> vector<8x192xf32>
    %c0_176 = arith.constant 0 : index
    %c0_177 = arith.constant 0 : index
    %457 = vector.load %arg5[%c0_176, %c0_177] : memref<1x192xf32, #tpu.memory_space<vmem>>, vector<1x192xf32>
    %458 = vector.broadcast %457 : vector<1x192xf32> to vector<8x192xf32>
    %459 = arith.addf %456, %458 : vector<8x192xf32>
    %460 = arith.index_cast %c6_i32 : i32 to index
    %c0_178 = arith.constant 0 : index
    %c0_179 = arith.constant 0 : index
    %461 = vector.load %arg11[%460, %c0_178, %c0_179] : memref<12x8x192xf32, #tpu.memory_space<vmem>>, vector<1x8x192xf32>
    %462 = vector.shape_cast %461 : vector<1x8x192xf32> to vector<8x192xf32>
    %463 = vector.extract_strided_slice %462 {offsets = [0, 0], sizes = [8, 64], strides = [1, 1]} : vector<8x192xf32> to vector<8x64xf32>
    %464 = vector.extract_strided_slice %459 {offsets = [0, 0], sizes = [8, 64], strides = [1, 1]} : vector<8x192xf32> to vector<8x64xf32>
    %465 = arith.addf %463, %464 : vector<8x64xf32>
    %cst_180 = arith.constant 0.000000e+00 : f32
    %466 = vector.broadcast %cst_180 : f32 to vector<8x64xf32>
    %467 = arith.subf %466, %465 : vector<8x64xf32>
    %468 = math.exp %467 : vector<8x64xf32>
    %cst_181 = arith.constant 1.000000e+00 : f32
    %469 = vector.broadcast %cst_181 : f32 to vector<8x64xf32>
    %470 = arith.addf %469, %468 : vector<8x64xf32>
    %471 = tpu.reciprocal %470 {approx = true} : vector<8x64xf32> -> vector<8x64xf32>
    %472 = vector.extract_strided_slice %462 {offsets = [0, 64], sizes = [8, 64], strides = [1, 1]} : vector<8x192xf32> to vector<8x64xf32>
    %473 = vector.extract_strided_slice %459 {offsets = [0, 64], sizes = [8, 64], strides = [1, 1]} : vector<8x192xf32> to vector<8x64xf32>
    %474 = arith.addf %472, %473 : vector<8x64xf32>
    %cst_182 = arith.constant 0.000000e+00 : f32
    %475 = vector.broadcast %cst_182 : f32 to vector<8x64xf32>
    %476 = arith.subf %475, %474 : vector<8x64xf32>
    %477 = math.exp %476 : vector<8x64xf32>
    %cst_183 = arith.constant 1.000000e+00 : f32
    %478 = vector.broadcast %cst_183 : f32 to vector<8x64xf32>
    %479 = arith.addf %478, %477 : vector<8x64xf32>
    %480 = tpu.reciprocal %479 {approx = true} : vector<8x64xf32> -> vector<8x64xf32>
    %481 = vector.extract_strided_slice %462 {offsets = [0, 128], sizes = [8, 64], strides = [1, 1]} : vector<8x192xf32> to vector<8x64xf32>
    %482 = vector.extract_strided_slice %459 {offsets = [0, 128], sizes = [8, 64], strides = [1, 1]} : vector<8x192xf32> to vector<8x64xf32>
    %483 = arith.mulf %471, %482 : vector<8x64xf32>
    %484 = arith.addf %481, %483 : vector<8x64xf32>
    %485 = math.tanh %484 : vector<8x64xf32>
    %cst_184 = arith.constant 1.000000e+00 : f32
    %486 = vector.broadcast %cst_184 : f32 to vector<8x64xf32>
    %487 = arith.subf %486, %480 : vector<8x64xf32>
    %488 = arith.mulf %487, %485 : vector<8x64xf32>
    %489 = arith.mulf %480, %416 : vector<8x64xf32>
    %490 = arith.addf %488, %489 : vector<8x64xf32>
    %c0_185 = arith.constant 0 : index
    %c0_186 = arith.constant 0 : index
    %491 = vector.load %arg6[%c0_185, %c0_186] : memref<64x192xf32, #tpu.memory_space<vmem>>, vector<64x192xf32>
    %cst_187 = arith.constant dense<0.000000e+00> : vector<8x192xf32>
    %492 = tpu.matmul %490, %491, %cst_187 {dimension_numbers = #tpu.dot_dimension_numbers<[1], [0], [0], [1], [0, 0, 1, 1], [], []>} : vector<8x64xf32>, vector<64x192xf32>, vector<8x192xf32> -> vector<8x192xf32>
    %c0_188 = arith.constant 0 : index
    %c0_189 = arith.constant 0 : index
    %493 = vector.load %arg8[%c0_188, %c0_189] : memref<1x192xf32, #tpu.memory_space<vmem>>, vector<1x192xf32>
    %494 = vector.broadcast %493 : vector<1x192xf32> to vector<8x192xf32>
    %495 = arith.addf %492, %494 : vector<8x192xf32>
    %c0_190 = arith.constant 0 : index
    %c0_191 = arith.constant 0 : index
    %496 = vector.load %arg7[%c0_190, %c0_191] : memref<64x192xf32, #tpu.memory_space<vmem>>, vector<64x192xf32>
    %cst_192 = arith.constant dense<0.000000e+00> : vector<8x192xf32>
    %497 = tpu.matmul %454, %496, %cst_192 {dimension_numbers = #tpu.dot_dimension_numbers<[1], [0], [0], [1], [0, 0, 1, 1], [], []>} : vector<8x64xf32>, vector<64x192xf32>, vector<8x192xf32> -> vector<8x192xf32>
    %c0_193 = arith.constant 0 : index
    %c0_194 = arith.constant 0 : index
    %498 = vector.load %arg9[%c0_193, %c0_194] : memref<1x192xf32, #tpu.memory_space<vmem>>, vector<1x192xf32>
    %499 = vector.broadcast %498 : vector<1x192xf32> to vector<8x192xf32>
    %500 = arith.addf %497, %499 : vector<8x192xf32>
    %501 = vector.extract_strided_slice %495 {offsets = [0, 0], sizes = [8, 64], strides = [1, 1]} : vector<8x192xf32> to vector<8x64xf32>
    %502 = vector.extract_strided_slice %500 {offsets = [0, 0], sizes = [8, 64], strides = [1, 1]} : vector<8x192xf32> to vector<8x64xf32>
    %503 = arith.addf %501, %502 : vector<8x64xf32>
    %cst_195 = arith.constant 0.000000e+00 : f32
    %504 = vector.broadcast %cst_195 : f32 to vector<8x64xf32>
    %505 = arith.subf %504, %503 : vector<8x64xf32>
    %506 = math.exp %505 : vector<8x64xf32>
    %cst_196 = arith.constant 1.000000e+00 : f32
    %507 = vector.broadcast %cst_196 : f32 to vector<8x64xf32>
    %508 = arith.addf %507, %506 : vector<8x64xf32>
    %509 = tpu.reciprocal %508 {approx = true} : vector<8x64xf32> -> vector<8x64xf32>
    %510 = vector.extract_strided_slice %495 {offsets = [0, 64], sizes = [8, 64], strides = [1, 1]} : vector<8x192xf32> to vector<8x64xf32>
    %511 = vector.extract_strided_slice %500 {offsets = [0, 64], sizes = [8, 64], strides = [1, 1]} : vector<8x192xf32> to vector<8x64xf32>
    %512 = arith.addf %510, %511 : vector<8x64xf32>
    %cst_197 = arith.constant 0.000000e+00 : f32
    %513 = vector.broadcast %cst_197 : f32 to vector<8x64xf32>
    %514 = arith.subf %513, %512 : vector<8x64xf32>
    %515 = math.exp %514 : vector<8x64xf32>
    %cst_198 = arith.constant 1.000000e+00 : f32
    %516 = vector.broadcast %cst_198 : f32 to vector<8x64xf32>
    %517 = arith.addf %516, %515 : vector<8x64xf32>
    %518 = tpu.reciprocal %517 {approx = true} : vector<8x64xf32> -> vector<8x64xf32>
    %519 = vector.extract_strided_slice %495 {offsets = [0, 128], sizes = [8, 64], strides = [1, 1]} : vector<8x192xf32> to vector<8x64xf32>
    %520 = vector.extract_strided_slice %500 {offsets = [0, 128], sizes = [8, 64], strides = [1, 1]} : vector<8x192xf32> to vector<8x64xf32>
    %521 = arith.mulf %509, %520 : vector<8x64xf32>
    %522 = arith.addf %519, %521 : vector<8x64xf32>
    %523 = math.tanh %522 : vector<8x64xf32>
    %cst_199 = arith.constant 1.000000e+00 : f32
    %524 = vector.broadcast %cst_199 : f32 to vector<8x64xf32>
    %525 = arith.subf %524, %518 : vector<8x64xf32>
    %526 = arith.mulf %525, %523 : vector<8x64xf32>
    %527 = arith.mulf %518, %454 : vector<8x64xf32>
    %528 = arith.addf %526, %527 : vector<8x64xf32>
    %c7_i32 = arith.constant 7 : i32
    %c0_200 = arith.constant 0 : index
    %c0_201 = arith.constant 0 : index
    %529 = vector.load %arg3[%c0_200, %c0_201] : memref<64x192xf32, #tpu.memory_space<vmem>>, vector<64x192xf32>
    %cst_202 = arith.constant dense<0.000000e+00> : vector<8x192xf32>
    %530 = tpu.matmul %490, %529, %cst_202 {dimension_numbers = #tpu.dot_dimension_numbers<[1], [0], [0], [1], [0, 0, 1, 1], [], []>} : vector<8x64xf32>, vector<64x192xf32>, vector<8x192xf32> -> vector<8x192xf32>
    %c0_203 = arith.constant 0 : index
    %c0_204 = arith.constant 0 : index
    %531 = vector.load %arg5[%c0_203, %c0_204] : memref<1x192xf32, #tpu.memory_space<vmem>>, vector<1x192xf32>
    %532 = vector.broadcast %531 : vector<1x192xf32> to vector<8x192xf32>
    %533 = arith.addf %530, %532 : vector<8x192xf32>
    %534 = arith.index_cast %c7_i32 : i32 to index
    %c0_205 = arith.constant 0 : index
    %c0_206 = arith.constant 0 : index
    %535 = vector.load %arg11[%534, %c0_205, %c0_206] : memref<12x8x192xf32, #tpu.memory_space<vmem>>, vector<1x8x192xf32>
    %536 = vector.shape_cast %535 : vector<1x8x192xf32> to vector<8x192xf32>
    %537 = vector.extract_strided_slice %536 {offsets = [0, 0], sizes = [8, 64], strides = [1, 1]} : vector<8x192xf32> to vector<8x64xf32>
    %538 = vector.extract_strided_slice %533 {offsets = [0, 0], sizes = [8, 64], strides = [1, 1]} : vector<8x192xf32> to vector<8x64xf32>
    %539 = arith.addf %537, %538 : vector<8x64xf32>
    %cst_207 = arith.constant 0.000000e+00 : f32
    %540 = vector.broadcast %cst_207 : f32 to vector<8x64xf32>
    %541 = arith.subf %540, %539 : vector<8x64xf32>
    %542 = math.exp %541 : vector<8x64xf32>
    %cst_208 = arith.constant 1.000000e+00 : f32
    %543 = vector.broadcast %cst_208 : f32 to vector<8x64xf32>
    %544 = arith.addf %543, %542 : vector<8x64xf32>
    %545 = tpu.reciprocal %544 {approx = true} : vector<8x64xf32> -> vector<8x64xf32>
    %546 = vector.extract_strided_slice %536 {offsets = [0, 64], sizes = [8, 64], strides = [1, 1]} : vector<8x192xf32> to vector<8x64xf32>
    %547 = vector.extract_strided_slice %533 {offsets = [0, 64], sizes = [8, 64], strides = [1, 1]} : vector<8x192xf32> to vector<8x64xf32>
    %548 = arith.addf %546, %547 : vector<8x64xf32>
    %cst_209 = arith.constant 0.000000e+00 : f32
    %549 = vector.broadcast %cst_209 : f32 to vector<8x64xf32>
    %550 = arith.subf %549, %548 : vector<8x64xf32>
    %551 = math.exp %550 : vector<8x64xf32>
    %cst_210 = arith.constant 1.000000e+00 : f32
    %552 = vector.broadcast %cst_210 : f32 to vector<8x64xf32>
    %553 = arith.addf %552, %551 : vector<8x64xf32>
    %554 = tpu.reciprocal %553 {approx = true} : vector<8x64xf32> -> vector<8x64xf32>
    %555 = vector.extract_strided_slice %536 {offsets = [0, 128], sizes = [8, 64], strides = [1, 1]} : vector<8x192xf32> to vector<8x64xf32>
    %556 = vector.extract_strided_slice %533 {offsets = [0, 128], sizes = [8, 64], strides = [1, 1]} : vector<8x192xf32> to vector<8x64xf32>
    %557 = arith.mulf %545, %556 : vector<8x64xf32>
    %558 = arith.addf %555, %557 : vector<8x64xf32>
    %559 = math.tanh %558 : vector<8x64xf32>
    %cst_211 = arith.constant 1.000000e+00 : f32
    %560 = vector.broadcast %cst_211 : f32 to vector<8x64xf32>
    %561 = arith.subf %560, %554 : vector<8x64xf32>
    %562 = arith.mulf %561, %559 : vector<8x64xf32>
    %563 = arith.mulf %554, %490 : vector<8x64xf32>
    %564 = arith.addf %562, %563 : vector<8x64xf32>
    %c0_212 = arith.constant 0 : index
    %c0_213 = arith.constant 0 : index
    %565 = vector.load %arg6[%c0_212, %c0_213] : memref<64x192xf32, #tpu.memory_space<vmem>>, vector<64x192xf32>
    %cst_214 = arith.constant dense<0.000000e+00> : vector<8x192xf32>
    %566 = tpu.matmul %564, %565, %cst_214 {dimension_numbers = #tpu.dot_dimension_numbers<[1], [0], [0], [1], [0, 0, 1, 1], [], []>} : vector<8x64xf32>, vector<64x192xf32>, vector<8x192xf32> -> vector<8x192xf32>
    %c0_215 = arith.constant 0 : index
    %c0_216 = arith.constant 0 : index
    %567 = vector.load %arg8[%c0_215, %c0_216] : memref<1x192xf32, #tpu.memory_space<vmem>>, vector<1x192xf32>
    %568 = vector.broadcast %567 : vector<1x192xf32> to vector<8x192xf32>
    %569 = arith.addf %566, %568 : vector<8x192xf32>
    %c0_217 = arith.constant 0 : index
    %c0_218 = arith.constant 0 : index
    %570 = vector.load %arg7[%c0_217, %c0_218] : memref<64x192xf32, #tpu.memory_space<vmem>>, vector<64x192xf32>
    %cst_219 = arith.constant dense<0.000000e+00> : vector<8x192xf32>
    %571 = tpu.matmul %528, %570, %cst_219 {dimension_numbers = #tpu.dot_dimension_numbers<[1], [0], [0], [1], [0, 0, 1, 1], [], []>} : vector<8x64xf32>, vector<64x192xf32>, vector<8x192xf32> -> vector<8x192xf32>
    %c0_220 = arith.constant 0 : index
    %c0_221 = arith.constant 0 : index
    %572 = vector.load %arg9[%c0_220, %c0_221] : memref<1x192xf32, #tpu.memory_space<vmem>>, vector<1x192xf32>
    %573 = vector.broadcast %572 : vector<1x192xf32> to vector<8x192xf32>
    %574 = arith.addf %571, %573 : vector<8x192xf32>
    %575 = vector.extract_strided_slice %569 {offsets = [0, 0], sizes = [8, 64], strides = [1, 1]} : vector<8x192xf32> to vector<8x64xf32>
    %576 = vector.extract_strided_slice %574 {offsets = [0, 0], sizes = [8, 64], strides = [1, 1]} : vector<8x192xf32> to vector<8x64xf32>
    %577 = arith.addf %575, %576 : vector<8x64xf32>
    %cst_222 = arith.constant 0.000000e+00 : f32
    %578 = vector.broadcast %cst_222 : f32 to vector<8x64xf32>
    %579 = arith.subf %578, %577 : vector<8x64xf32>
    %580 = math.exp %579 : vector<8x64xf32>
    %cst_223 = arith.constant 1.000000e+00 : f32
    %581 = vector.broadcast %cst_223 : f32 to vector<8x64xf32>
    %582 = arith.addf %581, %580 : vector<8x64xf32>
    %583 = tpu.reciprocal %582 {approx = true} : vector<8x64xf32> -> vector<8x64xf32>
    %584 = vector.extract_strided_slice %569 {offsets = [0, 64], sizes = [8, 64], strides = [1, 1]} : vector<8x192xf32> to vector<8x64xf32>
    %585 = vector.extract_strided_slice %574 {offsets = [0, 64], sizes = [8, 64], strides = [1, 1]} : vector<8x192xf32> to vector<8x64xf32>
    %586 = arith.addf %584, %585 : vector<8x64xf32>
    %cst_224 = arith.constant 0.000000e+00 : f32
    %587 = vector.broadcast %cst_224 : f32 to vector<8x64xf32>
    %588 = arith.subf %587, %586 : vector<8x64xf32>
    %589 = math.exp %588 : vector<8x64xf32>
    %cst_225 = arith.constant 1.000000e+00 : f32
    %590 = vector.broadcast %cst_225 : f32 to vector<8x64xf32>
    %591 = arith.addf %590, %589 : vector<8x64xf32>
    %592 = tpu.reciprocal %591 {approx = true} : vector<8x64xf32> -> vector<8x64xf32>
    %593 = vector.extract_strided_slice %569 {offsets = [0, 128], sizes = [8, 64], strides = [1, 1]} : vector<8x192xf32> to vector<8x64xf32>
    %594 = vector.extract_strided_slice %574 {offsets = [0, 128], sizes = [8, 64], strides = [1, 1]} : vector<8x192xf32> to vector<8x64xf32>
    %595 = arith.mulf %583, %594 : vector<8x64xf32>
    %596 = arith.addf %593, %595 : vector<8x64xf32>
    %597 = math.tanh %596 : vector<8x64xf32>
    %cst_226 = arith.constant 1.000000e+00 : f32
    %598 = vector.broadcast %cst_226 : f32 to vector<8x64xf32>
    %599 = arith.subf %598, %592 : vector<8x64xf32>
    %600 = arith.mulf %599, %597 : vector<8x64xf32>
    %601 = arith.mulf %592, %528 : vector<8x64xf32>
    %602 = arith.addf %600, %601 : vector<8x64xf32>
    %c8_i32 = arith.constant 8 : i32
    %c0_227 = arith.constant 0 : index
    %c0_228 = arith.constant 0 : index
    %603 = vector.load %arg3[%c0_227, %c0_228] : memref<64x192xf32, #tpu.memory_space<vmem>>, vector<64x192xf32>
    %cst_229 = arith.constant dense<0.000000e+00> : vector<8x192xf32>
    %604 = tpu.matmul %564, %603, %cst_229 {dimension_numbers = #tpu.dot_dimension_numbers<[1], [0], [0], [1], [0, 0, 1, 1], [], []>} : vector<8x64xf32>, vector<64x192xf32>, vector<8x192xf32> -> vector<8x192xf32>
    %c0_230 = arith.constant 0 : index
    %c0_231 = arith.constant 0 : index
    %605 = vector.load %arg5[%c0_230, %c0_231] : memref<1x192xf32, #tpu.memory_space<vmem>>, vector<1x192xf32>
    %606 = vector.broadcast %605 : vector<1x192xf32> to vector<8x192xf32>
    %607 = arith.addf %604, %606 : vector<8x192xf32>
    %608 = arith.index_cast %c8_i32 : i32 to index
    %c0_232 = arith.constant 0 : index
    %c0_233 = arith.constant 0 : index
    %609 = vector.load %arg11[%608, %c0_232, %c0_233] : memref<12x8x192xf32, #tpu.memory_space<vmem>>, vector<1x8x192xf32>
    %610 = vector.shape_cast %609 : vector<1x8x192xf32> to vector<8x192xf32>
    %611 = vector.extract_strided_slice %610 {offsets = [0, 0], sizes = [8, 64], strides = [1, 1]} : vector<8x192xf32> to vector<8x64xf32>
    %612 = vector.extract_strided_slice %607 {offsets = [0, 0], sizes = [8, 64], strides = [1, 1]} : vector<8x192xf32> to vector<8x64xf32>
    %613 = arith.addf %611, %612 : vector<8x64xf32>
    %cst_234 = arith.constant 0.000000e+00 : f32
    %614 = vector.broadcast %cst_234 : f32 to vector<8x64xf32>
    %615 = arith.subf %614, %613 : vector<8x64xf32>
    %616 = math.exp %615 : vector<8x64xf32>
    %cst_235 = arith.constant 1.000000e+00 : f32
    %617 = vector.broadcast %cst_235 : f32 to vector<8x64xf32>
    %618 = arith.addf %617, %616 : vector<8x64xf32>
    %619 = tpu.reciprocal %618 {approx = true} : vector<8x64xf32> -> vector<8x64xf32>
    %620 = vector.extract_strided_slice %610 {offsets = [0, 64], sizes = [8, 64], strides = [1, 1]} : vector<8x192xf32> to vector<8x64xf32>
    %621 = vector.extract_strided_slice %607 {offsets = [0, 64], sizes = [8, 64], strides = [1, 1]} : vector<8x192xf32> to vector<8x64xf32>
    %622 = arith.addf %620, %621 : vector<8x64xf32>
    %cst_236 = arith.constant 0.000000e+00 : f32
    %623 = vector.broadcast %cst_236 : f32 to vector<8x64xf32>
    %624 = arith.subf %623, %622 : vector<8x64xf32>
    %625 = math.exp %624 : vector<8x64xf32>
    %cst_237 = arith.constant 1.000000e+00 : f32
    %626 = vector.broadcast %cst_237 : f32 to vector<8x64xf32>
    %627 = arith.addf %626, %625 : vector<8x64xf32>
    %628 = tpu.reciprocal %627 {approx = true} : vector<8x64xf32> -> vector<8x64xf32>
    %629 = vector.extract_strided_slice %610 {offsets = [0, 128], sizes = [8, 64], strides = [1, 1]} : vector<8x192xf32> to vector<8x64xf32>
    %630 = vector.extract_strided_slice %607 {offsets = [0, 128], sizes = [8, 64], strides = [1, 1]} : vector<8x192xf32> to vector<8x64xf32>
    %631 = arith.mulf %619, %630 : vector<8x64xf32>
    %632 = arith.addf %629, %631 : vector<8x64xf32>
    %633 = math.tanh %632 : vector<8x64xf32>
    %cst_238 = arith.constant 1.000000e+00 : f32
    %634 = vector.broadcast %cst_238 : f32 to vector<8x64xf32>
    %635 = arith.subf %634, %628 : vector<8x64xf32>
    %636 = arith.mulf %635, %633 : vector<8x64xf32>
    %637 = arith.mulf %628, %564 : vector<8x64xf32>
    %638 = arith.addf %636, %637 : vector<8x64xf32>
    %c0_239 = arith.constant 0 : index
    %c0_240 = arith.constant 0 : index
    %639 = vector.load %arg6[%c0_239, %c0_240] : memref<64x192xf32, #tpu.memory_space<vmem>>, vector<64x192xf32>
    %cst_241 = arith.constant dense<0.000000e+00> : vector<8x192xf32>
    %640 = tpu.matmul %638, %639, %cst_241 {dimension_numbers = #tpu.dot_dimension_numbers<[1], [0], [0], [1], [0, 0, 1, 1], [], []>} : vector<8x64xf32>, vector<64x192xf32>, vector<8x192xf32> -> vector<8x192xf32>
    %c0_242 = arith.constant 0 : index
    %c0_243 = arith.constant 0 : index
    %641 = vector.load %arg8[%c0_242, %c0_243] : memref<1x192xf32, #tpu.memory_space<vmem>>, vector<1x192xf32>
    %642 = vector.broadcast %641 : vector<1x192xf32> to vector<8x192xf32>
    %643 = arith.addf %640, %642 : vector<8x192xf32>
    %c0_244 = arith.constant 0 : index
    %c0_245 = arith.constant 0 : index
    %644 = vector.load %arg7[%c0_244, %c0_245] : memref<64x192xf32, #tpu.memory_space<vmem>>, vector<64x192xf32>
    %cst_246 = arith.constant dense<0.000000e+00> : vector<8x192xf32>
    %645 = tpu.matmul %602, %644, %cst_246 {dimension_numbers = #tpu.dot_dimension_numbers<[1], [0], [0], [1], [0, 0, 1, 1], [], []>} : vector<8x64xf32>, vector<64x192xf32>, vector<8x192xf32> -> vector<8x192xf32>
    %c0_247 = arith.constant 0 : index
    %c0_248 = arith.constant 0 : index
    %646 = vector.load %arg9[%c0_247, %c0_248] : memref<1x192xf32, #tpu.memory_space<vmem>>, vector<1x192xf32>
    %647 = vector.broadcast %646 : vector<1x192xf32> to vector<8x192xf32>
    %648 = arith.addf %645, %647 : vector<8x192xf32>
    %649 = vector.extract_strided_slice %643 {offsets = [0, 0], sizes = [8, 64], strides = [1, 1]} : vector<8x192xf32> to vector<8x64xf32>
    %650 = vector.extract_strided_slice %648 {offsets = [0, 0], sizes = [8, 64], strides = [1, 1]} : vector<8x192xf32> to vector<8x64xf32>
    %651 = arith.addf %649, %650 : vector<8x64xf32>
    %cst_249 = arith.constant 0.000000e+00 : f32
    %652 = vector.broadcast %cst_249 : f32 to vector<8x64xf32>
    %653 = arith.subf %652, %651 : vector<8x64xf32>
    %654 = math.exp %653 : vector<8x64xf32>
    %cst_250 = arith.constant 1.000000e+00 : f32
    %655 = vector.broadcast %cst_250 : f32 to vector<8x64xf32>
    %656 = arith.addf %655, %654 : vector<8x64xf32>
    %657 = tpu.reciprocal %656 {approx = true} : vector<8x64xf32> -> vector<8x64xf32>
    %658 = vector.extract_strided_slice %643 {offsets = [0, 64], sizes = [8, 64], strides = [1, 1]} : vector<8x192xf32> to vector<8x64xf32>
    %659 = vector.extract_strided_slice %648 {offsets = [0, 64], sizes = [8, 64], strides = [1, 1]} : vector<8x192xf32> to vector<8x64xf32>
    %660 = arith.addf %658, %659 : vector<8x64xf32>
    %cst_251 = arith.constant 0.000000e+00 : f32
    %661 = vector.broadcast %cst_251 : f32 to vector<8x64xf32>
    %662 = arith.subf %661, %660 : vector<8x64xf32>
    %663 = math.exp %662 : vector<8x64xf32>
    %cst_252 = arith.constant 1.000000e+00 : f32
    %664 = vector.broadcast %cst_252 : f32 to vector<8x64xf32>
    %665 = arith.addf %664, %663 : vector<8x64xf32>
    %666 = tpu.reciprocal %665 {approx = true} : vector<8x64xf32> -> vector<8x64xf32>
    %667 = vector.extract_strided_slice %643 {offsets = [0, 128], sizes = [8, 64], strides = [1, 1]} : vector<8x192xf32> to vector<8x64xf32>
    %668 = vector.extract_strided_slice %648 {offsets = [0, 128], sizes = [8, 64], strides = [1, 1]} : vector<8x192xf32> to vector<8x64xf32>
    %669 = arith.mulf %657, %668 : vector<8x64xf32>
    %670 = arith.addf %667, %669 : vector<8x64xf32>
    %671 = math.tanh %670 : vector<8x64xf32>
    %cst_253 = arith.constant 1.000000e+00 : f32
    %672 = vector.broadcast %cst_253 : f32 to vector<8x64xf32>
    %673 = arith.subf %672, %666 : vector<8x64xf32>
    %674 = arith.mulf %673, %671 : vector<8x64xf32>
    %675 = arith.mulf %666, %602 : vector<8x64xf32>
    %676 = arith.addf %674, %675 : vector<8x64xf32>
    %c9_i32 = arith.constant 9 : i32
    %c0_254 = arith.constant 0 : index
    %c0_255 = arith.constant 0 : index
    %677 = vector.load %arg3[%c0_254, %c0_255] : memref<64x192xf32, #tpu.memory_space<vmem>>, vector<64x192xf32>
    %cst_256 = arith.constant dense<0.000000e+00> : vector<8x192xf32>
    %678 = tpu.matmul %638, %677, %cst_256 {dimension_numbers = #tpu.dot_dimension_numbers<[1], [0], [0], [1], [0, 0, 1, 1], [], []>} : vector<8x64xf32>, vector<64x192xf32>, vector<8x192xf32> -> vector<8x192xf32>
    %c0_257 = arith.constant 0 : index
    %c0_258 = arith.constant 0 : index
    %679 = vector.load %arg5[%c0_257, %c0_258] : memref<1x192xf32, #tpu.memory_space<vmem>>, vector<1x192xf32>
    %680 = vector.broadcast %679 : vector<1x192xf32> to vector<8x192xf32>
    %681 = arith.addf %678, %680 : vector<8x192xf32>
    %682 = arith.index_cast %c9_i32 : i32 to index
    %c0_259 = arith.constant 0 : index
    %c0_260 = arith.constant 0 : index
    %683 = vector.load %arg11[%682, %c0_259, %c0_260] : memref<12x8x192xf32, #tpu.memory_space<vmem>>, vector<1x8x192xf32>
    %684 = vector.shape_cast %683 : vector<1x8x192xf32> to vector<8x192xf32>
    %685 = vector.extract_strided_slice %684 {offsets = [0, 0], sizes = [8, 64], strides = [1, 1]} : vector<8x192xf32> to vector<8x64xf32>
    %686 = vector.extract_strided_slice %681 {offsets = [0, 0], sizes = [8, 64], strides = [1, 1]} : vector<8x192xf32> to vector<8x64xf32>
    %687 = arith.addf %685, %686 : vector<8x64xf32>
    %cst_261 = arith.constant 0.000000e+00 : f32
    %688 = vector.broadcast %cst_261 : f32 to vector<8x64xf32>
    %689 = arith.subf %688, %687 : vector<8x64xf32>
    %690 = math.exp %689 : vector<8x64xf32>
    %cst_262 = arith.constant 1.000000e+00 : f32
    %691 = vector.broadcast %cst_262 : f32 to vector<8x64xf32>
    %692 = arith.addf %691, %690 : vector<8x64xf32>
    %693 = tpu.reciprocal %692 {approx = true} : vector<8x64xf32> -> vector<8x64xf32>
    %694 = vector.extract_strided_slice %684 {offsets = [0, 64], sizes = [8, 64], strides = [1, 1]} : vector<8x192xf32> to vector<8x64xf32>
    %695 = vector.extract_strided_slice %681 {offsets = [0, 64], sizes = [8, 64], strides = [1, 1]} : vector<8x192xf32> to vector<8x64xf32>
    %696 = arith.addf %694, %695 : vector<8x64xf32>
    %cst_263 = arith.constant 0.000000e+00 : f32
    %697 = vector.broadcast %cst_263 : f32 to vector<8x64xf32>
    %698 = arith.subf %697, %696 : vector<8x64xf32>
    %699 = math.exp %698 : vector<8x64xf32>
    %cst_264 = arith.constant 1.000000e+00 : f32
    %700 = vector.broadcast %cst_264 : f32 to vector<8x64xf32>
    %701 = arith.addf %700, %699 : vector<8x64xf32>
    %702 = tpu.reciprocal %701 {approx = true} : vector<8x64xf32> -> vector<8x64xf32>
    %703 = vector.extract_strided_slice %684 {offsets = [0, 128], sizes = [8, 64], strides = [1, 1]} : vector<8x192xf32> to vector<8x64xf32>
    %704 = vector.extract_strided_slice %681 {offsets = [0, 128], sizes = [8, 64], strides = [1, 1]} : vector<8x192xf32> to vector<8x64xf32>
    %705 = arith.mulf %693, %704 : vector<8x64xf32>
    %706 = arith.addf %703, %705 : vector<8x64xf32>
    %707 = math.tanh %706 : vector<8x64xf32>
    %cst_265 = arith.constant 1.000000e+00 : f32
    %708 = vector.broadcast %cst_265 : f32 to vector<8x64xf32>
    %709 = arith.subf %708, %702 : vector<8x64xf32>
    %710 = arith.mulf %709, %707 : vector<8x64xf32>
    %711 = arith.mulf %702, %638 : vector<8x64xf32>
    %712 = arith.addf %710, %711 : vector<8x64xf32>
    %c0_266 = arith.constant 0 : index
    %c0_267 = arith.constant 0 : index
    %713 = vector.load %arg6[%c0_266, %c0_267] : memref<64x192xf32, #tpu.memory_space<vmem>>, vector<64x192xf32>
    %cst_268 = arith.constant dense<0.000000e+00> : vector<8x192xf32>
    %714 = tpu.matmul %712, %713, %cst_268 {dimension_numbers = #tpu.dot_dimension_numbers<[1], [0], [0], [1], [0, 0, 1, 1], [], []>} : vector<8x64xf32>, vector<64x192xf32>, vector<8x192xf32> -> vector<8x192xf32>
    %c0_269 = arith.constant 0 : index
    %c0_270 = arith.constant 0 : index
    %715 = vector.load %arg8[%c0_269, %c0_270] : memref<1x192xf32, #tpu.memory_space<vmem>>, vector<1x192xf32>
    %716 = vector.broadcast %715 : vector<1x192xf32> to vector<8x192xf32>
    %717 = arith.addf %714, %716 : vector<8x192xf32>
    %c0_271 = arith.constant 0 : index
    %c0_272 = arith.constant 0 : index
    %718 = vector.load %arg7[%c0_271, %c0_272] : memref<64x192xf32, #tpu.memory_space<vmem>>, vector<64x192xf32>
    %cst_273 = arith.constant dense<0.000000e+00> : vector<8x192xf32>
    %719 = tpu.matmul %676, %718, %cst_273 {dimension_numbers = #tpu.dot_dimension_numbers<[1], [0], [0], [1], [0, 0, 1, 1], [], []>} : vector<8x64xf32>, vector<64x192xf32>, vector<8x192xf32> -> vector<8x192xf32>
    %c0_274 = arith.constant 0 : index
    %c0_275 = arith.constant 0 : index
    %720 = vector.load %arg9[%c0_274, %c0_275] : memref<1x192xf32, #tpu.memory_space<vmem>>, vector<1x192xf32>
    %721 = vector.broadcast %720 : vector<1x192xf32> to vector<8x192xf32>
    %722 = arith.addf %719, %721 : vector<8x192xf32>
    %723 = vector.extract_strided_slice %717 {offsets = [0, 0], sizes = [8, 64], strides = [1, 1]} : vector<8x192xf32> to vector<8x64xf32>
    %724 = vector.extract_strided_slice %722 {offsets = [0, 0], sizes = [8, 64], strides = [1, 1]} : vector<8x192xf32> to vector<8x64xf32>
    %725 = arith.addf %723, %724 : vector<8x64xf32>
    %cst_276 = arith.constant 0.000000e+00 : f32
    %726 = vector.broadcast %cst_276 : f32 to vector<8x64xf32>
    %727 = arith.subf %726, %725 : vector<8x64xf32>
    %728 = math.exp %727 : vector<8x64xf32>
    %cst_277 = arith.constant 1.000000e+00 : f32
    %729 = vector.broadcast %cst_277 : f32 to vector<8x64xf32>
    %730 = arith.addf %729, %728 : vector<8x64xf32>
    %731 = tpu.reciprocal %730 {approx = true} : vector<8x64xf32> -> vector<8x64xf32>
    %732 = vector.extract_strided_slice %717 {offsets = [0, 64], sizes = [8, 64], strides = [1, 1]} : vector<8x192xf32> to vector<8x64xf32>
    %733 = vector.extract_strided_slice %722 {offsets = [0, 64], sizes = [8, 64], strides = [1, 1]} : vector<8x192xf32> to vector<8x64xf32>
    %734 = arith.addf %732, %733 : vector<8x64xf32>
    %cst_278 = arith.constant 0.000000e+00 : f32
    %735 = vector.broadcast %cst_278 : f32 to vector<8x64xf32>
    %736 = arith.subf %735, %734 : vector<8x64xf32>
    %737 = math.exp %736 : vector<8x64xf32>
    %cst_279 = arith.constant 1.000000e+00 : f32
    %738 = vector.broadcast %cst_279 : f32 to vector<8x64xf32>
    %739 = arith.addf %738, %737 : vector<8x64xf32>
    %740 = tpu.reciprocal %739 {approx = true} : vector<8x64xf32> -> vector<8x64xf32>
    %741 = vector.extract_strided_slice %717 {offsets = [0, 128], sizes = [8, 64], strides = [1, 1]} : vector<8x192xf32> to vector<8x64xf32>
    %742 = vector.extract_strided_slice %722 {offsets = [0, 128], sizes = [8, 64], strides = [1, 1]} : vector<8x192xf32> to vector<8x64xf32>
    %743 = arith.mulf %731, %742 : vector<8x64xf32>
    %744 = arith.addf %741, %743 : vector<8x64xf32>
    %745 = math.tanh %744 : vector<8x64xf32>
    %cst_280 = arith.constant 1.000000e+00 : f32
    %746 = vector.broadcast %cst_280 : f32 to vector<8x64xf32>
    %747 = arith.subf %746, %740 : vector<8x64xf32>
    %748 = arith.mulf %747, %745 : vector<8x64xf32>
    %749 = arith.mulf %740, %676 : vector<8x64xf32>
    %750 = arith.addf %748, %749 : vector<8x64xf32>
    %c10_i32 = arith.constant 10 : i32
    %c0_281 = arith.constant 0 : index
    %c0_282 = arith.constant 0 : index
    %751 = vector.load %arg3[%c0_281, %c0_282] : memref<64x192xf32, #tpu.memory_space<vmem>>, vector<64x192xf32>
    %cst_283 = arith.constant dense<0.000000e+00> : vector<8x192xf32>
    %752 = tpu.matmul %712, %751, %cst_283 {dimension_numbers = #tpu.dot_dimension_numbers<[1], [0], [0], [1], [0, 0, 1, 1], [], []>} : vector<8x64xf32>, vector<64x192xf32>, vector<8x192xf32> -> vector<8x192xf32>
    %c0_284 = arith.constant 0 : index
    %c0_285 = arith.constant 0 : index
    %753 = vector.load %arg5[%c0_284, %c0_285] : memref<1x192xf32, #tpu.memory_space<vmem>>, vector<1x192xf32>
    %754 = vector.broadcast %753 : vector<1x192xf32> to vector<8x192xf32>
    %755 = arith.addf %752, %754 : vector<8x192xf32>
    %756 = arith.index_cast %c10_i32 : i32 to index
    %c0_286 = arith.constant 0 : index
    %c0_287 = arith.constant 0 : index
    %757 = vector.load %arg11[%756, %c0_286, %c0_287] : memref<12x8x192xf32, #tpu.memory_space<vmem>>, vector<1x8x192xf32>
    %758 = vector.shape_cast %757 : vector<1x8x192xf32> to vector<8x192xf32>
    %759 = vector.extract_strided_slice %758 {offsets = [0, 0], sizes = [8, 64], strides = [1, 1]} : vector<8x192xf32> to vector<8x64xf32>
    %760 = vector.extract_strided_slice %755 {offsets = [0, 0], sizes = [8, 64], strides = [1, 1]} : vector<8x192xf32> to vector<8x64xf32>
    %761 = arith.addf %759, %760 : vector<8x64xf32>
    %cst_288 = arith.constant 0.000000e+00 : f32
    %762 = vector.broadcast %cst_288 : f32 to vector<8x64xf32>
    %763 = arith.subf %762, %761 : vector<8x64xf32>
    %764 = math.exp %763 : vector<8x64xf32>
    %cst_289 = arith.constant 1.000000e+00 : f32
    %765 = vector.broadcast %cst_289 : f32 to vector<8x64xf32>
    %766 = arith.addf %765, %764 : vector<8x64xf32>
    %767 = tpu.reciprocal %766 {approx = true} : vector<8x64xf32> -> vector<8x64xf32>
    %768 = vector.extract_strided_slice %758 {offsets = [0, 64], sizes = [8, 64], strides = [1, 1]} : vector<8x192xf32> to vector<8x64xf32>
    %769 = vector.extract_strided_slice %755 {offsets = [0, 64], sizes = [8, 64], strides = [1, 1]} : vector<8x192xf32> to vector<8x64xf32>
    %770 = arith.addf %768, %769 : vector<8x64xf32>
    %cst_290 = arith.constant 0.000000e+00 : f32
    %771 = vector.broadcast %cst_290 : f32 to vector<8x64xf32>
    %772 = arith.subf %771, %770 : vector<8x64xf32>
    %773 = math.exp %772 : vector<8x64xf32>
    %cst_291 = arith.constant 1.000000e+00 : f32
    %774 = vector.broadcast %cst_291 : f32 to vector<8x64xf32>
    %775 = arith.addf %774, %773 : vector<8x64xf32>
    %776 = tpu.reciprocal %775 {approx = true} : vector<8x64xf32> -> vector<8x64xf32>
    %777 = vector.extract_strided_slice %758 {offsets = [0, 128], sizes = [8, 64], strides = [1, 1]} : vector<8x192xf32> to vector<8x64xf32>
    %778 = vector.extract_strided_slice %755 {offsets = [0, 128], sizes = [8, 64], strides = [1, 1]} : vector<8x192xf32> to vector<8x64xf32>
    %779 = arith.mulf %767, %778 : vector<8x64xf32>
    %780 = arith.addf %777, %779 : vector<8x64xf32>
    %781 = math.tanh %780 : vector<8x64xf32>
    %cst_292 = arith.constant 1.000000e+00 : f32
    %782 = vector.broadcast %cst_292 : f32 to vector<8x64xf32>
    %783 = arith.subf %782, %776 : vector<8x64xf32>
    %784 = arith.mulf %783, %781 : vector<8x64xf32>
    %785 = arith.mulf %776, %712 : vector<8x64xf32>
    %786 = arith.addf %784, %785 : vector<8x64xf32>
    %c0_293 = arith.constant 0 : index
    %c0_294 = arith.constant 0 : index
    %787 = vector.load %arg6[%c0_293, %c0_294] : memref<64x192xf32, #tpu.memory_space<vmem>>, vector<64x192xf32>
    %cst_295 = arith.constant dense<0.000000e+00> : vector<8x192xf32>
    %788 = tpu.matmul %786, %787, %cst_295 {dimension_numbers = #tpu.dot_dimension_numbers<[1], [0], [0], [1], [0, 0, 1, 1], [], []>} : vector<8x64xf32>, vector<64x192xf32>, vector<8x192xf32> -> vector<8x192xf32>
    %c0_296 = arith.constant 0 : index
    %c0_297 = arith.constant 0 : index
    %789 = vector.load %arg8[%c0_296, %c0_297] : memref<1x192xf32, #tpu.memory_space<vmem>>, vector<1x192xf32>
    %790 = vector.broadcast %789 : vector<1x192xf32> to vector<8x192xf32>
    %791 = arith.addf %788, %790 : vector<8x192xf32>
    %c0_298 = arith.constant 0 : index
    %c0_299 = arith.constant 0 : index
    %792 = vector.load %arg7[%c0_298, %c0_299] : memref<64x192xf32, #tpu.memory_space<vmem>>, vector<64x192xf32>
    %cst_300 = arith.constant dense<0.000000e+00> : vector<8x192xf32>
    %793 = tpu.matmul %750, %792, %cst_300 {dimension_numbers = #tpu.dot_dimension_numbers<[1], [0], [0], [1], [0, 0, 1, 1], [], []>} : vector<8x64xf32>, vector<64x192xf32>, vector<8x192xf32> -> vector<8x192xf32>
    %c0_301 = arith.constant 0 : index
    %c0_302 = arith.constant 0 : index
    %794 = vector.load %arg9[%c0_301, %c0_302] : memref<1x192xf32, #tpu.memory_space<vmem>>, vector<1x192xf32>
    %795 = vector.broadcast %794 : vector<1x192xf32> to vector<8x192xf32>
    %796 = arith.addf %793, %795 : vector<8x192xf32>
    %797 = vector.extract_strided_slice %791 {offsets = [0, 0], sizes = [8, 64], strides = [1, 1]} : vector<8x192xf32> to vector<8x64xf32>
    %798 = vector.extract_strided_slice %796 {offsets = [0, 0], sizes = [8, 64], strides = [1, 1]} : vector<8x192xf32> to vector<8x64xf32>
    %799 = arith.addf %797, %798 : vector<8x64xf32>
    %cst_303 = arith.constant 0.000000e+00 : f32
    %800 = vector.broadcast %cst_303 : f32 to vector<8x64xf32>
    %801 = arith.subf %800, %799 : vector<8x64xf32>
    %802 = math.exp %801 : vector<8x64xf32>
    %cst_304 = arith.constant 1.000000e+00 : f32
    %803 = vector.broadcast %cst_304 : f32 to vector<8x64xf32>
    %804 = arith.addf %803, %802 : vector<8x64xf32>
    %805 = tpu.reciprocal %804 {approx = true} : vector<8x64xf32> -> vector<8x64xf32>
    %806 = vector.extract_strided_slice %791 {offsets = [0, 64], sizes = [8, 64], strides = [1, 1]} : vector<8x192xf32> to vector<8x64xf32>
    %807 = vector.extract_strided_slice %796 {offsets = [0, 64], sizes = [8, 64], strides = [1, 1]} : vector<8x192xf32> to vector<8x64xf32>
    %808 = arith.addf %806, %807 : vector<8x64xf32>
    %cst_305 = arith.constant 0.000000e+00 : f32
    %809 = vector.broadcast %cst_305 : f32 to vector<8x64xf32>
    %810 = arith.subf %809, %808 : vector<8x64xf32>
    %811 = math.exp %810 : vector<8x64xf32>
    %cst_306 = arith.constant 1.000000e+00 : f32
    %812 = vector.broadcast %cst_306 : f32 to vector<8x64xf32>
    %813 = arith.addf %812, %811 : vector<8x64xf32>
    %814 = tpu.reciprocal %813 {approx = true} : vector<8x64xf32> -> vector<8x64xf32>
    %815 = vector.extract_strided_slice %791 {offsets = [0, 128], sizes = [8, 64], strides = [1, 1]} : vector<8x192xf32> to vector<8x64xf32>
    %816 = vector.extract_strided_slice %796 {offsets = [0, 128], sizes = [8, 64], strides = [1, 1]} : vector<8x192xf32> to vector<8x64xf32>
    %817 = arith.mulf %805, %816 : vector<8x64xf32>
    %818 = arith.addf %815, %817 : vector<8x64xf32>
    %819 = math.tanh %818 : vector<8x64xf32>
    %cst_307 = arith.constant 1.000000e+00 : f32
    %820 = vector.broadcast %cst_307 : f32 to vector<8x64xf32>
    %821 = arith.subf %820, %814 : vector<8x64xf32>
    %822 = arith.mulf %821, %819 : vector<8x64xf32>
    %823 = arith.mulf %814, %750 : vector<8x64xf32>
    %824 = arith.addf %822, %823 : vector<8x64xf32>
    %c11_i32 = arith.constant 11 : i32
    %c0_308 = arith.constant 0 : index
    %c0_309 = arith.constant 0 : index
    %825 = vector.load %arg3[%c0_308, %c0_309] : memref<64x192xf32, #tpu.memory_space<vmem>>, vector<64x192xf32>
    %cst_310 = arith.constant dense<0.000000e+00> : vector<8x192xf32>
    %826 = tpu.matmul %786, %825, %cst_310 {dimension_numbers = #tpu.dot_dimension_numbers<[1], [0], [0], [1], [0, 0, 1, 1], [], []>} : vector<8x64xf32>, vector<64x192xf32>, vector<8x192xf32> -> vector<8x192xf32>
    %c0_311 = arith.constant 0 : index
    %c0_312 = arith.constant 0 : index
    %827 = vector.load %arg5[%c0_311, %c0_312] : memref<1x192xf32, #tpu.memory_space<vmem>>, vector<1x192xf32>
    %828 = vector.broadcast %827 : vector<1x192xf32> to vector<8x192xf32>
    %829 = arith.addf %826, %828 : vector<8x192xf32>
    %830 = arith.index_cast %c11_i32 : i32 to index
    %c0_313 = arith.constant 0 : index
    %c0_314 = arith.constant 0 : index
    %831 = vector.load %arg11[%830, %c0_313, %c0_314] : memref<12x8x192xf32, #tpu.memory_space<vmem>>, vector<1x8x192xf32>
    %832 = vector.shape_cast %831 : vector<1x8x192xf32> to vector<8x192xf32>
    %833 = vector.extract_strided_slice %832 {offsets = [0, 0], sizes = [8, 64], strides = [1, 1]} : vector<8x192xf32> to vector<8x64xf32>
    %834 = vector.extract_strided_slice %829 {offsets = [0, 0], sizes = [8, 64], strides = [1, 1]} : vector<8x192xf32> to vector<8x64xf32>
    %835 = arith.addf %833, %834 : vector<8x64xf32>
    %cst_315 = arith.constant 0.000000e+00 : f32
    %836 = vector.broadcast %cst_315 : f32 to vector<8x64xf32>
    %837 = arith.subf %836, %835 : vector<8x64xf32>
    %838 = math.exp %837 : vector<8x64xf32>
    %cst_316 = arith.constant 1.000000e+00 : f32
    %839 = vector.broadcast %cst_316 : f32 to vector<8x64xf32>
    %840 = arith.addf %839, %838 : vector<8x64xf32>
    %841 = tpu.reciprocal %840 {approx = true} : vector<8x64xf32> -> vector<8x64xf32>
    %842 = vector.extract_strided_slice %832 {offsets = [0, 64], sizes = [8, 64], strides = [1, 1]} : vector<8x192xf32> to vector<8x64xf32>
    %843 = vector.extract_strided_slice %829 {offsets = [0, 64], sizes = [8, 64], strides = [1, 1]} : vector<8x192xf32> to vector<8x64xf32>
    %844 = arith.addf %842, %843 : vector<8x64xf32>
    %cst_317 = arith.constant 0.000000e+00 : f32
    %845 = vector.broadcast %cst_317 : f32 to vector<8x64xf32>
    %846 = arith.subf %845, %844 : vector<8x64xf32>
    %847 = math.exp %846 : vector<8x64xf32>
    %cst_318 = arith.constant 1.000000e+00 : f32
    %848 = vector.broadcast %cst_318 : f32 to vector<8x64xf32>
    %849 = arith.addf %848, %847 : vector<8x64xf32>
    %850 = tpu.reciprocal %849 {approx = true} : vector<8x64xf32> -> vector<8x64xf32>
    %851 = vector.extract_strided_slice %832 {offsets = [0, 128], sizes = [8, 64], strides = [1, 1]} : vector<8x192xf32> to vector<8x64xf32>
    %852 = vector.extract_strided_slice %829 {offsets = [0, 128], sizes = [8, 64], strides = [1, 1]} : vector<8x192xf32> to vector<8x64xf32>
    %853 = arith.mulf %841, %852 : vector<8x64xf32>
    %854 = arith.addf %851, %853 : vector<8x64xf32>
    %855 = math.tanh %854 : vector<8x64xf32>
    %cst_319 = arith.constant 1.000000e+00 : f32
    %856 = vector.broadcast %cst_319 : f32 to vector<8x64xf32>
    %857 = arith.subf %856, %850 : vector<8x64xf32>
    %858 = arith.mulf %857, %855 : vector<8x64xf32>
    %859 = arith.mulf %850, %786 : vector<8x64xf32>
    %860 = arith.addf %858, %859 : vector<8x64xf32>
    %c0_320 = arith.constant 0 : index
    %c0_321 = arith.constant 0 : index
    %861 = vector.load %arg6[%c0_320, %c0_321] : memref<64x192xf32, #tpu.memory_space<vmem>>, vector<64x192xf32>
    %cst_322 = arith.constant dense<0.000000e+00> : vector<8x192xf32>
    %862 = tpu.matmul %860, %861, %cst_322 {dimension_numbers = #tpu.dot_dimension_numbers<[1], [0], [0], [1], [0, 0, 1, 1], [], []>} : vector<8x64xf32>, vector<64x192xf32>, vector<8x192xf32> -> vector<8x192xf32>
    %c0_323 = arith.constant 0 : index
    %c0_324 = arith.constant 0 : index
    %863 = vector.load %arg8[%c0_323, %c0_324] : memref<1x192xf32, #tpu.memory_space<vmem>>, vector<1x192xf32>
    %864 = vector.broadcast %863 : vector<1x192xf32> to vector<8x192xf32>
    %865 = arith.addf %862, %864 : vector<8x192xf32>
    %c0_325 = arith.constant 0 : index
    %c0_326 = arith.constant 0 : index
    %866 = vector.load %arg7[%c0_325, %c0_326] : memref<64x192xf32, #tpu.memory_space<vmem>>, vector<64x192xf32>
    %cst_327 = arith.constant dense<0.000000e+00> : vector<8x192xf32>
    %867 = tpu.matmul %824, %866, %cst_327 {dimension_numbers = #tpu.dot_dimension_numbers<[1], [0], [0], [1], [0, 0, 1, 1], [], []>} : vector<8x64xf32>, vector<64x192xf32>, vector<8x192xf32> -> vector<8x192xf32>
    %c0_328 = arith.constant 0 : index
    %c0_329 = arith.constant 0 : index
    %868 = vector.load %arg9[%c0_328, %c0_329] : memref<1x192xf32, #tpu.memory_space<vmem>>, vector<1x192xf32>
    %869 = vector.broadcast %868 : vector<1x192xf32> to vector<8x192xf32>
    %870 = arith.addf %867, %869 : vector<8x192xf32>
    %871 = vector.extract_strided_slice %865 {offsets = [0, 0], sizes = [8, 64], strides = [1, 1]} : vector<8x192xf32> to vector<8x64xf32>
    %872 = vector.extract_strided_slice %870 {offsets = [0, 0], sizes = [8, 64], strides = [1, 1]} : vector<8x192xf32> to vector<8x64xf32>
    %873 = arith.addf %871, %872 : vector<8x64xf32>
    %cst_330 = arith.constant 0.000000e+00 : f32
    %874 = vector.broadcast %cst_330 : f32 to vector<8x64xf32>
    %875 = arith.subf %874, %873 : vector<8x64xf32>
    %876 = math.exp %875 : vector<8x64xf32>
    %cst_331 = arith.constant 1.000000e+00 : f32
    %877 = vector.broadcast %cst_331 : f32 to vector<8x64xf32>
    %878 = arith.addf %877, %876 : vector<8x64xf32>
    %879 = tpu.reciprocal %878 {approx = true} : vector<8x64xf32> -> vector<8x64xf32>
    %880 = vector.extract_strided_slice %865 {offsets = [0, 64], sizes = [8, 64], strides = [1, 1]} : vector<8x192xf32> to vector<8x64xf32>
    %881 = vector.extract_strided_slice %870 {offsets = [0, 64], sizes = [8, 64], strides = [1, 1]} : vector<8x192xf32> to vector<8x64xf32>
    %882 = arith.addf %880, %881 : vector<8x64xf32>
    %cst_332 = arith.constant 0.000000e+00 : f32
    %883 = vector.broadcast %cst_332 : f32 to vector<8x64xf32>
    %884 = arith.subf %883, %882 : vector<8x64xf32>
    %885 = math.exp %884 : vector<8x64xf32>
    %cst_333 = arith.constant 1.000000e+00 : f32
    %886 = vector.broadcast %cst_333 : f32 to vector<8x64xf32>
    %887 = arith.addf %886, %885 : vector<8x64xf32>
    %888 = tpu.reciprocal %887 {approx = true} : vector<8x64xf32> -> vector<8x64xf32>
    %889 = vector.extract_strided_slice %865 {offsets = [0, 128], sizes = [8, 64], strides = [1, 1]} : vector<8x192xf32> to vector<8x64xf32>
    %890 = vector.extract_strided_slice %870 {offsets = [0, 128], sizes = [8, 64], strides = [1, 1]} : vector<8x192xf32> to vector<8x64xf32>
    %891 = arith.mulf %879, %890 : vector<8x64xf32>
    %892 = arith.addf %889, %891 : vector<8x64xf32>
    %893 = math.tanh %892 : vector<8x64xf32>
    %cst_334 = arith.constant 1.000000e+00 : f32
    %894 = vector.broadcast %cst_334 : f32 to vector<8x64xf32>
    %895 = arith.subf %894, %888 : vector<8x64xf32>
    %896 = arith.mulf %895, %893 : vector<8x64xf32>
    %897 = arith.mulf %888, %824 : vector<8x64xf32>
    %898 = arith.addf %896, %897 : vector<8x64xf32>
    %c12_i32 = arith.constant 12 : i32
    %c0_335 = arith.constant 0 : index
    %c0_336 = arith.constant 0 : index
    %899 = vector.load %arg10[%c0_335, %c0_336] : memref<8x64xf32, #tpu.memory_space<vmem>>, vector<8x64xf32>
    tpu.vector_store %arg10[%c0_335, %c0_336], %898 {strides = array<i32>} : memref<8x64xf32, #tpu.memory_space<vmem>>, vector<8x64xf32>,
    return
  }
  func.func @transform_0(%arg0: i32) -> (i32, i32, i32) {
    %c0_i32 = arith.constant 0 : i32
    %c0_i32_0 = arith.constant 0 : i32
    %c0_i32_1 = arith.constant 0 : i32
    return %c0_i32, %arg0, %c0_i32_0 : i32, i32, i32
  }
  func.func @transform_1(%arg0: i32) -> (i32, i32) {
    %c0_i32 = arith.constant 0 : i32
    %c0_i32_0 = arith.constant 0 : i32
    %c0_i32_1 = arith.constant 0 : i32
    return %c0_i32, %c0_i32_0 : i32, i32
  }
  func.func @transform_2(%arg0: i32) -> (i32, i32) {
    %c0_i32 = arith.constant 0 : i32
    %c0_i32_0 = arith.constant 0 : i32
    %c0_i32_1 = arith.constant 0 : i32
    return %c0_i32, %c0_i32_0 : i32, i32
  }
  func.func @transform_3(%arg0: i32) -> (i32, i32) {
    %c0_i32 = arith.constant 0 : i32
    %c0_i32_0 = arith.constant 0 : i32
    %c0_i32_1 = arith.constant 0 : i32
    return %c0_i32, %c0_i32_0 : i32, i32
  }
  func.func @transform_4(%arg0: i32) -> (i32, i32) {
    %c0_i32 = arith.constant 0 : i32
    %c0_i32_0 = arith.constant 0 : i32
    %c0_i32_1 = arith.constant 0 : i32
    return %c0_i32, %c0_i32_0 : i32, i32
  }
  func.func @transform_5(%arg0: i32) -> (i32, i32) {
    %c0_i32 = arith.constant 0 : i32
    %c0_i32_0 = arith.constant 0 : i32
    %c0_i32_1 = arith.constant 0 : i32
    return %c0_i32, %c0_i32_0 : i32, i32
  }
  func.func @transform_6(%arg0: i32) -> (i32, i32) {
    %c0_i32 = arith.constant 0 : i32
    %c0_i32_0 = arith.constant 0 : i32
    %c0_i32_1 = arith.constant 0 : i32
    return %c0_i32, %c0_i32_0 : i32, i32
  }
  func.func @transform_7(%arg0: i32) -> (i32, i32) {
    %c0_i32 = arith.constant 0 : i32
    %c0_i32_0 = arith.constant 0 : i32
    %c0_i32_1 = arith.constant 0 : i32
    return %c0_i32, %c0_i32_0 : i32, i32
  }
  func.func @transform_8(%arg0: i32) -> (i32, i32) {
    %c0_i32 = arith.constant 0 : i32
    %c0_i32_0 = arith.constant 0 : i32
    %c0_i32_1 = arith.constant 0 : i32
    return %c0_i32, %c0_i32_0 : i32, i32
  }
  func.func @transform_9(%arg0: i32) -> (i32, i32) {
    %c0_i32 = arith.constant 0 : i32
    %c0_i32_0 = arith.constant 0 : i32
    return %arg0, %c0_i32 : i32, i32
  }
}

</mosaic_0001>

<bundles_post_ra>
// kernel: tpu_custom_call.1
= control target key start
LH: loop header
LB: loop body
LE: loop exit
PB: predicated region body
PF: predicated region fallthrough
CT: control target
= control target key end

     0   :  { %s5172_s0 = inlined_call_operand.vmem [shape: f32[12,16,5], index: 0, kind: input, shape index: {}]   ;;  %s5173_s1 = inlined_call_operand.vmem [shape: f32[5,192], index: 1, kind: input, shape index: {}]   ;;  %s5174_s2 = inlined_call_operand.vmem [shape: f32[64,192], index: 2, kind: input, shape index: {}]   ;;  %s5175_s3 = inlined_call_operand.vmem [shape: f32[1,192], index: 3, kind: input, shape index: {}]   ;;  %s5176_s4 = inlined_call_operand.hbm [shape: f32[1,192], index: 4, kind: input, shape index: {}]   ;;  %s5177_s5 = inlined_call_operand.vmem [shape: f32[64,192], index: 5, kind: input, shape index: {}]   ;;  %s5178_s6 = inlined_call_operand.hbm [shape: f32[64,192], index: 6, kind: input, shape index: {}]   ;;  %s5179_s7 = inlined_call_operand.vmem [shape: f32[1,192], index: 7, kind: input, shape index: {}]   ;;  %s5180_s8 = inlined_call_operand.hbm [shape: f32[1,192], index: 8, kind: input, shape index: {}]   ;;  %s5181_s9 = inlined_call_operand.hbm [shape: f32[16,64], index: 9, kind: output, shape index: {}]  }
   0x1   :  { %5242 = sst [smem:[#allocation37_spill]] %s5178_s6 }
   0x2   :  { %14 = vsyncpa [#allocation5], 0 }
   0x3   :  { %15 = vsyncpa [#allocation8], 0 }
   0x4   :  { %16 = vsyncpa [#allocation6], 0 }
   0x5   :  { %18 = vsyncpa [#allocation6 + $0x1], 0  ;;  %s3480_s30 = smov 0   ;;  %s3482_s10 = smov 0  }
   0x6   :  { %s3484_s11 = smov 0   ;;  %s3486_s12 = smov 0  }
   0x7 LB: > { %s3501_s13 = sadd.s32 4294967295, %s3421_s12   ;;  %s2835_s14 = sadd.s32 4294967294, %s3421_s12   ;;  %s3421_s12 = sphi %s3486_s12, %s5326_s12   ;;  %s3417_s11 = sphi %s3484_s11, %s5330_s11   ;;  %s3413_s10 = sphi %s3482_s10, %s5329_s10   ;;  %s3409_s30 = sphi %s3480_s30, %s5328_s30  }
   0x8   : > { %s3505_s15 = sadd.s32 1, %s3421_s12   ;;  %s31_s16 = sadd.s32 1, %s3417_s11 }
   0x9   : > { %5243 = sst [smem:[#allocation14_spill]] %s3505_s15  ;;  %s28_s17 = ssub.s32 %s3421_s12, %s3505_s15 }
   0xa   : > { %p38_p0 = scmp.ne.s32.totalorder %s3417_s11, %s3413_s10  ;;  %p29_p1 = scmp.eq.s32.totalorder %s28_s17, 0 }
   0xb   : > { %p39_p2 = scmp.eq.s32.totalorder %s3421_s12, 0  ;;  %p236_p3 = scmp.eq.s32.totalorder %s3501_s13, 1 }
   0xc   : > { %p241_p4 = scmp.ne.s32.totalorder %s3413_s10, %s3409_s30  ;;  %p242_p7 = scmp.eq.s32.totalorder %s2835_s14, 1 }
   0xd   : > { %s3517_s18 = scalar_select %p29_p1, %s3417_s11, %s31_s16  }
   0xe   : > { %p3519_p5 = por %p39_p2, %p38_p0  ;;  %p3523_p6 = por %p236_p3, %p38_p0 }
   0xf   : > { %5244 = sst [smem:[#allocation15_spill]] %s3517_s18  ;;  %p2836_p8 = scmp.ge.s32.totalorder %s3421_s12, 1 }
  0x10   : > { %p249_p9 = scmp.lt.s32.totalorder %s3421_s12, 3  ;;  %p3529_p10 = por %p242_p7, %p241_p4 }
  0x11   : > { %p2975_p11 = scmp.eq.s32.totalorder %s3501_s13, 0  ;;  %s5249_s6 = sld [smem:[#allocation37_spill]] }
  0x12   : > { %p3534_p12 = pnand %p2836_p8, %p249_p9  ;;  %s3423_s26 = smov [#allocation7]  }
  0x13   : > { %s286_s27 = sshll.u32 %s3423_s26, 4  ;;  %s270_s16 = sshll.u32 %s5176_s4, 4  ;;  %s287_s27 = int_to_ptr.vmem [resolvable:$true] %s286_s27  ;;  %s271_s16 = int_to_ptr.hbm [resolvable:$true] %s270_s16 }
  0x14   : > { %p2961_p13 = pneg %p3534_p12  ;;  %s3424_s17 = smov 256  }
  0x15   : > { %s3425_s23 = smov 16   ;;  %s3426_s24 = smov [#allocation4]  }
  0x16   : > { %p3545_p0 = pnand %p2975_p11, %p2961_p13  ;;  %s272_s26 = sshll.u32 %s3426_s24, 4  ;;  %s273_s26 = int_to_ptr.vmem [resolvable:$true] %s272_s26 }
  0x17   : > { %s284_s25 = sshll.u32 %s5249_s6, 4  ;;  %s302_s15 = sshll.u32 %s5180_s8, 4  ;;  %s285_s25 = int_to_ptr.hbm [resolvable:$true] %s284_s25  ;;  %s303_s15 = int_to_ptr.hbm [resolvable:$true] %s302_s15 }
  0x18   : > { %2967 = dma.hbm_to_vmem [thread:$0]  (!%p3545_p0), %s285_s25, 2048, %s287_s27, [#allocation8], %s3424_s17, %s3424_s17, %s3425_s23  }
  0x19   : > { %2964 = dma.hbm_to_vmem [thread:$0]  (!%p3545_p0), %s271_s16, 32, %s273_s26, [#allocation5]  }
  0x1a   : > { %s3427_s29 = smov [#allocation9]   ;;  %p2840_p1 = scmp.ge.s32.totalorder %s3421_s12, 2 }
  0x1b   : > { %s304_s14 = sshll.u32 %s3427_s29, 4  ;;  %s305_s14 = int_to_ptr.vmem [resolvable:$true] %s304_s14 }
  0x1c   : > { %2970 = dma.hbm_to_vmem [thread:$0]  (!%p3545_p0), %s303_s15, 32, %s305_s14, [#allocation8]  }
  0x1d   : > { %311 = sbr.rel (%p2840_p1) target bundleno = 50 (0x32), region = 48 }
  0x22   : > { %314 = sbr.rel (!%p3519_p5) target bundleno = 50 (0x32), region = 52  ;;  %s316_s6 = sand.u32 (%p3519_p5), 1, %s3417_s11  }
  0x23   : > { %s2841_s18 = sshll.u32 (%p3519_p5), %s3421_s12, 3  ;;  %s2945_s25 = smul.u32 (%p3519_p5), 96, %s316_s6 }
  0x24   : > { %s320_s17 = scalar_lea.vmem (%p3519_p5), %s5172_s0, %s2841_s18 }
  0x25   : > { %v371_v0 = vld [vmem:[%s320_s17] sm:$0xff] (%p3519_p5)  ;;  %v373_v1 = vld [vmem:[%s320_s17 + $0x10] sm:$0xff] (%p3519_p5)  ;;  %s318_s15 = scalar_lea.vmem (%p3519_p5), [#allocation3], %s2945_s25 }
  0x26   : > { %v375_v2 = vld [vmem:[%s320_s17 + $0x20] sm:$0xff] (%p3519_p5)  ;;  %372 = vst [vmem:[%s318_s15] sm:$0xff] (%p3519_p5), %v371_v0  ;;  %v377_v3 = vld [vmem:[%s320_s17 + $0x30] sm:$0xff] (%p3519_p5) }
  0x27   : > { %374 = vst [vmem:[%s318_s15 + $0x8] sm:$0xff] %v373_v1  ;;  %v379_v4 = vld [vmem:[%s320_s17 + $0x40] sm:$0xff]  ;;  %v381_v5 = vld [vmem:[%s320_s17 + $0x50] sm:$0xff] }
  0x28   : > { %376 = vst [vmem:[%s318_s15 + $0x10] sm:$0xff] %v375_v2  ;;  %v383_v6 = vld [vmem:[%s320_s17 + $0x60] sm:$0xff]  ;;  %v385_v7 = vld [vmem:[%s320_s17 + $0x70] sm:$0xff] }
  0x29   : > { %378 = vst [vmem:[%s318_s15 + $0x18] sm:$0xff] %v377_v3  ;;  %v387_v8 = vld [vmem:[%s320_s17 + $0x80] sm:$0xff]  ;;  %v389_v9 = vld [vmem:[%s320_s17 + $0x90] sm:$0xff] }
  0x2a   : > { %380 = vst [vmem:[%s318_s15 + $0x20] sm:$0xff] %v379_v4  ;;  %v391_v10 = vld [vmem:[%s320_s17 + $0xa0] sm:$0xff]  ;;  %v393_v11 = vld [vmem:[%s320_s17 + $0xb0] sm:$0xff] }
  0x2b   : > { %382 = vst [vmem:[%s318_s15 + $0x28] sm:$0xff] %v381_v5 }
  0x2c   : > { %384 = vst [vmem:[%s318_s15 + $0x30] sm:$0xff] %v383_v6 }
  0x2d   : > { %386 = vst [vmem:[%s318_s15 + $0x38] sm:$0xff] %v385_v7 }
  0x2e   : > { %388 = vst [vmem:[%s318_s15 + $0x40] sm:$0xff] %v387_v8 }
  0x2f   : > { %390 = vst [vmem:[%s318_s15 + $0x48] sm:$0xff] %v389_v9 }
  0x30   : > { %392 = vst [vmem:[%s318_s15 + $0x50] sm:$0xff] %v391_v10 }
  0x31   : > { %394 = vst [vmem:[%s318_s15 + $0x58] sm:$0xff] %v393_v11 }
  0x32 PF: > { %403 = sbr.rel (%p3534_p12) target bundleno = 5180 (0x143c), region = 90 }
  0x37   : > { %s3574_s19 = sand.u32 1, %s3413_s10  }
  0x38   : > { %s2946_s28 = smul.u32 96, %s3574_s19 }
  0x3a   : > { %s3577_s23 = scalar_lea.vmem [#allocation3], %s2946_s28 }
  0x3b   : > { %3396 = dma.done.wait (%p2975_p11), [#allocation5], 32  }
  0x3c   : > { %3398 = vsyncadd (%p2975_p11), [#allocation5], 4294967264 }
  0x3d   : > { %3400 = dma.done.wait (%p2975_p11), [#allocation8], 2080  }
  0x3e   : > { %3402 = vsyncadd (%p2975_p11), [#allocation8], 4294965216  ;;  %v3590_v12 = vld [vmem:[%s5174_s2 + $0x70] sm:$0xff]  ;;  %v3595_v13 = vld [vmem:[%s5174_s2 + $0x60] sm:$0xff]  ;;  %vm513_vm0 = vcmask 1044480   ;;  %vm476_vm1 = vcmask 39936  }
  0x3f   : > { %684 = vmatpush.msra.mxu2 %v3590_v12  ;;  %v3601_v14 = vld [vmem:[%s5174_s2 + $0x50] sm:$0xff]  ;;  %v468_v15 = vld [vmem:[%s5173_s1] sm:$0x1f]  ;;  %v3612_v17 = vld [vmem:[%s5174_s2 + $0x78] sm:$0xff]  ;;  %v3428_v31 = vmov 0.0   ;;  %vm627_vm2 = vcmask 523264  }
  0x40   : > { %v456_v16 = vld [vmem:[%s3577_s23] sm:$0xff]  ;;  %2847 = vmatpush.msk.msra.mxu0 %vm513_vm0, %v468_v15  ;;  %v3617_v18 = vld [vmem:[%s5174_s2 + $0x68] sm:$0xff]  ;;  %704 = vmatpush.msra.mxu3 %v3612_v17  ;;  %v3630_v20 = vld [vmem:[%s5174_s2 + $0x58] sm:$0xff]  ;;  %s3429_s28 = smov 64   ;;  %s2846_s27 = sshll.u32 %s3574_s19, 3 }
  0x41   : > { %685 = vmatpush.msra.mxu2 %v3595_v13  ;;  %v3622_v19 = vld [vmem:[%s5174_s2 + $0x40] sm:$0xff]  ;;  %2848 = vmatmul.msk.f32.vlgmr.msra.gmra.mxu0 %vm476_vm1, %v456_v16  ;;  %v469_v21 = vld [vmem:[%s5173_s1 + $0x8] sm:$0x1f]  ;;  %v3639_v22 = vld [vmem:[%s5174_s2 + $0x30] sm:$0xff]  ;;  %s2942_s16 = sshll.u32 %s3501_s13, 3  ;;  %s455_s22 = scalar_lea.vmem [#allocation10], %s2846_s27 }
  0x42   : > { %1056 = vmatpush.msrb.mxu0 %v3590_v12  ;;  %705 = vmatpush.msra.mxu3 %v3617_v18  ;;  %v3647_v23 = vld [vmem:[%s5174_s2 + $0x48] sm:$0xff]  ;;  %v3653_v24 = vld [vmem:[%s5174_s2 + $0x20] sm:$0xff]  ;;  %v3661_v25 = vld [vmem:[%s5174_s2 + $0x38] sm:$0xff]  ;;  %s2734_s15 = scalar_lea.hbm %s5181_s9, %s2942_s16  ;;  %s2736_s24 = sshll.u32 %s455_s22, 4  ;;  %s2737_s24 = int_to_ptr.vmem [resolvable:$true] %s2736_s24 }
  0x43   : > { %686 = vmatpush.msra.mxu2 %v3601_v14  ;;  %2860 = vmatpush.msk.msra.mxu1 %vm513_vm0, %v469_v21  ;;  %v3667_v26 = vld [vmem:[%s5174_s2 + $0x10] sm:$0xff]  ;;  %v3675_v27 = vld [vmem:[%s5174_s2 + $0x28] sm:$0xff]  ;;  %v3681_v28 = vld [vmem:[%s5174_s2] sm:$0xff]  ;;  %s2738_s26 = sshll.u32 %s2734_s15, 4  ;;  %s2724_s29 = scalar_lea.sflag [#allocation6], %s3574_s19  ;;  %s2739_s26 = int_to_ptr.hbm [resolvable:$true] %s2738_s26 }
  0x44   : > { %2861 = vmatmul.msk.f32.vlgmr.msra.gmra.mxu1 %vm476_vm1, %v456_v16  ;;  %706 = vmatpush.msra.mxu3 %v3630_v20  ;;  %v3689_v29 = vld [vmem:[%s5174_s2 + $0x18] sm:$0xff]  ;;  %v3698_v30 = vld [vmem:[%s5174_s2 + $0x8] sm:$0xff]  ;;  %v470_v32 = vld [vmem:[%s5175_s3] sm:$0x3]  ;;  %s3365_s14 = sshra.s32 %s2739_s26, 4  ;;  %s3371_s18 = scalar_lea.hbm %s5181_s9, 16  ;;  %s3366_s14 = int_to_ptr.hbm [resolvable:$true] %s3365_s14 }
  0x45   : > { %687 = vmatpush.msra.mxu2 %v3622_v19  ;;  %1057 = vmatpush.msrb.mxu0 %v3595_v13  ;;  %v3715_v33 = vperm.slane %v470_v32, 0  ;;  %v3718_v36 = vperm.slane %v470_v32, 1  ;;  %v667_v39 = vld [vmem:[#allocation4] sm:$0x3]  ;;  %v3735_v56 = vld [vmem:[%s5177_s5 + $0x70] sm:$0xff]  ;;  %v3740_v57 = vld [vmem:[%s5177_s5 + $0x78] sm:$0xff]  ;;  %p3372_p5 = scmp.lt.s32.totalorder %s3366_s14, %s5181_s9 }
  0x46   : > { %1076 = vmatpush.msrb.mxu1 %v3612_v17  ;;  %707 = vmatpush.msra.mxu3 %v3647_v23  ;;  %v3722_v40 = vperm.slane %v667_v39, 0  ;;  %v3725_v48 = vperm.slane %v667_v39, 1  ;;  %v3745_v58 = vld [vmem:[%s5177_s5 + $0x60] sm:$0xff]  ;;  %v3752_v59 = vld [vmem:[%s5177_s5 + $0x68] sm:$0xff]  ;;  %v3757_v60 = vld [vmem:[%s5177_s5 + $0x50] sm:$0xff]  ;;  %s3367_s6 = scalar_lea.hbm %s3366_s14, 8 }
  0x47   : > { %688 = vmatpush.msra.mxu2 %v3639_v22  ;;  %1058 = vmatpush.msrb.mxu0 %v3601_v14  ;;  %v3762_v61 = vld [vmem:[%s5177_s5 + $0x58] sm:$0xff]  ;;  %v3769_v62 = vld [vmem:[%s5177_s5 + $0x40] sm:$0xff]  ;;  %v3774_v63 = vld [vmem:[%s5177_s5 + $0x48] sm:$0xff]  ;;  %p3368_p2 = scmp.ne.s32.totalorder %s3366_s14, %s3367_s6  ;;  %p3373_p7 = scmp.lt.s32.totalorder %s3371_s18, %s3367_s6 }
  0x48   : > { %1077 = vmatpush.msrb.mxu1 %v3617_v18  ;;  %708 = vmatpush.msra.mxu3 %v3661_v25  ;;  %5251 = vst [vmem:[#allocation16_spill] sm:$0xff] %v3722_v40  ;;  %v3778_v0 = vld [vmem:[#allocation7 + $0x70] sm:$0xff]  ;;  %v3780_v1 = vld [vmem:[#allocation7 + $0x78] sm:$0xff]  ;;  %v3796_v4 = vld [vmem:[#allocation7 + $0x60] sm:$0xff] }
  0x49   : > { %689 = vmatpush.msra.mxu2 %v3653_v24  ;;  %1059 = vmatpush.msrb.mxu0 %v3622_v19  ;;  %v3785_v2 = vld [vmem:[%s5177_s5 + $0x30] sm:$0xff]  ;;  %v3790_v3 = vld [vmem:[%s5177_s5 + $0x38] sm:$0xff]  ;;  %v3803_v6 = vld [vmem:[%s5177_s5 + $0x20] sm:$0xff]  ;;  %p3369_p3 = pnand %p3368_p2, %p3523_p6  ;;  %p3374_p8 = por %p3373_p7, %p3372_p5 }
  0x4a   : > { %1078 = vmatpush.msrb.mxu1 %v3630_v20  ;;  %709 = vmatpush.msra.mxu3 %v3675_v27  ;;  %v3798_v5 = vld [vmem:[#allocation7 + $0x68] sm:$0xff]  ;;  %v3814_v8 = vld [vmem:[#allocation7 + $0x50] sm:$0xff]  ;;  %v3816_v9 = vld [vmem:[#allocation7 + $0x58] sm:$0xff] }
  0x4b   : > { %690 = vmatpush.msra.mxu2 %v3667_v26  ;;  %1060 = vmatpush.msrb.mxu0 %v3639_v22  ;;  %v3808_v7 = vld [vmem:[%s5177_s5 + $0x28] sm:$0xff]  ;;  %5252 = vst [vmem:[#allocation17_spill] sm:$0xff] %v3816_v9  ;;  %v3821_v10 = vld [vmem:[%s5177_s5 + $0x10] sm:$0xff]  ;;  %v3826_v11 = vld [vmem:[%s5177_s5 + $0x18] sm:$0xff]  ;;  %p3370_p4 = pneg %p3369_p3 }
  0x4c   : > { %1079 = vmatpush.msrb.mxu1 %v3647_v23  ;;  %710 = vmatpush.msra.mxu3 %v3689_v29  ;;  %v3832_v15 = vld [vmem:[#allocation7 + $0x40] sm:$0xff]  ;;  %v3834_v16 = vld [vmem:[#allocation7 + $0x48] sm:$0xff]  ;;  %v3868_v39 = vld [vmem:[#allocation7 + $0x10] sm:$0xff] }
  0x4d   : > { %691 = vmatpush.msra.mxu2 %v3681_v28  ;;  %1061 = vmatpush.msrb.mxu0 %v3653_v24  ;;  %5253 = vst [vmem:[#allocation18_spill] sm:$0xff] %v3832_v15  ;;  %v3839_v21 = vld [vmem:[%s5177_s5] sm:$0xff]  ;;  %v3844_v32 = vld [vmem:[%s5177_s5 + $0x8] sm:$0xff]  ;;  %p3375_p9 = pnand %p3374_p8, %p3370_p4 }
  0x4e   : > { %692 = vmatmul.f32.vlgmr.msra.gmra.mxu2 %v3428_v31  ;;  %1080 = vmatpush.msrb.mxu1 %v3661_v25  ;;  %5254 = vst [vmem:[#allocation19_spill] sm:$0xff] %v3834_v16 }
  0x4f   : > { %711 = vmatpush.msra.mxu3 %v3698_v30  ;;  %1062 = vmatpush.msrb.mxu0 %v3667_v26  ;;  %5259 = vst [vmem:[#allocation24_spill] sm:$0xff] %v3868_v39 }
  0x50   : > { %712 = vmatmul.f32.vlgmr.msra.gmra.mxu3 %v3428_v31  ;;  %1081 = vmatpush.msrb.mxu1 %v3675_v27 }
  0x51   : > { %1063 = vmatpush.msrb.mxu0 %v3681_v28  ;;  %770 = vmatpush.msrb.mxu2 %v3735_v56 }
  0x52   : > { %1082 = vmatpush.msrb.mxu1 %v3689_v29  ;;  %790 = vmatpush.msrb.mxu3 %v3740_v57 }
  0x53   : > { %771 = vmatpush.msrb.mxu2 %v3745_v58  ;;  %1166 = vmatpush.msra.mxu0 %v3778_v0 }
  0x54   : > { %1083 = vmatpush.msrb.mxu1 %v3698_v30  ;;  %791 = vmatpush.msrb.mxu3 %v3752_v59 }
  0x55   : > { %772 = vmatpush.msrb.mxu2 %v3757_v60  ;;  %1167 = vmatpush.msra.mxu0 %v3796_v4 }
  0x56   : > { %792 = vmatpush.msrb.mxu3 %v3762_v61  ;;  %1186 = vmatpush.msra.mxu1 %v3780_v1 }
  0x57   : > { %773 = vmatpush.msrb.mxu2 %v3769_v62  ;;  %1168 = vmatpush.msra.mxu0 %v3814_v8 }
  0x58   : > { %793 = vmatpush.msrb.mxu3 %v3774_v63  ;;  %1187 = vmatpush.msra.mxu1 %v3798_v5 }
  0x59   : > { %774 = vmatpush.msrb.mxu2 %v3785_v2  ;;  %1169 = vmatpush.msra.mxu0 %v3832_v15 }
  0x5a   : > { %794 = vmatpush.msrb.mxu3 %v3790_v3  ;;  %1188 = vmatpush.msra.mxu1 %v3816_v9 }
  0x5b   : > { %775 = vmatpush.msrb.mxu2 %v3803_v6 }
  0x5c   : > { %795 = vmatpush.msrb.mxu3 %v3808_v7  ;;  %1189 = vmatpush.msra.mxu1 %v3834_v16 }
  0x5d   : > { %776 = vmatpush.msrb.mxu2 %v3821_v10 }
  0x5e   : > { %796 = vmatpush.msrb.mxu3 %v3826_v11 }
  0x5f   : > { %777 = vmatpush.msrb.mxu2 %v3839_v21 }
  0x60   : > { %797 = vmatpush.msrb.mxu3 %v3844_v32 }
  0x61   : > { %832 = vmatpush.msra.mxu2 %v3778_v0 }
  0x62   : > { %852 = vmatpush.msra.mxu3 %v3780_v1 }
  0x63   : > { %833 = vmatpush.msra.mxu2 %v3796_v4 }
  0x64   : > { %853 = vmatpush.msra.mxu3 %v3798_v5 }
  0x65   : > { %834 = vmatpush.msra.mxu2 %v3814_v8 }
  0x66   : > { %854 = vmatpush.msra.mxu3 %v3816_v9 }
  0x67   : > { %835 = vmatpush.msra.mxu2 %v3832_v15 }
  0x68   : > { %855 = vmatpush.msra.mxu3 %v3834_v16 }
  0xbe   : > { %v537_v34 = vpop.f32.mrf.mxu0 }
  0xbf   : > { %v538_v35 = vadd.f32 %v537_v34, %v3715_v33  ;;  %v3850_v34 = vld [vmem:[#allocation7 + $0x30] sm:$0xff] }
  0xc0   : > { %5255 = vst [vmem:[#allocation20_spill] sm:$0xff] %v3850_v34  ;;  %1170 = vmatpush.msra.mxu0 %v3850_v34  ;;  %836 = vmatpush.msra.mxu2 %v3850_v34 }
  0xc1   : > { %v590_v37 = vpop.f32.mrf.mxu1 }
  0xc2   : > { %v591_v38 = vadd.f32 %v590_v37, %v3718_v36  ;;  %v3860_v37 = vld [vmem:[#allocation7 + $0x20] sm:$0xff] }
  0xc3   : > { %5257 = vst [vmem:[#allocation22_spill] sm:$0xff] %v3860_v37  ;;  %1171 = vmatpush.msra.mxu0 %v3860_v37  ;;  %837 = vmatpush.msra.mxu2 %v3860_v37 }
  0xc4   : > { %628 = vst.msk [vmem:[#allocation2 + $0x8] sm:$0xff] %vm627_vm2, %v591_v38  ;;  %v3862_v38 = vld [vmem:[#allocation7 + $0x28] sm:$0xff] }
  0xc5   : > { %5258 = vst [vmem:[#allocation23_spill] sm:$0xff] %v3862_v38  ;;  %1172 = vmatpush.msra.mxu0 %v3868_v39  ;;  %838 = vmatpush.msra.mxu2 %v3868_v39 }
  0xcb   : > { %v717_v52 = vld [vmem:[#allocation2 + $0x8] sm:$0xff] }
  0xd1   : > { %v693_v41 = vpop.f32.mrf.mxu2 }
  0xd2   : > { %v694_v42 = vadd.f32 %v693_v41, %v3722_v40  ;;  %v3870_v41 = vld [vmem:[#allocation7 + $0x18] sm:$0xff] }
  0xd3   : > { %v713_v49 = vpop.f32.mrf.mxu3  ;;  %5260 = vst [vmem:[#allocation25_spill] sm:$0xff] %v3870_v41 }
  0xd4   : > { %v718_v43 = vadd.f32 %v694_v42, %v538_v35  ;;  %v714_v50 = vadd.f32 %v713_v49, %v3725_v48  ;;  %v3852_v35 = vld [vmem:[#allocation7 + $0x38] sm:$0xff]  ;;  %v3892_v49 = vld [vmem:[#allocation7 + $0x8] sm:$0xff] }
  0xd5   : > { %5256 = vst [vmem:[#allocation21_spill] sm:$0xff] %v3852_v35  ;;  %1190 = vmatpush.msra.mxu1 %v3852_v35  ;;  %856 = vmatpush.msra.mxu3 %v3852_v35 }
  0xd6   : > { %v719_v44 = vsub.f32 0.0, %v718_v43  ;;  %5262 = vst [vmem:[#allocation27_spill] sm:$0xff] %v3892_v49 }
  0xd7   : > { %1191 = vmatpush.msra.mxu1 %v3862_v38  ;;  %857 = vmatpush.msra.mxu3 %v3862_v38 }
  0xd8   : > { %v720_v45 = vmul.f32 1.442695, %v719_v44 }
  0xd9   : > { %1192 = vmatpush.msra.mxu1 %v3870_v41  ;;  %858 = vmatpush.msra.mxu3 %v3870_v41 }
  0xda   : > { %3021 = vpow2.f32 %v720_v45 }
  0xdb   : > { %859 = vmatpush.msra.mxu3 %v3892_v49  ;;  %1193 = vmatpush.msra.mxu1 %v3892_v49 }
  0xe0   : > { %v3022_v46 = vpop.eup %3021 }
  0xe1   : > { %v722_v47 = vadd.f32 1.0, %v3022_v46 }
  0xe3   : > { %3023 = vrcp.f32 %v722_v47  ;;  %v3890_v47 = vld [vmem:[#allocation7] sm:$0xff] }
  0xe4   : > { %5261 = vst [vmem:[#allocation26_spill] sm:$0xff] %v3890_v47  ;;  %839 = vmatpush.msra.mxu2 %v3890_v47  ;;  %1173 = vmatpush.msra.mxu0 %v3890_v47 }
  0xe9   : > { %v3728_v51 = vpop.eup %3023 }
  0xea   : > { %v724_v53 = vmul.f32 %v3728_v51, %v714_v50  ;;  %v727_v42 = vsub.f32 1.0, %v3728_v51  ;;  %v733_v44 = vmul.f32 0.0, %v3728_v51  ;;  %v457_v50 = vld [vmem:[%s3577_s23 + $0x8] sm:$0xff] }
  0xeb   : > { %2849 = vmatmul.msk.f32.gmra.mxu0 %vm476_vm1, %v457_v50  ;;  %2862 = vmatmul.msk.f32.gmra.mxu1 %vm476_vm1, %v457_v50 }
  0xec   : > { %v725_v54 = vadd.f32 %v724_v53, %v717_v52 }
  0xee   : > { %3025 = vtanh.f32 %v725_v54 }
  0xf4   : > { %v3026_v55 = vpop.eup %3025 }
  0xf5   : > { %729 = vrot.lane.b32.xlu0 %v3026_v55, %s3429_s28  ;;  %v751_v55 = vld [vmem:[%s5179_s7] sm:$0x3] }
 0x167   : > { %v730_v43 = vpop.permute.xlu0 %729 }
 0x168   : > { %v732_v45 = vmul.f32 %v730_v43, %v727_v42  ;;  %v593_v54 = vpop.f32.mrf.mxu1  ;;  %v818_v42 = vld [vmem:[#allocation9] sm:$0x3] }
 0x169   : > { %v594_v43 = vadd.f32 %v593_v54, %v3718_v36 }
 0x16a   : > { %v3886_v46 = vadd.f32 %v733_v44, %v732_v45  ;;  %v3961_v44 = vperm.slane %v751_v55, 0  ;;  %v3963_v45 = vperm.slane %v818_v42, 0 }
 0x16b   : > { %630 = vst.msk [vmem:[#allocation2 + $0x18] sm:$0xff] %vm627_vm2, %v594_v43 }
 0x16c   : > { %758 = vrot.lane.b32.xlu0 %v3886_v46, %s3429_s28 }
 0x1de   : > { %v759_v51 = vpop.permute.xlu0 %758 }
 0x1df   : > { %2873 = vmatmul.msk.f32.vlgmr.msrb.gmra.mxu2 %vm627_vm2, %v759_v51  ;;  %2874 = vmatmul.msk.f32.vlgmr.msrb.gmra.mxu3 %vm627_vm2, %v759_v51 }
 0x1e0   : > { %889 = vmatpush.msrb.mxu2 %v3590_v12  ;;  %909 = vmatpush.msrb.mxu3 %v3612_v17 }
 0x1e2   : > { %890 = vmatpush.msrb.mxu2 %v3595_v13  ;;  %910 = vmatpush.msrb.mxu3 %v3617_v18 }
 0x1e4   : > { %891 = vmatpush.msrb.mxu2 %v3601_v14  ;;  %911 = vmatpush.msrb.mxu3 %v3630_v20 }
 0x1e6   : > { %892 = vmatpush.msrb.mxu2 %v3622_v19  ;;  %912 = vmatpush.msrb.mxu3 %v3647_v23 }
 0x1e7   : > { %840 = vmatmul.f32.vlgmr.msra.gmra.mxu2 %v3428_v31  ;;  %860 = vmatmul.f32.vlgmr.msra.gmra.mxu3 %v3428_v31  ;;  %v540_v31 = vpop.f32.mrf.mxu0 }
 0x1e8   : > { %893 = vmatpush.msrb.mxu2 %v3639_v22  ;;  %913 = vmatpush.msrb.mxu3 %v3661_v25  ;;  %v541_v52 = vadd.f32 %v540_v31, %v3715_v33 }
 0x1ea   : > { %894 = vmatpush.msrb.mxu2 %v3653_v24  ;;  %914 = vmatpush.msrb.mxu3 %v3675_v27 }
 0x1ec   : > { %895 = vmatpush.msrb.mxu2 %v3667_v26  ;;  %915 = vmatpush.msrb.mxu3 %v3689_v29 }
 0x1ee   : > { %896 = vmatpush.msrb.mxu2 %v3681_v28  ;;  %916 = vmatpush.msrb.mxu3 %v3698_v30 }
 0x1ef   : > { %2875 = vmatmul.msk.f32.vlgmr.msrb.gmra.mxu2 %vm627_vm2, %v759_v51  ;;  %2876 = vmatmul.msk.f32.vlgmr.msrb.gmra.mxu3 %vm627_vm2, %v759_v51 }
 0x1f0   : > { %954 = vmatpush.msra.mxu2 %v3735_v56  ;;  %974 = vmatpush.msra.mxu3 %v3740_v57 }
 0x1f2   : > { %955 = vmatpush.msra.mxu2 %v3745_v58  ;;  %975 = vmatpush.msra.mxu3 %v3752_v59 }
 0x1f4   : > { %956 = vmatpush.msra.mxu2 %v3757_v60  ;;  %976 = vmatpush.msra.mxu3 %v3762_v61 }
 0x1f6   : > { %957 = vmatpush.msra.mxu2 %v3769_v62  ;;  %977 = vmatpush.msra.mxu3 %v3774_v63 }
 0x1f8   : > { %958 = vmatpush.msra.mxu2 %v3785_v2  ;;  %978 = vmatpush.msra.mxu3 %v3790_v3 }
 0x1fa   : > { %959 = vmatpush.msra.mxu2 %v3803_v6  ;;  %979 = vmatpush.msra.mxu3 %v3808_v7 }
 0x1fc   : > { %960 = vmatpush.msra.mxu2 %v3821_v10  ;;  %980 = vmatpush.msra.mxu3 %v3826_v11 }
 0x1fe   : > { %961 = vmatpush.msra.mxu2 %v3839_v21  ;;  %981 = vmatpush.msra.mxu3 %v3844_v32 }
 0x200   : > { %999 = vmatpush.msrb.mxu2 %v3778_v0  ;;  %1019 = vmatpush.msrb.mxu3 %v3780_v1 }
 0x202   : > { %1000 = vmatpush.msrb.mxu2 %v3796_v4  ;;  %1020 = vmatpush.msrb.mxu3 %v3798_v5 }
 0x204   : > { %1001 = vmatpush.msrb.mxu2 %v3814_v8  ;;  %1021 = vmatpush.msrb.mxu3 %v3816_v9  ;;  %v3970_v9 = vperm.slane %v751_v55, 1 }
 0x206   : > { %1002 = vmatpush.msrb.mxu2 %v3832_v15  ;;  %1022 = vmatpush.msrb.mxu3 %v3834_v16  ;;  %v3968_v15 = vperm.slane %v818_v42, 1 }
 0x208   : > { %1003 = vmatpush.msrb.mxu2 %v3850_v34  ;;  %1023 = vmatpush.msrb.mxu3 %v3852_v35 }
 0x20a   : > { %1004 = vmatpush.msrb.mxu2 %v3860_v37  ;;  %1024 = vmatpush.msrb.mxu3 %v3862_v38 }
 0x20c   : > { %1005 = vmatpush.msrb.mxu2 %v3868_v39  ;;  %1025 = vmatpush.msrb.mxu3 %v3870_v41 }
 0x20e   : > { %1006 = vmatpush.msrb.mxu2 %v3890_v47  ;;  %1026 = vmatpush.msrb.mxu3 %v3892_v49 }
 0x262   : > { %v779_v53 = vpop.f32.mrf.mxu2  ;;  %v799_v39 = vpop.f32.mrf.mxu3 }
 0x263   : > { %v780_v51 = vadd.f32 %v779_v53, %v3961_v44 }
 0x26a   : > { %v841_v50 = vpop.f32.mrf.mxu2  ;;  %v861_v53 = vpop.f32.mrf.mxu3 }
 0x26b   : > { %v842_v31 = vadd.f32 %v841_v50, %v3963_v45 }
 0x26d   : > { %v864_v49 = vadd.f32 %v842_v31, %v780_v51 }
 0x26f   : > { %v865_v47 = vsub.f32 0.0, %v864_v49  ;;  %v862_v49 = vadd.f32 %v861_v53, %v3968_v15 }
 0x271   : > { %v866_v41 = vmul.f32 1.442695, %v865_v47 }
 0x272   : > { %v898_v38 = vpop.f32.mrf.mxu2 }
 0x273   : > { %3027 = vpow2.f32 %v866_v41  ;;  %v899_v37 = vadd.f32 %v898_v38, %v3722_v40  ;;  %v800_v41 = vadd.f32 %v799_v39, %v3970_v9 }
 0x275   : > { %v924_v54 = vadd.f32 %v899_v37, %v541_v52  ;;  %v918_v52 = vpop.f32.mrf.mxu3 }
 0x277   : > { %v925_v35 = vsub.f32 0.0, %v924_v54 }
 0x279   : > { %v3028_v43 = vpop.eup %3027  ;;  %v926_v34 = vmul.f32 1.442695, %v925_v35  ;;  %v919_v35 = vadd.f32 %v918_v52, %v3725_v48 }
 0x27a   : > { %v868_v16 = vadd.f32 1.0, %v3028_v43 }
 0x27b   : > { %3029 = vpow2.f32 %v926_v34 }
 0x27c   : > { %3031 = vrcp.f32 %v868_v16  ;;  %v923_v16 = vld [vmem:[#allocation2 + $0x18] sm:$0xff] }
 0x281   : > { %v3030_v47 = vpop.eup %3029 }
 0x282   : > { %v3032_v50 = vpop.eup %3031  ;;  %v928_v51 = vadd.f32 1.0, %v3030_v47 }
 0x283   : > { %v870_v38 = vmul.f32 %v3032_v50, %v862_v49  ;;  %v873_v39 = vsub.f32 1.0, %v3032_v50  ;;  %v879_v53 = vmul.f32 0.0, %v3032_v50  ;;  %v460_v50 = vld [vmem:[%s3577_s23 + $0x20] sm:$0xff] }
 0x284   : > { %3033 = vrcp.f32 %v928_v51  ;;  %v458_v51 = vld [vmem:[%s3577_s23 + $0x10] sm:$0xff] }
 0x285   : > { %v871_v37 = vadd.f32 %v870_v38, %v800_v41  ;;  %2850 = vmatmul.msk.f32.gmra.mxu0 %vm476_vm1, %v458_v51  ;;  %2863 = vmatmul.msk.f32.gmra.mxu1 %vm476_vm1, %v458_v51  ;;  %v459_v41 = vld [vmem:[%s3577_s23 + $0x18] sm:$0xff] }
 0x287   : > { %3035 = vtanh.f32 %v871_v37 }
 0x28a   : > { %v3034_v34 = vpop.eup %3033 }
 0x28b   : > { %v930_v42 = vmul.f32 %v3034_v34, %v919_v35  ;;  %v933_v38 = vsub.f32 1.0, %v3034_v34  ;;  %v939_v52 = vmul.f32 %v3034_v34, %v3886_v46  ;;  %v463_v46 = vld [vmem:[%s3577_s23 + $0x38] sm:$0xff]  ;;  %v464_v34 = vld [vmem:[%s3577_s23 + $0x40] sm:$0xff] }
 0x28d   : > { %v3036_v55 = vpop.eup %3035  ;;  %v931_v31 = vadd.f32 %v930_v42, %v923_v16  ;;  %2851 = vmatmul.msk.f32.gmra.mxu0 %vm476_vm1, %v459_v41  ;;  %2864 = vmatmul.msk.f32.gmra.mxu1 %vm476_vm1, %v459_v41  ;;  %v461_v42 = vld [vmem:[%s3577_s23 + $0x28] sm:$0xff] }
 0x28e   : > { %875 = vrot.lane.b32.xlu2 %v3036_v55, %s3429_s28  ;;  %v462_v55 = vld [vmem:[%s3577_s23 + $0x30] sm:$0xff] }
 0x28f   : > { %3037 = vtanh.f32 %v931_v31  ;;  %v465_v31 = vld [vmem:[%s3577_s23 + $0x48] sm:$0xff] }
 0x295   : > { %v3038_v54 = vpop.eup %3037  ;;  %2852 = vmatmul.msk.f32.gmra.mxu0 %vm476_vm1, %v460_v50  ;;  %2865 = vmatmul.msk.f32.gmra.mxu1 %vm476_vm1, %v460_v50 }
 0x296   : > { %935 = vrot.lane.b32.xlu1 %v3038_v54, %s3429_s28  ;;  %v466_v54 = vld [vmem:[%s3577_s23 + $0x50] sm:$0xff] }
 0x29d   : > { %2853 = vmatmul.msk.f32.gmra.mxu0 %vm476_vm1, %v461_v42  ;;  %2866 = vmatmul.msk.f32.gmra.mxu1 %vm476_vm1, %v461_v42 }
 0x2a5   : > { %2854 = vmatmul.msk.f32.gmra.mxu0 %vm476_vm1, %v462_v55  ;;  %2867 = vmatmul.msk.f32.gmra.mxu1 %vm476_vm1, %v462_v55 }
 0x2ad   : > { %2855 = vmatmul.msk.f32.gmra.mxu0 %vm476_vm1, %v463_v46  ;;  %2868 = vmatmul.msk.f32.gmra.mxu1 %vm476_vm1, %v463_v46 }
 0x2b5   : > { %2856 = vmatmul.msk.f32.gmra.mxu0 %vm476_vm1, %v464_v34  ;;  %2869 = vmatmul.msk.f32.gmra.mxu1 %vm476_vm1, %v464_v34 }
 0x2bd   : > { %2857 = vmatmul.msk.f32.gmra.mxu0 %vm476_vm1, %v465_v31  ;;  %2870 = vmatmul.msk.f32.gmra.mxu1 %vm476_vm1, %v465_v31 }
 0x2c5   : > { %2858 = vmatmul.msk.f32.gmra.mxu0 %vm476_vm1, %v466_v54  ;;  %2871 = vmatmul.msk.f32.gmra.mxu1 %vm476_vm1, %v466_v54 }
 0x2e8   : > { %v876_v43 = vpop.permute.xlu2 %875 }
 0x2e9   : > { %v878_v49 = vmul.f32 %v876_v43, %v873_v39  ;;  %v467_v39 = vld [vmem:[%s3577_s23 + $0x58] sm:$0xff] }
 0x2ea   : > { %2859 = vmatmul.msk.f32.gmra.mxu0 %vm476_vm1, %v467_v39  ;;  %2872 = vmatmul.msk.f32.gmra.mxu1 %vm476_vm1, %v467_v39 }
 0x2eb   : > { %v3977_v47 = vadd.f32 %v879_v53, %v878_v49 }
 0x2ed   : > { %987 = vrot.lane.b32.xlu2 %v3977_v47, %s3429_s28 }
 0x302   : > { %v543_v43 = vpop.f32.mrf.mxu0  ;;  %v596_v53 = vpop.f32.mrf.mxu1 }
 0x303   : > { %v4017_v49 = vadd.f32 %v543_v43, %v3715_v33  ;;  %v597_v51 = vadd.f32 %v596_v53, %v3718_v36 }
 0x305   : > { %632 = vst.msk [vmem:[#allocation2 + $0x28] sm:$0xff] %vm627_vm2, %v597_v51 }
 0x308   : > { %v936_v37 = vpop.permute.xlu1 %935 }
 0x309   : > { %v938_v35 = vmul.f32 %v936_v37, %v933_v38 }
 0x30a   : > { %v546_v41 = vpop.f32.mrf.mxu0  ;;  %v599_v50 = vpop.f32.mrf.mxu1 }
 0x30b   : > { %v3991_v16 = vadd.f32 %v939_v52, %v938_v35  ;;  %v4022_v38 = vadd.f32 %v546_v41, %v3715_v33  ;;  %v600_v37 = vadd.f32 %v599_v50, %v3718_v36 }
 0x30d   : > { %942 = vrot.lane.b32.xlu1 %v3991_v16, %s3429_s28  ;;  %634 = vst.msk [vmem:[#allocation2 + $0x38] sm:$0xff] %vm627_vm2, %v600_v37 }
 0x312   : > { %v549_v52 = vpop.f32.mrf.mxu0  ;;  %v602_v35 = vpop.f32.mrf.mxu1 }
 0x313   : > { %v4027_v42 = vadd.f32 %v549_v52, %v3715_v33  ;;  %v603_v55 = vadd.f32 %v602_v35, %v3718_v36 }
 0x315   : > { %5263 = vst [vmem:[#allocation28_spill] sm:$0xff] %v4027_v42 }
 0x316   : > { %636 = vst.msk [vmem:[#allocation2 + $0x48] sm:$0xff] %vm627_vm2, %v603_v55 }
 0x31a   : > { %v552_v31 = vpop.f32.mrf.mxu0  ;;  %v605_v54 = vpop.f32.mrf.mxu1 }
 0x31b   : > { %v4086_v39 = vadd.f32 %v552_v31, %v3715_v33  ;;  %v606_v43 = vadd.f32 %v605_v54, %v3718_v36 }
 0x31d   : > { %5264 = vst [vmem:[#allocation29_spill] sm:$0xff] %v4086_v39 }
 0x31e   : > { %638 = vst.msk [vmem:[#allocation2 + $0x58] sm:$0xff] %vm627_vm2, %v606_v43 }
 0x322   : > { %v555_v53 = vpop.f32.mrf.mxu0  ;;  %v608_v51 = vpop.f32.mrf.mxu1 }
 0x323   : > { %v4091_v41 = vadd.f32 %v555_v53, %v3715_v33  ;;  %v609_v50 = vadd.f32 %v608_v51, %v3718_v36 }
 0x325   : > { %5265 = vst [vmem:[#allocation30_spill] sm:$0xff] %v4091_v41 }
 0x326   : > { %640 = vst.msk [vmem:[#allocation2 + $0x68] sm:$0xff] %vm627_vm2, %v609_v50 }
 0x32a   : > { %v558_v37 = vpop.f32.mrf.mxu0  ;;  %v611_v52 = vpop.f32.mrf.mxu1 }
 0x32b   : > { %v559_v35 = vadd.f32 %v558_v37, %v3715_v33  ;;  %v612_v55 = vadd.f32 %v611_v52, %v3718_v36 }
 0x32d   : > { %641 = vst [vmem:[#allocation2 + $0x70] sm:$0xff] %v559_v35 }
 0x32e   : > { %642 = vst.msk [vmem:[#allocation2 + $0x78] sm:$0xff] %vm627_vm2, %v612_v55 }
 0x347   : > { %v988_v34 = vpop.permute.xlu2 %987 }
 0x37f   : > { %v943_v46 = vpop.permute.xlu1 %942 }
 0x380   : > { %2877 = vmatmul.msk.f32.vlgmr.msra.gmra.mxu2 %vm627_vm2, %v943_v46  ;;  %2878 = vmatmul.msk.f32.vlgmr.msra.gmra.mxu3 %vm627_vm2, %v943_v46 }
 0x381   : > { %2881 = vmatmul.msk.f32.vlgmr.msrb.gmra.mxu0 %vm627_vm2, %v943_v46  ;;  %2882 = vmatmul.msk.f32.vlgmr.msrb.gmra.mxu1 %vm627_vm2, %v943_v46  ;;  %v561_v46 = vpop.f32.mrf.mxu0 }
 0x382   : > { %1121 = vmatpush.msra.mxu2 %v3735_v56  ;;  %1141 = vmatpush.msra.mxu3 %v3740_v57  ;;  %v562_v31 = vadd.f32 %v561_v46, %v3715_v33 }
 0x383   : > { %1288 = vmatpush.msrb.mxu0 %v3735_v56  ;;  %1308 = vmatpush.msrb.mxu1 %v3740_v57 }
 0x384   : > { %1122 = vmatpush.msra.mxu2 %v3745_v58  ;;  %1142 = vmatpush.msra.mxu3 %v3752_v59  ;;  %643 = vst [vmem:[#allocation2 + $0x80] sm:$0xff] %v562_v31 }
 0x385   : > { %1289 = vmatpush.msrb.mxu0 %v3745_v58  ;;  %1309 = vmatpush.msrb.mxu1 %v3752_v59 }
 0x386   : > { %1123 = vmatpush.msra.mxu2 %v3757_v60  ;;  %1143 = vmatpush.msra.mxu3 %v3762_v61 }
 0x387   : > { %1290 = vmatpush.msrb.mxu0 %v3757_v60  ;;  %1310 = vmatpush.msrb.mxu1 %v3762_v61 }
 0x388   : > { %2879 = vmatmul.msk.f32.vlgmr.msrb.gmra.mxu2 %vm627_vm2, %v988_v34  ;;  %2880 = vmatmul.msk.f32.vlgmr.msrb.gmra.mxu3 %vm627_vm2, %v988_v34  ;;  %v614_v34 = vpop.f32.mrf.mxu1 }
 0x389   : > { %1124 = vmatpush.msra.mxu2 %v3769_v62  ;;  %1144 = vmatpush.msra.mxu3 %v3774_v63  ;;  %v615_v54 = vadd.f32 %v614_v34, %v3718_v36  ;;  %v564_v43 = vpop.f32.mrf.mxu0 }
 0x38a   : > { %1291 = vmatpush.msrb.mxu0 %v3769_v62  ;;  %1311 = vmatpush.msrb.mxu1 %v3774_v63  ;;  %v565_v51 = vadd.f32 %v564_v43, %v3715_v33 }
 0x38b   : > { %1125 = vmatpush.msra.mxu2 %v3785_v2  ;;  %1145 = vmatpush.msra.mxu3 %v3790_v3  ;;  %644 = vst.msk [vmem:[#allocation2 + $0x88] sm:$0xff] %vm627_vm2, %v615_v54 }
 0x38c   : > { %1292 = vmatpush.msrb.mxu0 %v3785_v2  ;;  %1312 = vmatpush.msrb.mxu1 %v3790_v3  ;;  %645 = vst [vmem:[#allocation2 + $0x90] sm:$0xff] %v565_v51 }
 0x38d   : > { %1126 = vmatpush.msra.mxu2 %v3803_v6  ;;  %1146 = vmatpush.msra.mxu3 %v3808_v7 }
 0x38e   : > { %1293 = vmatpush.msrb.mxu0 %v3803_v6  ;;  %1313 = vmatpush.msrb.mxu1 %v3808_v7 }
 0x38f   : > { %1127 = vmatpush.msra.mxu2 %v3821_v10  ;;  %1147 = vmatpush.msra.mxu3 %v3826_v11 }
 0x390   : > { %1294 = vmatpush.msrb.mxu0 %v3821_v10  ;;  %1314 = vmatpush.msrb.mxu1 %v3826_v11  ;;  %v617_v53 = vpop.f32.mrf.mxu1 }
 0x391   : > { %1128 = vmatpush.msra.mxu2 %v3839_v21  ;;  %1148 = vmatpush.msra.mxu3 %v3844_v32  ;;  %v618_v50 = vadd.f32 %v617_v53, %v3718_v36  ;;  %v567_v37 = vpop.f32.mrf.mxu0 }
 0x392   : > { %1295 = vmatpush.msrb.mxu0 %v3839_v21  ;;  %1315 = vmatpush.msrb.mxu1 %v3844_v32  ;;  %v568_v35 = vadd.f32 %v567_v37, %v3715_v33 }
 0x393   : > { %1223 = vmatpush.msrb.mxu2 %v3590_v12  ;;  %1243 = vmatpush.msrb.mxu3 %v3612_v17  ;;  %646 = vst.msk [vmem:[#allocation2 + $0x98] sm:$0xff] %vm627_vm2, %v618_v50 }
 0x394   : > { %647 = vst [vmem:[#allocation2 + $0xa0] sm:$0xff] %v568_v35 }
 0x395   : > { %1224 = vmatpush.msrb.mxu2 %v3595_v13  ;;  %1244 = vmatpush.msrb.mxu3 %v3617_v18 }
 0x397   : > { %1225 = vmatpush.msrb.mxu2 %v3601_v14  ;;  %1245 = vmatpush.msrb.mxu3 %v3630_v20 }
 0x398   : > { %v620_v52 = vpop.f32.mrf.mxu1 }
 0x399   : > { %1226 = vmatpush.msrb.mxu2 %v3622_v19  ;;  %1246 = vmatpush.msrb.mxu3 %v3647_v23  ;;  %v621_v55 = vadd.f32 %v620_v52, %v3718_v36  ;;  %v570_v46 = vpop.f32.mrf.mxu0 }
 0x39a   : > { %v571_v31 = vadd.f32 %v570_v46, %v3715_v33 }
 0x39b   : > { %1227 = vmatpush.msrb.mxu2 %v3639_v22  ;;  %1247 = vmatpush.msrb.mxu3 %v3661_v25  ;;  %648 = vst.msk [vmem:[#allocation2 + $0xa8] sm:$0xff] %vm627_vm2, %v621_v55 }
 0x39c   : > { %649 = vst [vmem:[#allocation2 + $0xb0] sm:$0xff] %v571_v31 }
 0x39d   : > { %1228 = vmatpush.msrb.mxu2 %v3653_v24  ;;  %1248 = vmatpush.msrb.mxu3 %v3675_v27 }
 0x39f   : > { %1229 = vmatpush.msrb.mxu2 %v3667_v26  ;;  %1249 = vmatpush.msrb.mxu3 %v3689_v29 }
 0x3a0   : > { %v623_v34 = vpop.f32.mrf.mxu1 }
 0x3a1   : > { %1230 = vmatpush.msrb.mxu2 %v3681_v28  ;;  %1250 = vmatpush.msrb.mxu3 %v3698_v30  ;;  %v624_v54 = vadd.f32 %v623_v34, %v3718_v36 }
 0x3a3   : > { %650 = vst.msk [vmem:[#allocation2 + $0xb8] sm:$0xff] %vm627_vm2, %v624_v54 }
 0x3fe   : > { %v1065_v43 = vpop.f32.mrf.mxu0  ;;  %v1085_v31 = vpop.f32.mrf.mxu1 }
 0x3ff   : > { %v1066_v53 = vadd.f32 %v1065_v43, %v3722_v40  ;;  %v1086_v43 = vadd.f32 %v1085_v31, %v3725_v48 }
 0x401   : > { %v1091_v51 = vadd.f32 %v1066_v53, %v4017_v49 }
 0x403   : > { %v1092_v50 = vsub.f32 0.0, %v1091_v51  ;;  %v963_v37 = vpop.f32.mrf.mxu2  ;;  %v983_v49 = vpop.f32.mrf.mxu3 }
 0x404   : > { %v964_v55 = vadd.f32 %v963_v37, %v3961_v44 }
 0x405   : > { %v1093_v52 = vmul.f32 1.442695, %v1092_v50  ;;  %v1090_v50 = vld [vmem:[#allocation2 + $0x28] sm:$0xff] }
 0x407   : > { %3039 = vpow2.f32 %v1093_v52 }
 0x40b   : > { %v1008_v35 = vpop.f32.mrf.mxu2 }
 0x40c   : > { %v1009_v41 = vadd.f32 %v1008_v35, %v3963_v45  ;;  %v1028_v35 = vpop.f32.mrf.mxu3 }
 0x40d   : > { %v3040_v33 = vpop.eup %3039 }
 0x40e   : > { %v1095_v46 = vadd.f32 1.0, %v3040_v33  ;;  %v1031_v36 = vadd.f32 %v1009_v41, %v964_v55  ;;  %v1029_v41 = vadd.f32 %v1028_v35, %v3968_v15  ;;  %v984_v33 = vadd.f32 %v983_v49, %v3970_v9 }
 0x410   : > { %3041 = vrcp.f32 %v1095_v46  ;;  %v1032_v34 = vsub.f32 0.0, %v1031_v36 }
 0x412   : > { %v1033_v54 = vmul.f32 1.442695, %v1032_v34 }
 0x414   : > { %3043 = vpow2.f32 %v1033_v54 }
 0x416   : > { %v3042_v53 = vpop.eup %3041 }
 0x417   : > { %v1097_v51 = vmul.f32 %v3042_v53, %v1086_v43  ;;  %v1106_v49 = vmul.f32 %v3042_v53, %v3991_v16 }
 0x419   : > { %v1098_v52 = vadd.f32 %v1097_v51, %v1090_v50 }
 0x41a   : > { %v3044_v39 = vpop.eup %3043 }
 0x41b   : > { %3045 = vtanh.f32 %v1098_v52  ;;  %v1035_v37 = vadd.f32 1.0, %v3044_v39 }
 0x41d   : > { %3047 = vrcp.f32 %v1035_v37 }
 0x421   : > { %v3046_v42 = vpop.eup %3045 }
 0x422   : > { %1102 = vrot.lane.b32.xlu0 %v3046_v42, %s3429_s28  ;;  %v1100_v42 = vsub.f32 1.0, %v3042_v53 }
 0x423   : > { %v3048_v55 = vpop.eup %3047 }
 0x424   : > { %v1037_v46 = vmul.f32 %v3048_v55, %v1029_v41  ;;  %v1040_v31 = vsub.f32 1.0, %v3048_v55  ;;  %v1046_v39 = vmul.f32 %v3048_v55, %v3977_v47 }
 0x426   : > { %v1038_v36 = vadd.f32 %v1037_v46, %v984_v33  ;;  %v1257_v46 = vld [vmem:[#allocation2 + $0x38] sm:$0xff] }
 0x428   : > { %3049 = vtanh.f32 %v1038_v36 }
 0x42e   : > { %v3050_v34 = vpop.eup %3049 }
 0x42f   : > { %1042 = vrot.lane.b32.xlu2 %v3050_v34, %s3429_s28 }
 0x489   : > { %v1043_v54 = vpop.permute.xlu2 %1042 }
 0x48a   : > { %v1045_v43 = vmul.f32 %v1043_v54, %v1040_v31 }
 0x48c   : > { %v4120_v51 = vadd.f32 %v1046_v39, %v1045_v43 }
 0x48e   : > { %1154 = vrot.lane.b32.xlu0 %v4120_v51, %s3429_s28 }
 0x494   : > { %v1103_v50 = vpop.permute.xlu0 %1102 }
 0x495   : > { %v1105_v52 = vmul.f32 %v1103_v50, %v1100_v42 }
 0x497   : > { %v4125_v37 = vadd.f32 %v1106_v49, %v1105_v52 }
 0x499   : > { %1109 = vrot.lane.b32.xlu1 %v4125_v37, %s3429_s28 }
 0x500   : > { %v1155_v35 = vpop.permute.xlu0 %1154 }
 0x501   : > { %2885 = vmatmul.msk.f32.vlgmr.msra.gmra.mxu0 %vm627_vm2, %v1155_v35  ;;  %2886 = vmatmul.msk.f32.vlgmr.msra.gmra.mxu1 %vm627_vm2, %v1155_v35 }
 0x502   : > { %1390 = vmatpush.msra.mxu0 %v3590_v12  ;;  %1410 = vmatpush.msra.mxu1 %v3612_v17  ;;  %v5266_v12 = vld [vmem:[#allocation17_spill] sm:$0xff]  ;;  %v5269_v17 = vld [vmem:[#allocation20_spill] sm:$0xff] }
 0x504   : > { %1391 = vmatpush.msra.mxu0 %v3595_v13  ;;  %1411 = vmatpush.msra.mxu1 %v3617_v18  ;;  %v5267_v13 = vld [vmem:[#allocation18_spill] sm:$0xff]  ;;  %v5270_v18 = vld [vmem:[#allocation21_spill] sm:$0xff] }
 0x506   : > { %1392 = vmatpush.msra.mxu0 %v3601_v14  ;;  %1412 = vmatpush.msra.mxu1 %v3630_v20  ;;  %v5268_v14 = vld [vmem:[#allocation19_spill] sm:$0xff] }
 0x507   : > { %v5272_v20 = vld [vmem:[#allocation23_spill] sm:$0xff] }
 0x508   : > { %1393 = vmatpush.msra.mxu0 %v3622_v19  ;;  %1413 = vmatpush.msra.mxu1 %v3647_v23  ;;  %v5271_v19 = vld [vmem:[#allocation22_spill] sm:$0xff]  ;;  %v5274_v23 = vld [vmem:[#allocation25_spill] sm:$0xff] }
 0x50a   : > { %1394 = vmatpush.msra.mxu0 %v3639_v22  ;;  %1414 = vmatpush.msra.mxu1 %v3661_v25  ;;  %v5273_v22 = vld [vmem:[#allocation24_spill] sm:$0xff]  ;;  %v5276_v25 = vld [vmem:[#allocation27_spill] sm:$0xff] }
 0x50b   : > { %v1110_v47 = vpop.permute.xlu1 %1109 }
 0x50c   : > { %2883 = vmatmul.msk.f32.vlgmr.msra.gmra.mxu2 %vm627_vm2, %v1110_v47  ;;  %2884 = vmatmul.msk.f32.vlgmr.msra.gmra.mxu3 %vm627_vm2, %v1110_v47 }
 0x50d   : > { %1333 = vmatpush.msra.mxu2 %v3778_v0  ;;  %1353 = vmatpush.msra.mxu3 %v3780_v1 }
 0x50e   : > { %1395 = vmatpush.msra.mxu0 %v3653_v24  ;;  %1415 = vmatpush.msra.mxu1 %v3675_v27  ;;  %v5275_v24 = vld [vmem:[#allocation26_spill] sm:$0xff] }
 0x50f   : > { %1334 = vmatpush.msra.mxu2 %v3796_v4  ;;  %1354 = vmatpush.msra.mxu3 %v3798_v5 }
 0x510   : > { %1396 = vmatpush.msra.mxu0 %v3667_v26  ;;  %1416 = vmatpush.msra.mxu1 %v3689_v29 }
 0x511   : > { %1335 = vmatpush.msra.mxu2 %v3814_v8  ;;  %1355 = vmatpush.msra.mxu3 %v5266_v12 }
 0x512   : > { %1397 = vmatpush.msra.mxu0 %v3681_v28  ;;  %1417 = vmatpush.msra.mxu1 %v3698_v30 }
 0x513   : > { %1336 = vmatpush.msra.mxu2 %v5267_v13  ;;  %1356 = vmatpush.msra.mxu3 %v5268_v14 }
 0x514   : > { %2887 = vmatmul.msk.f32.vlgmr.msrb.gmra.mxu2 %vm627_vm2, %v1110_v47  ;;  %2888 = vmatmul.msk.f32.vlgmr.msrb.gmra.mxu3 %vm627_vm2, %v1110_v47 }
 0x515   : > { %1337 = vmatpush.msra.mxu2 %v5269_v17  ;;  %1357 = vmatpush.msra.mxu3 %v5270_v18 }
 0x517   : > { %1338 = vmatpush.msra.mxu2 %v5271_v19  ;;  %1358 = vmatpush.msra.mxu3 %v5272_v20 }
 0x519   : > { %1339 = vmatpush.msra.mxu2 %v5273_v22  ;;  %1359 = vmatpush.msra.mxu3 %v5274_v23 }
 0x51b   : > { %1340 = vmatpush.msra.mxu2 %v5275_v24  ;;  %1360 = vmatpush.msra.mxu3 %v5276_v25 }
 0x51d   : > { %1455 = vmatpush.msrb.mxu2 %v3735_v56  ;;  %1475 = vmatpush.msrb.mxu3 %v3740_v57 }
 0x51f   : > { %1456 = vmatpush.msrb.mxu2 %v3745_v58  ;;  %1476 = vmatpush.msrb.mxu3 %v3752_v59 }
 0x521   : > { %1457 = vmatpush.msrb.mxu2 %v3757_v60  ;;  %1477 = vmatpush.msrb.mxu3 %v3762_v61 }
 0x523   : > { %1458 = vmatpush.msrb.mxu2 %v3769_v62  ;;  %1478 = vmatpush.msrb.mxu3 %v3774_v63 }
 0x525   : > { %1459 = vmatpush.msrb.mxu2 %v3785_v2  ;;  %1479 = vmatpush.msrb.mxu3 %v3790_v3 }
 0x527   : > { %1460 = vmatpush.msrb.mxu2 %v3803_v6  ;;  %1480 = vmatpush.msrb.mxu3 %v3808_v7 }
 0x529   : > { %1461 = vmatpush.msrb.mxu2 %v3821_v10  ;;  %1481 = vmatpush.msrb.mxu3 %v3826_v11 }
 0x52b   : > { %1462 = vmatpush.msrb.mxu2 %v3839_v21  ;;  %1482 = vmatpush.msrb.mxu3 %v3844_v32 }
 0x57e   : > { %v1175_v26 = vpop.f32.mrf.mxu0  ;;  %v1195_v6 = vpop.f32.mrf.mxu1 }
 0x57f   : > { %v1176_v28 = vadd.f32 %v1175_v26, %v3963_v45  ;;  %v1196_v10 = vadd.f32 %v1195_v6, %v3968_v15  ;;  %v4407_v6 = vld [vmem:[%s5177_s5] sm:$0xff] }
 0x580   : > { %5292 = vst [vmem:[#allocation35_spill] sm:$0xff] %v4407_v6 }
 0x58f   : > { %v1130_v27 = vpop.f32.mrf.mxu2  ;;  %v1150_v3 = vpop.f32.mrf.mxu3 }
 0x590   : > { %v1131_v29 = vadd.f32 %v1130_v27, %v3961_v44  ;;  %v1151_v32 = vadd.f32 %v1150_v3, %v3970_v9  ;;  %v4401_v3 = vld [vmem:[%s5174_s2 + $0x8] sm:$0xff] }
 0x591   : > { %5291 = vst [vmem:[#allocation34_spill] sm:$0xff] %v4401_v3 }
 0x592   : > { %v1198_v30 = vadd.f32 %v1176_v28, %v1131_v29  ;;  %v4329_v28 = vld [vmem:[%s5174_s2 + $0x38] sm:$0xff]  ;;  %v4335_v29 = vld [vmem:[%s5177_s5 + $0x30] sm:$0xff] }
 0x593   : > { %5279 = vst [vmem:[#allocation19_spill] sm:$0xff] %v4329_v28 }
 0x594   : > { %v1199_v56 = vsub.f32 0.0, %v1198_v30  ;;  %5280 = vst [vmem:[#allocation20_spill] sm:$0xff] %v4335_v29  ;;  %v4341_v30 = vld [vmem:[%s5177_s5 + $0x38] sm:$0xff] }
 0x595   : > { %5281 = vst [vmem:[#allocation21_spill] sm:$0xff] %v4341_v30 }
 0x596   : > { %v1200_v57 = vmul.f32 1.442695, %v1199_v56  ;;  %v4347_v56 = vld [vmem:[%s5174_s2 + $0x20] sm:$0xff] }
 0x597   : > { %v1232_v58 = vpop.f32.mrf.mxu2  ;;  %v1252_v41 = vpop.f32.mrf.mxu3  ;;  %5282 = vst [vmem:[#allocation22_spill] sm:$0xff] %v4347_v56 }
 0x598   : > { %3051 = vpow2.f32 %v1200_v57  ;;  %v1233_v59 = vadd.f32 %v1232_v58, %v3722_v40  ;;  %v4353_v57 = vld [vmem:[%s5174_s2 + $0x28] sm:$0xff]  ;;  %v4359_v58 = vld [vmem:[%s5177_s5 + $0x20] sm:$0xff] }
 0x599   : > { %5283 = vst [vmem:[#allocation23_spill] sm:$0xff] %v4353_v57 }
 0x59a   : > { %v1258_v60 = vadd.f32 %v1233_v59, %v4022_v38  ;;  %v1253_v38 = vadd.f32 %v1252_v41, %v3725_v48  ;;  %5284 = vst [vmem:[#allocation24_spill] sm:$0xff] %v4359_v58  ;;  %v4365_v59 = vld [vmem:[%s5177_s5 + $0x28] sm:$0xff] }
 0x59b   : > { %5285 = vst [vmem:[#allocation25_spill] sm:$0xff] %v4365_v59 }
 0x59c   : > { %v1259_v61 = vsub.f32 0.0, %v1258_v60  ;;  %v4371_v60 = vld [vmem:[%s5174_s2 + $0x10] sm:$0xff] }
 0x59d   : > { %5286 = vst [vmem:[#allocation26_spill] sm:$0xff] %v4371_v60 }
 0x59e   : > { %v3052_v62 = vpop.eup %3051  ;;  %v1260_v63 = vmul.f32 1.442695, %v1259_v61  ;;  %v4377_v61 = vld [vmem:[%s5174_s2 + $0x18] sm:$0xff] }
 0x59f   : > { %v1202_v2 = vadd.f32 1.0, %v3052_v62  ;;  %5287 = vst [vmem:[#allocation27_spill] sm:$0xff] %v4377_v61  ;;  %v4383_v62 = vld [vmem:[%s5177_s5 + $0x10] sm:$0xff] }
 0x5a0   : > { %3053 = vpow2.f32 %v1260_v63  ;;  %5288 = vst [vmem:[#allocation31_spill] sm:$0xff] %v4383_v62  ;;  %v4389_v63 = vld [vmem:[%s5177_s5 + $0x18] sm:$0xff] }
 0x5a1   : > { %3055 = vrcp.f32 %v1202_v2  ;;  %5289 = vst [vmem:[#allocation32_spill] sm:$0xff] %v4389_v63  ;;  %v4395_v2 = vld [vmem:[%s5174_s2] sm:$0xff] }
 0x5a2   : > { %5290 = vst [vmem:[#allocation33_spill] sm:$0xff] %v4395_v2 }
 0x5a6   : > { %v3054_v7 = vpop.eup %3053 }
 0x5a7   : > { %v3056_v11 = vpop.eup %3055  ;;  %v1262_v21 = vadd.f32 1.0, %v3054_v7  ;;  %v4413_v7 = vld [vmem:[%s5177_s5 + $0x8] sm:$0xff] }
 0x5a8   : > { %v1204_v16 = vmul.f32 %v3056_v11, %v1196_v10  ;;  %v1207_v54 = vsub.f32 1.0, %v3056_v11  ;;  %v1213_v43 = vmul.f32 %v3056_v11, %v4120_v51  ;;  %v4251_v51 = vld [vmem:[%s5174_s2 + $0x60] sm:$0xff]  ;;  %5293 = vst [vmem:[#allocation36_spill] sm:$0xff] %v4413_v7 }
 0x5a9   : > { %3057 = vrcp.f32 %v1262_v21 }
 0x5aa   : > { %v1205_v53 = vadd.f32 %v1204_v16, %v1151_v32  ;;  %v5294_v32 = vld [vmem:[#allocation28_spill] sm:$0xff] }
 0x5ac   : > { %3059 = vtanh.f32 %v1205_v53 }
 0x5af   : > { %v3058_v55 = vpop.eup %3057 }
 0x5b0   : > { %v1264_v33 = vmul.f32 %v3058_v55, %v1253_v38  ;;  %v1267_v49 = vsub.f32 1.0, %v3058_v55  ;;  %v1273_v35 = vmul.f32 %v3058_v55, %v4125_v37  ;;  %v4257_v37 = vld [vmem:[%s5174_s2 + $0x68] sm:$0xff] }
 0x5b2   : > { %v3060_v36 = vpop.eup %3059  ;;  %v1265_v34 = vadd.f32 %v1264_v33, %v1257_v46 }
 0x5b3   : > { %1209 = vrot.lane.b32.xlu0 %v3060_v36, %s3429_s28 }
 0x5b4   : > { %3061 = vtanh.f32 %v1265_v34 }
 0x5ba   : > { %v3062_v31 = vpop.eup %3061 }
 0x5bb   : > { %1269 = vrot.lane.b32.xlu1 %v3062_v31, %s3429_s28 }
 0x625   : > { %v1210_v39 = vpop.permute.xlu0 %1209 }
 0x626   : > { %v1212_v42 = vmul.f32 %v1210_v39, %v1207_v54 }
 0x628   : > { %v4193_v50 = vadd.f32 %v1213_v43, %v1212_v42 }
 0x62a   : > { %1321 = vrot.lane.b32.xlu1 %v4193_v50, %s3429_s28 }
 0x62d   : > { %v1270_v52 = vpop.permute.xlu1 %1269 }
 0x62e   : > { %v1272_v47 = vmul.f32 %v1270_v52, %v1267_v49 }
 0x630   : > { %v4198_v26 = vadd.f32 %v1273_v35, %v1272_v47  ;;  %v1424_v35 = vld [vmem:[#allocation2 + $0x48] sm:$0xff] }
 0x632   : > { %1276 = vrot.lane.b32.xlu2 %v4198_v26, %s3429_s28 }
 0x68c   : > { %v1277_v27 = vpop.permute.xlu2 %1276 }
 0x68d   : > { %2889 = vmatmul.msk.f32.vlgmr.msrb.gmra.mxu0 %vm627_vm2, %v1277_v27  ;;  %2890 = vmatmul.msk.f32.vlgmr.msrb.gmra.mxu1 %vm627_vm2, %v1277_v27 }
 0x68e   : > { %1500 = vmatpush.msrb.mxu0 %v3778_v0  ;;  %1520 = vmatpush.msrb.mxu1 %v3780_v1  ;;  %v4227_v1 = vld [vmem:[%s5174_s2 + $0x70] sm:$0xff] }
 0x690   : > { %1501 = vmatpush.msrb.mxu0 %v3796_v4  ;;  %1521 = vmatpush.msrb.mxu1 %v3798_v5  ;;  %v4233_v4 = vld [vmem:[%s5174_s2 + $0x78] sm:$0xff]  ;;  %v4239_v5 = vld [vmem:[%s5177_s5 + $0x70] sm:$0xff] }
 0x692   : > { %1502 = vmatpush.msrb.mxu0 %v3814_v8  ;;  %1522 = vmatpush.msrb.mxu1 %v5266_v12  ;;  %v4245_v8 = vld [vmem:[%s5177_s5 + $0x78] sm:$0xff]  ;;  %v4263_v12 = vld [vmem:[%s5177_s5 + $0x60] sm:$0xff] }
 0x694   : > { %1503 = vmatpush.msrb.mxu0 %v5267_v13  ;;  %1523 = vmatpush.msrb.mxu1 %v5268_v14  ;;  %v4269_v13 = vld [vmem:[%s5177_s5 + $0x68] sm:$0xff]  ;;  %v4275_v14 = vld [vmem:[%s5174_s2 + $0x50] sm:$0xff] }
 0x695   : > { %2893 = vmatmul.msk.f32.vlgmr.msra.gmra.mxu0 %vm627_vm2, %v1277_v27  ;;  %2894 = vmatmul.msk.f32.vlgmr.msra.gmra.mxu1 %vm627_vm2, %v1277_v27 }
 0x696   : > { %1504 = vmatpush.msrb.mxu0 %v5269_v17  ;;  %1524 = vmatpush.msrb.mxu1 %v5270_v18  ;;  %v4281_v17 = vld [vmem:[%s5174_s2 + $0x58] sm:$0xff]  ;;  %v4287_v18 = vld [vmem:[%s5177_s5 + $0x50] sm:$0xff] }
 0x698   : > { %1505 = vmatpush.msrb.mxu0 %v5271_v19  ;;  %1525 = vmatpush.msrb.mxu1 %v5272_v20  ;;  %v4293_v19 = vld [vmem:[%s5177_s5 + $0x58] sm:$0xff]  ;;  %v4299_v20 = vld [vmem:[%s5174_s2 + $0x40] sm:$0xff] }
 0x69a   : > { %1506 = vmatpush.msrb.mxu0 %v5273_v22  ;;  %1526 = vmatpush.msrb.mxu1 %v5274_v23  ;;  %v4305_v22 = vld [vmem:[%s5174_s2 + $0x48] sm:$0xff]  ;;  %v4311_v23 = vld [vmem:[%s5177_s5 + $0x40] sm:$0xff] }
 0x69c   : > { %v1322_v0 = vpop.permute.xlu1 %1321  ;;  %1507 = vmatpush.msrb.mxu0 %v5275_v24  ;;  %1527 = vmatpush.msrb.mxu1 %v5276_v25  ;;  %v4317_v24 = vld [vmem:[%s5177_s5 + $0x48] sm:$0xff]  ;;  %v4323_v25 = vld [vmem:[%s5174_s2 + $0x30] sm:$0xff] }
 0x69d   : > { %2891 = vmatmul.msk.f32.vlgmr.msra.gmra.mxu2 %vm627_vm2, %v1322_v0  ;;  %2892 = vmatmul.msk.f32.vlgmr.msra.gmra.mxu3 %vm627_vm2, %v1322_v0  ;;  %5277 = vst [vmem:[#allocation17_spill] sm:$0xff] %v4317_v24 }
 0x69e   : > { %1557 = vmatpush.msra.mxu2 %v4227_v1  ;;  %1577 = vmatpush.msra.mxu3 %v4233_v4  ;;  %5278 = vst [vmem:[#allocation18_spill] sm:$0xff] %v4323_v25 }
 0x69f   : > { %1622 = vmatpush.msra.mxu0 %v4239_v5  ;;  %1642 = vmatpush.msra.mxu1 %v4245_v8 }
 0x6a0   : > { %1558 = vmatpush.msra.mxu2 %v4251_v51  ;;  %1578 = vmatpush.msra.mxu3 %v4257_v37 }
 0x6a1   : > { %1623 = vmatpush.msra.mxu0 %v4263_v12  ;;  %1643 = vmatpush.msra.mxu1 %v4269_v13 }
 0x6a2   : > { %1559 = vmatpush.msra.mxu2 %v4275_v14  ;;  %1579 = vmatpush.msra.mxu3 %v4281_v17 }
 0x6a3   : > { %1624 = vmatpush.msra.mxu0 %v4287_v18  ;;  %1644 = vmatpush.msra.mxu1 %v4293_v19 }
 0x6a4   : > { %1560 = vmatpush.msra.mxu2 %v4299_v20  ;;  %1580 = vmatpush.msra.mxu3 %v4305_v22 }
 0x6a5   : > { %1625 = vmatpush.msra.mxu0 %v4311_v23  ;;  %1645 = vmatpush.msra.mxu1 %v4317_v24 }
 0x6a6   : > { %1561 = vmatpush.msra.mxu2 %v4323_v25  ;;  %1581 = vmatpush.msra.mxu3 %v4329_v28 }
 0x6a7   : > { %1626 = vmatpush.msra.mxu0 %v4335_v29  ;;  %1646 = vmatpush.msra.mxu1 %v4341_v30 }
 0x6a8   : > { %1562 = vmatpush.msra.mxu2 %v4347_v56  ;;  %1582 = vmatpush.msra.mxu3 %v4353_v57 }
 0x6a9   : > { %1627 = vmatpush.msra.mxu0 %v4359_v58  ;;  %1647 = vmatpush.msra.mxu1 %v4365_v59 }
 0x6aa   : > { %1563 = vmatpush.msra.mxu2 %v4371_v60  ;;  %1583 = vmatpush.msra.mxu3 %v4377_v61 }
 0x6ab   : > { %1628 = vmatpush.msra.mxu0 %v4383_v62  ;;  %1648 = vmatpush.msra.mxu1 %v4389_v63 }
 0x6ac   : > { %1564 = vmatpush.msra.mxu2 %v4395_v2  ;;  %1584 = vmatpush.msra.mxu3 %v4401_v3 }
 0x6ad   : > { %1629 = vmatpush.msra.mxu0 %v4407_v6  ;;  %1649 = vmatpush.msra.mxu1 %v4413_v7 }
 0x70a   : > { %v1297_v10 = vpop.f32.mrf.mxu0  ;;  %v1317_v38 = vpop.f32.mrf.mxu1 }
 0x70b   : > { %v1298_v46 = vadd.f32 %v1297_v10, %v3961_v44 }
 0x712   : > { %v1399_v11 = vpop.f32.mrf.mxu0  ;;  %v1419_v39 = vpop.f32.mrf.mxu1 }
 0x713   : > { %v1400_v21 = vadd.f32 %v1399_v11, %v3722_v40  ;;  %v1420_v42 = vadd.f32 %v1419_v39, %v3725_v48 }
 0x715   : > { %v1425_v16 = vadd.f32 %v1400_v21, %v5294_v32 }
 0x717   : > { %v1426_v53 = vsub.f32 0.0, %v1425_v16  ;;  %v1318_v16 = vadd.f32 %v1317_v38, %v3970_v9 }
 0x719   : > { %v1427_v41 = vmul.f32 1.442695, %v1426_v53 }
 0x71b   : > { %3063 = vpow2.f32 %v1427_v41 }
 0x720   : > { %v1342_v55 = vpop.f32.mrf.mxu2  ;;  %v1362_v10 = vpop.f32.mrf.mxu3 }
 0x721   : > { %v3064_v33 = vpop.eup %3063  ;;  %v1343_v36 = vadd.f32 %v1342_v55, %v3963_v45  ;;  %v1363_v21 = vadd.f32 %v1362_v10, %v3968_v15  ;;  %v4458_v10 = vld [vmem:[#allocation7 + $0x48] sm:$0xff] }
 0x722   : > { %v1429_v34 = vadd.f32 1.0, %v3064_v33 }
 0x723   : > { %v1365_v31 = vadd.f32 %v1343_v36, %v1298_v46 }
 0x724   : > { %3065 = vrcp.f32 %v1429_v34 }
 0x725   : > { %v1366_v54 = vsub.f32 0.0, %v1365_v31 }
 0x727   : > { %v1367_v43 = vmul.f32 1.442695, %v1366_v54 }
 0x729   : > { %3067 = vpow2.f32 %v1367_v43 }
 0x72a   : > { %v3066_v49 = vpop.eup %3065 }
 0x72b   : > { %v1431_v52 = vmul.f32 %v3066_v49, %v1420_v42  ;;  %v1434_v33 = vsub.f32 1.0, %v3066_v49  ;;  %v1440_v36 = vmul.f32 %v3066_v49, %v4198_v26  ;;  %v4437_v26 = vld [vmem:[#allocation7 + $0x70] sm:$0xff]  ;;  %v4440_v49 = vld [vmem:[#allocation7 + $0x78] sm:$0xff] }
 0x72d   : > { %v1432_v47 = vadd.f32 %v1431_v52, %v1424_v35  ;;  %v4446_v35 = vld [vmem:[#allocation7 + $0x68] sm:$0xff] }
 0x72f   : > { %v3068_v27 = vpop.eup %3067  ;;  %3069 = vtanh.f32 %v1432_v47  ;;  %v4449_v47 = vld [vmem:[#allocation7 + $0x50] sm:$0xff] }
 0x730   : > { %v1369_v0 = vadd.f32 1.0, %v3068_v27  ;;  %v4452_v27 = vld [vmem:[#allocation7 + $0x58] sm:$0xff] }
 0x732   : > { %3071 = vrcp.f32 %v1369_v0  ;;  %v4455_v0 = vld [vmem:[#allocation7 + $0x40] sm:$0xff] }
 0x735   : > { %v3070_v11 = vpop.eup %3069 }
 0x736   : > { %1436 = vrot.lane.b32.xlu2 %v3070_v11, %s3429_s28  ;;  %v4463_v11 = vld [vmem:[#allocation7 + $0x30] sm:$0xff] }
 0x738   : > { %v3072_v32 = vpop.eup %3071 }
 0x739   : > { %v1371_v53 = vmul.f32 %v3072_v32, %v1363_v21  ;;  %v1374_v54 = vsub.f32 1.0, %v3072_v32  ;;  %v1380_v38 = vmul.f32 %v3072_v32, %v4193_v50  ;;  %v4443_v50 = vld [vmem:[#allocation7 + $0x60] sm:$0xff]  ;;  %v4466_v21 = vld [vmem:[#allocation7 + $0x38] sm:$0xff] }
 0x73a   : > { %v4469_v32 = vld [vmem:[#allocation7 + $0x20] sm:$0xff] }
 0x73b   : > { %v1372_v41 = vadd.f32 %v1371_v53, %v1318_v16  ;;  %v4472_v16 = vld [vmem:[#allocation7 + $0x28] sm:$0xff] }
 0x73d   : > { %3073 = vtanh.f32 %v1372_v41  ;;  %v4475_v41 = vld [vmem:[#allocation7 + $0x10] sm:$0xff] }
 0x743   : > { %v3074_v55 = vpop.eup %3073 }
 0x744   : > { %1376 = vrot.lane.b32.xlu1 %v3074_v55, %s3429_s28  ;;  %v4478_v55 = vld [vmem:[#allocation7 + $0x18] sm:$0xff] }
 0x790   : > { %v1437_v46 = vpop.permute.xlu2 %1436 }
 0x791   : > { %v1439_v34 = vmul.f32 %v1437_v46, %v1434_v33  ;;  %v4485_v33 = vld [vmem:[#allocation7] sm:$0xff]  ;;  %v4488_v46 = vld [vmem:[#allocation7 + $0x8] sm:$0xff] }
 0x793   : > { %v4426_v31 = vadd.f32 %v1440_v36, %v1439_v34 }
 0x795   : > { %1443 = vrot.lane.b32.xlu0 %v4426_v31, %s3429_s28 }
 0x7b6   : > { %v1377_v39 = vpop.permute.xlu1 %1376 }
 0x7b7   : > { %v1379_v43 = vmul.f32 %v1377_v39, %v1374_v54 }
 0x7b9   : > { %v4431_v42 = vadd.f32 %v1380_v38, %v1379_v43 }
 0x7bb   : > { %1488 = vrot.lane.b32.xlu2 %v4431_v42, %s3429_s28 }
 0x807   : > { %v1444_v52 = vpop.permute.xlu0 %1443 }
 0x808   : > { %2895 = vmatmul.msk.f32.vlgmr.msrb.gmra.mxu2 %vm627_vm2, %v1444_v52  ;;  %2896 = vmatmul.msk.f32.vlgmr.msrb.gmra.mxu3 %vm627_vm2, %v1444_v52 }
 0x809   : > { %1667 = vmatpush.msrb.mxu2 %v4437_v26  ;;  %1687 = vmatpush.msrb.mxu3 %v4440_v49 }
 0x80b   : > { %1668 = vmatpush.msrb.mxu2 %v4443_v50  ;;  %1688 = vmatpush.msrb.mxu3 %v4446_v35 }
 0x80d   : > { %1669 = vmatpush.msrb.mxu2 %v4449_v47  ;;  %1689 = vmatpush.msrb.mxu3 %v4452_v27 }
 0x80f   : > { %1670 = vmatpush.msrb.mxu2 %v4455_v0  ;;  %1690 = vmatpush.msrb.mxu3 %v4458_v10 }
 0x810   : > { %2899 = vmatmul.msk.f32.vlgmr.msra.gmra.mxu2 %vm627_vm2, %v1444_v52  ;;  %2900 = vmatmul.msk.f32.vlgmr.msra.gmra.mxu3 %vm627_vm2, %v1444_v52 }
 0x811   : > { %1671 = vmatpush.msrb.mxu2 %v4463_v11  ;;  %1691 = vmatpush.msrb.mxu3 %v4466_v21 }
 0x813   : > { %1672 = vmatpush.msrb.mxu2 %v4469_v32  ;;  %1692 = vmatpush.msrb.mxu3 %v4472_v16 }
 0x815   : > { %v1489_v53 = vpop.permute.xlu2 %1488  ;;  %1673 = vmatpush.msrb.mxu2 %v4475_v41  ;;  %1693 = vmatpush.msrb.mxu3 %v4478_v55 }
 0x816   : > { %2897 = vmatmul.msk.f32.vlgmr.msrb.gmra.mxu0 %vm627_vm2, %v1489_v53  ;;  %2898 = vmatmul.msk.f32.vlgmr.msrb.gmra.mxu1 %vm627_vm2, %v1489_v53  ;;  %v5295_v53 = vld [vmem:[#allocation29_spill] sm:$0xff] }
 0x817   : > { %1724 = vmatpush.msrb.mxu0 %v4227_v1  ;;  %1744 = vmatpush.msrb.mxu1 %v4233_v4 }
 0x818   : > { %1674 = vmatpush.msrb.mxu2 %v4485_v33  ;;  %1694 = vmatpush.msrb.mxu3 %v4488_v46 }
 0x819   : > { %1725 = vmatpush.msrb.mxu0 %v4251_v51  ;;  %1745 = vmatpush.msrb.mxu1 %v4257_v37 }
 0x81a   : > { %1789 = vmatpush.msra.mxu2 %v4239_v5  ;;  %1809 = vmatpush.msra.mxu3 %v4245_v8 }
 0x81b   : > { %1726 = vmatpush.msrb.mxu0 %v4275_v14  ;;  %1746 = vmatpush.msrb.mxu1 %v4281_v17 }
 0x81c   : > { %1790 = vmatpush.msra.mxu2 %v4263_v12  ;;  %1810 = vmatpush.msra.mxu3 %v4269_v13 }
 0x81d   : > { %1727 = vmatpush.msrb.mxu0 %v4299_v20  ;;  %1747 = vmatpush.msrb.mxu1 %v4305_v22 }
 0x81e   : > { %1791 = vmatpush.msra.mxu2 %v4287_v18  ;;  %1811 = vmatpush.msra.mxu3 %v4293_v19 }
 0x81f   : > { %1728 = vmatpush.msrb.mxu0 %v4323_v25  ;;  %1748 = vmatpush.msrb.mxu1 %v4329_v28 }
 0x820   : > { %1792 = vmatpush.msra.mxu2 %v4311_v23  ;;  %1812 = vmatpush.msra.mxu3 %v4317_v24 }
 0x821   : > { %1729 = vmatpush.msrb.mxu0 %v4347_v56  ;;  %1749 = vmatpush.msrb.mxu1 %v4353_v57 }
 0x822   : > { %1793 = vmatpush.msra.mxu2 %v4335_v29  ;;  %1813 = vmatpush.msra.mxu3 %v4341_v30 }
 0x823   : > { %1730 = vmatpush.msrb.mxu0 %v4371_v60  ;;  %1750 = vmatpush.msrb.mxu1 %v4377_v61 }
 0x824   : > { %1794 = vmatpush.msra.mxu2 %v4359_v58  ;;  %1814 = vmatpush.msra.mxu3 %v4365_v59 }
 0x825   : > { %1731 = vmatpush.msrb.mxu0 %v4395_v2  ;;  %1751 = vmatpush.msrb.mxu1 %v4401_v3 }
 0x826   : > { %1795 = vmatpush.msra.mxu2 %v4383_v62  ;;  %1815 = vmatpush.msra.mxu3 %v4389_v63 }
 0x828   : > { %1796 = vmatpush.msra.mxu2 %v4407_v6  ;;  %1816 = vmatpush.msra.mxu3 %v4413_v7 }
 0x88b   : > { %v1464_v36 = vpop.f32.mrf.mxu2  ;;  %v1484_v56 = vpop.f32.mrf.mxu3 }
 0x88c   : > { %v1465_v54 = vadd.f32 %v1464_v36, %v3961_v44 }
 0x893   : > { %v1509_v34 = vpop.f32.mrf.mxu0  ;;  %v1566_v38 = vpop.f32.mrf.mxu2 }
 0x894   : > { %v1510_v39 = vadd.f32 %v1509_v34, %v3963_v45  ;;  %v1567_v43 = vadd.f32 %v1566_v38, %v3722_v40  ;;  %v1529_v36 = vpop.f32.mrf.mxu1  ;;  %v1586_v34 = vpop.f32.mrf.mxu3 }
 0x895   : > { %v1530_v38 = vadd.f32 %v1529_v36, %v3968_v15 }
 0x896   : > { %v1532_v52 = vadd.f32 %v1510_v39, %v1465_v54  ;;  %v1592_v3 = vadd.f32 %v1567_v43, %v5295_v53  ;;  %v1587_v39 = vadd.f32 %v1586_v34, %v3725_v48 }
 0x898   : > { %v1533_v2 = vsub.f32 0.0, %v1532_v52  ;;  %v1593_v61 = vsub.f32 0.0, %v1592_v3  ;;  %v1591_v3 = vld [vmem:[#allocation2 + $0x58] sm:$0xff] }
 0x89a   : > { %v1534_v60 = vmul.f32 1.442695, %v1533_v2  ;;  %v1594_v57 = vmul.f32 1.442695, %v1593_v61  ;;  %v1485_v2 = vadd.f32 %v1484_v56, %v3970_v9 }
 0x89c   : > { %3075 = vpow2.f32 %v1534_v60 }
 0x89d   : > { %3077 = vpow2.f32 %v1594_v57 }
 0x8a2   : > { %v3076_v28 = vpop.eup %3075 }
 0x8a3   : > { %v3078_v25 = vpop.eup %3077  ;;  %v1536_v7 = vadd.f32 1.0, %v3076_v28 }
 0x8a4   : > { %v1596_v6 = vadd.f32 1.0, %v3078_v25 }
 0x8a5   : > { %3079 = vrcp.f32 %v1536_v7 }
 0x8a6   : > { %3081 = vrcp.f32 %v1596_v6 }
 0x8ab   : > { %v3080_v54 = vpop.eup %3079 }
 0x8ac   : > { %v3082_v43 = vpop.eup %3081  ;;  %v1538_v61 = vmul.f32 %v3080_v54, %v1530_v38  ;;  %v1541_v6 = vsub.f32 1.0, %v3080_v54  ;;  %v1547_v34 = vmul.f32 %v3080_v54, %v4431_v42  ;;  %v5296_v42 = vld [vmem:[#allocation35_spill] sm:$0xff]  ;;  %v5297_v54 = vld [vmem:[#allocation36_spill] sm:$0xff] }
 0x8ad   : > { %v1598_v60 = vmul.f32 %v3082_v43, %v1587_v39  ;;  %v1601_v7 = vsub.f32 1.0, %v3082_v43  ;;  %v1607_v38 = vmul.f32 %v3082_v43, %v4426_v31  ;;  %v5298_v43 = vld [vmem:[#allocation18_spill] sm:$0xff] }
 0x8ae   : > { %v1539_v57 = vadd.f32 %v1538_v61, %v1485_v2 }
 0x8af   : > { %v1599_v52 = vadd.f32 %v1598_v60, %v1591_v3  ;;  %v5300_v3 = vld [vmem:[#allocation22_spill] sm:$0xff] }
 0x8b0   : > { %3083 = vtanh.f32 %v1539_v57  ;;  %v5299_v57 = vld [vmem:[#allocation19_spill] sm:$0xff] }
 0x8b1   : > { %3085 = vtanh.f32 %v1599_v52  ;;  %v5301_v52 = vld [vmem:[#allocation23_spill] sm:$0xff] }
 0x8b6   : > { %v3084_v25 = vpop.eup %3083 }
 0x8b7   : > { %v3086_v28 = vpop.eup %3085  ;;  %1543 = vrot.lane.b32.xlu1 %v3084_v25, %s3429_s28  ;;  %v5302_v25 = vld [vmem:[#allocation26_spill] sm:$0xff] }
 0x8b8   : > { %1603 = vrot.lane.b32.xlu0 %v3086_v28, %s3429_s28  ;;  %v5303_v28 = vld [vmem:[#allocation27_spill] sm:$0xff] }
 0x929   : > { %v1544_v53 = vpop.permute.xlu1 %1543 }
 0x92a   : > { %v1604_v36 = vpop.permute.xlu0 %1603  ;;  %v1546_v56 = vmul.f32 %v1544_v53, %v1541_v6  ;;  %v5304_v6 = vld [vmem:[#allocation33_spill] sm:$0xff] }
 0x92b   : > { %v1606_v39 = vmul.f32 %v1604_v36, %v1601_v7  ;;  %v5305_v7 = vld [vmem:[#allocation34_spill] sm:$0xff] }
 0x92c   : > { %v4532_v2 = vadd.f32 %v1547_v34, %v1546_v56  ;;  %v5306_v56 = vld [vmem:[#allocation30_spill] sm:$0xff] }
 0x92d   : > { %v4534_v61 = vadd.f32 %v1607_v38, %v1606_v39 }
 0x92e   : > { %1655 = vrot.lane.b32.xlu0 %v4532_v2, %s3429_s28 }
 0x92f   : > { %1610 = vrot.lane.b32.xlu2 %v4534_v61, %s3429_s28 }
 0x989   : > { %v1611_v60 = vpop.permute.xlu2 %1610 }
 0x98a   : > { %2901 = vmatmul.msk.f32.vlgmr.msra.gmra.mxu0 %vm627_vm2, %v1611_v60  ;;  %2902 = vmatmul.msk.f32.vlgmr.msra.gmra.mxu1 %vm627_vm2, %v1611_v60 }
 0x98b   : > { %1834 = vmatpush.msra.mxu0 %v4437_v26  ;;  %1854 = vmatpush.msra.mxu1 %v4440_v49 }
 0x98d   : > { %1835 = vmatpush.msra.mxu0 %v4443_v50  ;;  %1855 = vmatpush.msra.mxu1 %v4446_v35 }
 0x98f   : > { %1836 = vmatpush.msra.mxu0 %v4449_v47  ;;  %1856 = vmatpush.msra.mxu1 %v4452_v27 }
 0x991   : > { %1837 = vmatpush.msra.mxu0 %v4455_v0  ;;  %1857 = vmatpush.msra.mxu1 %v4458_v10 }
 0x992   : > { %2905 = vmatmul.msk.f32.vlgmr.msrb.gmra.mxu0 %vm627_vm2, %v1611_v60  ;;  %2906 = vmatmul.msk.f32.vlgmr.msrb.gmra.mxu1 %vm627_vm2, %v1611_v60 }
 0x993   : > { %1838 = vmatpush.msra.mxu0 %v4463_v11  ;;  %1858 = vmatpush.msra.mxu1 %v4466_v21 }
 0x995   : > { %1839 = vmatpush.msra.mxu0 %v4469_v32  ;;  %1859 = vmatpush.msra.mxu1 %v4472_v16 }
 0x997   : > { %1840 = vmatpush.msra.mxu0 %v4475_v41  ;;  %1860 = vmatpush.msra.mxu1 %v4478_v55 }
 0x999   : > { %1841 = vmatpush.msra.mxu0 %v4485_v33  ;;  %1861 = vmatpush.msra.mxu1 %v4488_v46 }
 0x99b   : > { %1956 = vmatpush.msrb.mxu0 %v4239_v5  ;;  %1976 = vmatpush.msrb.mxu1 %v4245_v8 }
 0x99d   : > { %1957 = vmatpush.msrb.mxu0 %v4263_v12  ;;  %1977 = vmatpush.msrb.mxu1 %v4269_v13 }
 0x99f   : > { %1958 = vmatpush.msrb.mxu0 %v4287_v18  ;;  %1978 = vmatpush.msrb.mxu1 %v4293_v19 }
 0x9a0   : > { %v1656_v31 = vpop.permute.xlu0 %1655 }
 0x9a1   : > { %1959 = vmatpush.msrb.mxu0 %v4311_v23  ;;  %1979 = vmatpush.msrb.mxu1 %v4317_v24 }
 0x9a2   : > { %2903 = vmatmul.msk.f32.vlgmr.msrb.gmra.mxu2 %vm627_vm2, %v1656_v31  ;;  %2904 = vmatmul.msk.f32.vlgmr.msrb.gmra.mxu3 %vm627_vm2, %v1656_v31 }
 0x9a3   : > { %1891 = vmatpush.msrb.mxu2 %v4227_v1  ;;  %1911 = vmatpush.msrb.mxu3 %v4233_v4 }
 0x9a4   : > { %1960 = vmatpush.msrb.mxu0 %v4335_v29  ;;  %1980 = vmatpush.msrb.mxu1 %v4341_v30 }
 0x9a5   : > { %1892 = vmatpush.msrb.mxu2 %v4251_v51  ;;  %1912 = vmatpush.msrb.mxu3 %v4257_v37 }
 0x9a6   : > { %1961 = vmatpush.msrb.mxu0 %v4359_v58  ;;  %1981 = vmatpush.msrb.mxu1 %v4365_v59 }
 0x9a7   : > { %1893 = vmatpush.msrb.mxu2 %v4275_v14  ;;  %1913 = vmatpush.msrb.mxu3 %v4281_v17 }
 0x9a8   : > { %1962 = vmatpush.msrb.mxu0 %v4383_v62  ;;  %1982 = vmatpush.msrb.mxu1 %v4389_v63 }
 0x9a9   : > { %1894 = vmatpush.msrb.mxu2 %v4299_v20  ;;  %1914 = vmatpush.msrb.mxu3 %v4305_v22 }
 0x9aa   : > { %1963 = vmatpush.msrb.mxu0 %v5296_v42  ;;  %1983 = vmatpush.msrb.mxu1 %v5297_v54 }
 0x9ab   : > { %1895 = vmatpush.msrb.mxu2 %v5298_v43  ;;  %1915 = vmatpush.msrb.mxu3 %v5299_v57 }
 0x9ad   : > { %1896 = vmatpush.msrb.mxu2 %v5300_v3  ;;  %1916 = vmatpush.msrb.mxu3 %v5301_v52 }
 0x9af   : > { %1897 = vmatpush.msrb.mxu2 %v5302_v25  ;;  %1917 = vmatpush.msrb.mxu3 %v5303_v28 }
 0x9b1   : > { %1898 = vmatpush.msrb.mxu2 %v5304_v6  ;;  %1918 = vmatpush.msrb.mxu3 %v5305_v7 }
 0xa07   : > { %v1631_v53 = vpop.f32.mrf.mxu0  ;;  %v1651_v31 = vpop.f32.mrf.mxu1 }
 0xa08   : > { %v1632_v59 = vadd.f32 %v1631_v53, %v3961_v44 }
 0xa0f   : > { %v1733_v36 = vpop.f32.mrf.mxu0  ;;  %v1753_v63 = vpop.f32.mrf.mxu1 }
 0xa10   : > { %v1734_v34 = vadd.f32 %v1733_v36, %v3722_v40  ;;  %v1754_v30 = vadd.f32 %v1753_v63, %v3725_v48  ;;  %v1758_v40 = vld [vmem:[#allocation2 + $0x68] sm:$0xff]  ;;  %v1652_v63 = vadd.f32 %v1651_v31, %v3970_v9 }
 0xa12   : > { %v1759_v38 = vadd.f32 %v1734_v34, %v5306_v56 }
 0xa14   : > { %v1760_v39 = vsub.f32 0.0, %v1759_v38 }
 0xa16   : > { %v1761_v60 = vmul.f32 1.442695, %v1760_v39 }
 0xa18   : > { %3087 = vpow2.f32 %v1761_v60 }
 0xa1e   : > { %v3088_v54 = vpop.eup %3087 }
 0xa1f   : > { %v1763_v42 = vadd.f32 1.0, %v3088_v54 }
 0xa21   : > { %3089 = vrcp.f32 %v1763_v42 }
 0xa25   : > { %v1676_v62 = vpop.f32.mrf.mxu2  ;;  %v1696_v53 = vpop.f32.mrf.mxu3 }
 0xa26   : > { %v1677_v58 = vadd.f32 %v1676_v62, %v3963_v45  ;;  %v1697_v62 = vadd.f32 %v1696_v53, %v3968_v15 }
 0xa27   : > { %v3090_v29 = vpop.eup %3089 }
 0xa28   : > { %v1699_v24 = vadd.f32 %v1677_v58, %v1632_v59  ;;  %v1765_v36 = vmul.f32 %v3090_v29, %v1754_v30 }
 0xa2a   : > { %v1700_v34 = vsub.f32 0.0, %v1699_v24  ;;  %v1766_v56 = vadd.f32 %v1765_v36, %v1758_v40 }
 0xa2c   : > { %v1701_v38 = vmul.f32 1.442695, %v1700_v34  ;;  %3091 = vtanh.f32 %v1766_v56  ;;  %v1768_v56 = vsub.f32 1.0, %v3090_v29 }
 0xa2e   : > { %3093 = vpow2.f32 %v1701_v38 }
 0xa32   : > { %v3092_v39 = vpop.eup %3091 }
 0xa33   : > { %1770 = vrot.lane.b32.xlu1 %v3092_v39, %s3429_s28 }
 0xa34   : > { %v3094_v54 = vpop.eup %3093 }
 0xa35   : > { %v1703_v42 = vadd.f32 1.0, %v3094_v54  ;;  %v1774_v54 = vmul.f32 %v3090_v29, %v4534_v61  ;;  %v5307_v29 = vld [vmem:[#allocation17_spill] sm:$0xff]  ;;  %v5308_v61 = vld [vmem:[#allocation20_spill] sm:$0xff] }
 0xa37   : > { %3095 = vrcp.f32 %v1703_v42 }
 0xa3d   : > { %v3096_v60 = vpop.eup %3095 }
 0xa3e   : > { %v1705_v58 = vmul.f32 %v3096_v60, %v1697_v62  ;;  %v1708_v40 = vsub.f32 1.0, %v3096_v60  ;;  %v1714_v36 = vmul.f32 %v3096_v60, %v4532_v2  ;;  %v5309_v62 = vld [vmem:[#allocation21_spill] sm:$0xff]  ;;  %v5310_v60 = vld [vmem:[#allocation24_spill] sm:$0xff] }
 0xa40   : > { %v1706_v30 = vadd.f32 %v1705_v58, %v1652_v63  ;;  %v5311_v63 = vld [vmem:[#allocation25_spill] sm:$0xff]  ;;  %v5312_v58 = vld [vmem:[#allocation31_spill] sm:$0xff] }
 0xa42   : > { %3097 = vtanh.f32 %v1706_v30  ;;  %v5313_v30 = vld [vmem:[#allocation32_spill] sm:$0xff] }
 0xa48   : > { %v3098_v24 = vpop.eup %3097 }
 0xa49   : > { %1710 = vrot.lane.b32.xlu2 %v3098_v24, %s3429_s28  ;;  %v5314_v24 = vld [vmem:[#allocation35_spill] sm:$0xff] }
 0xaa3   : > { %v1711_v59 = vpop.permute.xlu2 %1710 }
 0xaa4   : > { %v1713_v34 = vmul.f32 %v1711_v59, %v1708_v40  ;;  %v5315_v40 = vld [vmem:[#allocation36_spill] sm:$0xff] }
 0xaa5   : > { %v1771_v39 = vpop.permute.xlu1 %1770 }
 0xaa6   : > { %v4604_v38 = vadd.f32 %v1714_v36, %v1713_v34  ;;  %v1773_v42 = vmul.f32 %v1771_v39, %v1768_v56 }
 0xaa8   : > { %1822 = vrot.lane.b32.xlu1 %v4604_v38, %s3429_s28  ;;  %v4609_v31 = vadd.f32 %v1774_v54, %v1773_v42 }
 0xaaa   : > { %1777 = vrot.lane.b32.xlu0 %v4609_v31, %s3429_s28 }
 0xb1a   : > { %v1823_v53 = vpop.permute.xlu1 %1822 }
 0xb1b   : > { %2909 = vmatmul.msk.f32.vlgmr.msra.gmra.mxu0 %vm627_vm2, %v1823_v53  ;;  %2910 = vmatmul.msk.f32.vlgmr.msra.gmra.mxu1 %vm627_vm2, %v1823_v53 }
 0xb1c   : > { %2058 = vmatpush.msra.mxu0 %v4227_v1  ;;  %2078 = vmatpush.msra.mxu1 %v4233_v4  ;;  %v1778_v2 = vpop.permute.xlu0 %1777 }
 0xb1d   : > { %2907 = vmatmul.msk.f32.vlgmr.msra.gmra.mxu2 %vm627_vm2, %v1778_v2  ;;  %2908 = vmatmul.msk.f32.vlgmr.msra.gmra.mxu3 %vm627_vm2, %v1778_v2 }
 0xb1e   : > { %2001 = vmatpush.msra.mxu2 %v4437_v26  ;;  %2021 = vmatpush.msra.mxu3 %v4440_v49 }
 0xb1f   : > { %2059 = vmatpush.msra.mxu0 %v4251_v51  ;;  %2079 = vmatpush.msra.mxu1 %v4257_v37 }
 0xb20   : > { %2002 = vmatpush.msra.mxu2 %v4443_v50  ;;  %2022 = vmatpush.msra.mxu3 %v4446_v35 }
 0xb21   : > { %2060 = vmatpush.msra.mxu0 %v4275_v14  ;;  %2080 = vmatpush.msra.mxu1 %v4281_v17 }
 0xb22   : > { %2003 = vmatpush.msra.mxu2 %v4449_v47  ;;  %2023 = vmatpush.msra.mxu3 %v4452_v27 }
 0xb23   : > { %2061 = vmatpush.msra.mxu0 %v4299_v20  ;;  %2081 = vmatpush.msra.mxu1 %v4305_v22 }
 0xb24   : > { %2004 = vmatpush.msra.mxu2 %v4455_v0  ;;  %2024 = vmatpush.msra.mxu3 %v4458_v10 }
 0xb25   : > { %2911 = vmatmul.msk.f32.vlgmr.msrb.gmra.mxu2 %vm627_vm2, %v1778_v2  ;;  %2912 = vmatmul.msk.f32.vlgmr.msrb.gmra.mxu3 %vm627_vm2, %v1778_v2  ;;  %v5316_v2 = vld [vmem:[#allocation16_spill] sm:$0xff] }
 0xb26   : > { %2005 = vmatpush.msra.mxu2 %v4463_v11  ;;  %2025 = vmatpush.msra.mxu3 %v4466_v21 }
 0xb27   : > { %2062 = vmatpush.msra.mxu0 %v5298_v43  ;;  %2082 = vmatpush.msra.mxu1 %v5299_v57 }
 0xb28   : > { %2006 = vmatpush.msra.mxu2 %v4469_v32  ;;  %2026 = vmatpush.msra.mxu3 %v4472_v16 }
 0xb29   : > { %2063 = vmatpush.msra.mxu0 %v5300_v3  ;;  %2083 = vmatpush.msra.mxu1 %v5301_v52 }
 0xb2a   : > { %2007 = vmatpush.msra.mxu2 %v4475_v41  ;;  %2027 = vmatpush.msra.mxu3 %v4478_v55 }
 0xb2b   : > { %2064 = vmatpush.msra.mxu0 %v5302_v25  ;;  %2084 = vmatpush.msra.mxu1 %v5303_v28 }
 0xb2c   : > { %2008 = vmatpush.msra.mxu2 %v4485_v33  ;;  %2028 = vmatpush.msra.mxu3 %v4488_v46 }
 0xb2d   : > { %2065 = vmatpush.msra.mxu0 %v5304_v6  ;;  %2085 = vmatpush.msra.mxu1 %v5305_v7 }
 0xb2e   : > { %2123 = vmatpush.msrb.mxu2 %v4239_v5  ;;  %2143 = vmatpush.msrb.mxu3 %v4245_v8 }
 0xb30   : > { %2124 = vmatpush.msrb.mxu2 %v4263_v12  ;;  %2144 = vmatpush.msrb.mxu3 %v4269_v13 }
 0xb32   : > { %2125 = vmatpush.msrb.mxu2 %v4287_v18  ;;  %2145 = vmatpush.msrb.mxu3 %v4293_v19 }
 0xb34   : > { %2126 = vmatpush.msrb.mxu2 %v4311_v23  ;;  %2146 = vmatpush.msrb.mxu3 %v5307_v29 }
 0xb36   : > { %2127 = vmatpush.msrb.mxu2 %v5308_v61  ;;  %2147 = vmatpush.msrb.mxu3 %v5309_v62 }
 0xb38   : > { %2128 = vmatpush.msrb.mxu2 %v5310_v60  ;;  %2148 = vmatpush.msrb.mxu3 %v5311_v63 }
 0xb3a   : > { %2129 = vmatpush.msrb.mxu2 %v5312_v58  ;;  %2149 = vmatpush.msrb.mxu3 %v5313_v30  ;;  %v1924_v58 = vld [vmem:[#allocation2 + $0x70] sm:$0xff] }
 0xb3c   : > { %2130 = vmatpush.msrb.mxu2 %v5314_v24  ;;  %2150 = vmatpush.msrb.mxu3 %v5315_v40 }
 0xb98   : > { %v1843_v59 = vpop.f32.mrf.mxu0  ;;  %v1863_v29 = vpop.f32.mrf.mxu1 }
 0xb99   : > { %v1844_v34 = vadd.f32 %v1843_v59, %v3963_v45 }
 0xba0   : > { %v1798_v36 = vpop.f32.mrf.mxu2  ;;  %v1818_v40 = vpop.f32.mrf.mxu3 }
 0xba1   : > { %v1799_v56 = vadd.f32 %v1798_v36, %v3961_v44  ;;  %v1864_v36 = vadd.f32 %v1863_v29, %v3968_v15 }
 0xba3   : > { %v1866_v39 = vadd.f32 %v1844_v34, %v1799_v56 }
 0xba5   : > { %v1867_v54 = vsub.f32 0.0, %v1866_v39  ;;  %v1819_v39 = vadd.f32 %v1818_v40, %v3970_v9 }
 0xba7   : > { %v1868_v42 = vmul.f32 1.442695, %v1867_v54 }
 0xba8   : > { %v1900_v53 = vpop.f32.mrf.mxu2 }
 0xba9   : > { %3099 = vpow2.f32 %v1868_v42  ;;  %v1901_v63 = vadd.f32 %v1900_v53, %v5316_v2  ;;  %v1920_v53 = vpop.f32.mrf.mxu3 }
 0xbab   : > { %v1926_v60 = vadd.f32 %v1924_v58, %v1901_v63  ;;  %v1925_v58 = vld [vmem:[#allocation2 + $0x78] sm:$0xff] }
 0xbad   : > { %v1927_v30 = vsub.f32 0.0, %v1926_v60  ;;  %v1921_v60 = vadd.f32 %v1920_v53, %v3725_v48 }
 0xbaf   : > { %v3100_v62 = vpop.eup %3099  ;;  %v1928_v24 = vmul.f32 1.442695, %v1927_v30 }
 0xbb0   : > { %v1870_v61 = vadd.f32 1.0, %v3100_v62 }
 0xbb1   : > { %3101 = vpow2.f32 %v1928_v24 }
 0xbb2   : > { %3103 = vrcp.f32 %v1870_v61 }
 0xbb7   : > { %v3102_v59 = vpop.eup %3101 }
 0xbb8   : > { %v3104_v34 = vpop.eup %3103  ;;  %v1930_v56 = vadd.f32 1.0, %v3102_v59 }
 0xbb9   : > { %v1872_v54 = vmul.f32 %v3104_v34, %v1864_v36 }
 0xbba   : > { %3105 = vrcp.f32 %v1930_v56 }
 0xbbb   : > { %v1873_v42 = vadd.f32 %v1872_v54, %v1819_v39  ;;  %v1875_v39 = vsub.f32 1.0, %v3104_v34 }
 0xbbd   : > { %3107 = vtanh.f32 %v1873_v42  ;;  %v1881_v42 = vmul.f32 %v3104_v34, %v4604_v38 }
 0xbc0   : > { %v3106_v63 = vpop.eup %3105 }
 0xbc1   : > { %v1932_v62 = vmul.f32 %v3106_v63, %v1921_v60  ;;  %v1935_v24 = vsub.f32 1.0, %v3106_v63  ;;  %v1941_v59 = vmul.f32 %v3106_v63, %v4609_v31 }
 0xbc3   : > { %v3108_v61 = vpop.eup %3107  ;;  %v1933_v30 = vadd.f32 %v1932_v62, %v1925_v58 }
 0xbc4   : > { %1877 = vrot.lane.b32.xlu0 %v3108_v61, %s3429_s28 }
 0xbc5   : > { %3109 = vtanh.f32 %v1933_v30 }
 0xbcb   : > { %v3110_v29 = vpop.eup %3109 }
 0xbcc   : > { %1937 = vrot.lane.b32.xlu2 %v3110_v29, %s3429_s28 }
 0xc26   : > { %v1938_v40 = vpop.permute.xlu2 %1937 }
 0xc27   : > { %v1940_v36 = vmul.f32 %v1938_v40, %v1935_v24 }
 0xc29   : > { %v4676_v56 = vadd.f32 %v1941_v59, %v1940_v36 }
 0xc2b   : > { %1944 = vrot.lane.b32.xlu1 %v4676_v56, %s3429_s28 }
 0xc36   : > { %v1878_v54 = vpop.permute.xlu0 %1877 }
 0xc37   : > { %v1880_v53 = vmul.f32 %v1878_v54, %v1875_v39 }
 0xc39   : > { %v4681_v60 = vadd.f32 %v1881_v42, %v1880_v53  ;;  %v2092_v53 = vld [vmem:[#allocation2 + $0x88] sm:$0xff] }
 0xc3b   : > { %1989 = vrot.lane.b32.xlu2 %v4681_v60, %s3429_s28 }
 0xc95   : > { %v1990_v62 = vpop.permute.xlu2 %1989 }
 0xc96   : > { %2915 = vmatmul.msk.f32.vlgmr.msra.gmra.mxu2 %vm627_vm2, %v1990_v62  ;;  %2916 = vmatmul.msk.f32.vlgmr.msra.gmra.mxu3 %vm627_vm2, %v1990_v62 }
 0xc97   : > { %2225 = vmatpush.msra.mxu2 %v4227_v1  ;;  %2245 = vmatpush.msra.mxu3 %v4233_v4  ;;  %v5317_v1 = vld [vmem:[#allocation17_spill] sm:$0xff]  ;;  %v5318_v4 = vld [vmem:[#allocation20_spill] sm:$0xff] }
 0xc99   : > { %2226 = vmatpush.msra.mxu2 %v4251_v51  ;;  %2246 = vmatpush.msra.mxu3 %v4257_v37  ;;  %v5319_v51 = vld [vmem:[#allocation21_spill] sm:$0xff]  ;;  %v5320_v37 = vld [vmem:[#allocation24_spill] sm:$0xff] }
 0xc9b   : > { %2227 = vmatpush.msra.mxu2 %v4275_v14  ;;  %2247 = vmatpush.msra.mxu3 %v4281_v17  ;;  %v5325_v14 = vld [vmem:[#allocation36_spill] sm:$0xff] }
 0xc9d   : > { %v1945_v38 = vpop.permute.xlu1 %1944  ;;  %2228 = vmatpush.msra.mxu2 %v4299_v20  ;;  %2248 = vmatpush.msra.mxu3 %v4305_v22 }
 0xc9e   : > { %2913 = vmatmul.msk.f32.vlgmr.msrb.gmra.mxu0 %vm627_vm2, %v1945_v38  ;;  %2914 = vmatmul.msk.f32.vlgmr.msrb.gmra.mxu1 %vm627_vm2, %v1945_v38 }
 0xc9f   : > { %2168 = vmatpush.msrb.mxu0 %v4437_v26  ;;  %2188 = vmatpush.msrb.mxu1 %v4440_v49 }
 0xca0   : > { %2229 = vmatpush.msra.mxu2 %v5298_v43  ;;  %2249 = vmatpush.msra.mxu3 %v5299_v57 }
 0xca1   : > { %2169 = vmatpush.msrb.mxu0 %v4443_v50  ;;  %2189 = vmatpush.msrb.mxu1 %v4446_v35 }
 0xca2   : > { %2230 = vmatpush.msra.mxu2 %v5300_v3  ;;  %2250 = vmatpush.msra.mxu3 %v5301_v52  ;;  %v2091_v52 = vld [vmem:[#allocation2 + $0x80] sm:$0xff] }
 0xca3   : > { %2170 = vmatpush.msrb.mxu0 %v4449_v47  ;;  %2190 = vmatpush.msrb.mxu1 %v4452_v27 }
 0xca4   : > { %2231 = vmatpush.msra.mxu2 %v5302_v25  ;;  %2251 = vmatpush.msra.mxu3 %v5303_v28 }
 0xca5   : > { %2171 = vmatpush.msrb.mxu0 %v4455_v0  ;;  %2191 = vmatpush.msrb.mxu1 %v4458_v10 }
 0xca6   : > { %2917 = vmatmul.msk.f32.vlgmr.msra.gmra.mxu0 %vm627_vm2, %v1945_v38  ;;  %2918 = vmatmul.msk.f32.vlgmr.msra.gmra.mxu1 %vm627_vm2, %v1945_v38 }
 0xca7   : > { %2232 = vmatpush.msra.mxu2 %v5304_v6  ;;  %2252 = vmatpush.msra.mxu3 %v5305_v7 }
 0xca8   : > { %2172 = vmatpush.msrb.mxu0 %v4463_v11  ;;  %2192 = vmatpush.msrb.mxu1 %v4466_v21 }
 0xcaa   : > { %2173 = vmatpush.msrb.mxu0 %v4469_v32  ;;  %2193 = vmatpush.msrb.mxu1 %v4472_v16 }
 0xcac   : > { %2174 = vmatpush.msrb.mxu0 %v4475_v41  ;;  %2194 = vmatpush.msrb.mxu1 %v4478_v55 }
 0xcae   : > { %2175 = vmatpush.msrb.mxu0 %v4485_v33  ;;  %2195 = vmatpush.msrb.mxu1 %v4488_v46 }
 0xcb0   : > { %2290 = vmatpush.msra.mxu0 %v4239_v5  ;;  %2310 = vmatpush.msra.mxu1 %v4245_v8  ;;  %v5321_v5 = vld [vmem:[#allocation25_spill] sm:$0xff]  ;;  %v5322_v8 = vld [vmem:[#allocation31_spill] sm:$0xff] }
 0xcb2   : > { %2291 = vmatpush.msra.mxu0 %v4263_v12  ;;  %2311 = vmatpush.msra.mxu1 %v4269_v13  ;;  %v5323_v12 = vld [vmem:[#allocation32_spill] sm:$0xff]  ;;  %v5324_v13 = vld [vmem:[#allocation35_spill] sm:$0xff] }
 0xcb4   : > { %2292 = vmatpush.msra.mxu0 %v4287_v18  ;;  %2312 = vmatpush.msra.mxu1 %v4293_v19 }
 0xcb6   : > { %2293 = vmatpush.msra.mxu0 %v4311_v23  ;;  %2313 = vmatpush.msra.mxu1 %v5317_v1 }
 0xcb8   : > { %2294 = vmatpush.msra.mxu0 %v5318_v4  ;;  %2314 = vmatpush.msra.mxu1 %v5319_v51 }
 0xcba   : > { %2295 = vmatpush.msra.mxu0 %v5320_v37  ;;  %2315 = vmatpush.msra.mxu1 %v5321_v5 }
 0xcbc   : > { %2296 = vmatpush.msra.mxu0 %v5322_v8  ;;  %2316 = vmatpush.msra.mxu1 %v5323_v12 }
 0xcbe   : > { %2297 = vmatpush.msra.mxu0 %v5324_v13  ;;  %2317 = vmatpush.msra.mxu1 %v5325_v14 }
 0xd19   : > { %v2010_v17 = vpop.f32.mrf.mxu2  ;;  %v2030_v63 = vpop.f32.mrf.mxu3 }
 0xd1a   : > { %v2011_v19 = vadd.f32 %v2010_v17, %v3963_v45  ;;  %v2031_v61 = vadd.f32 %v2030_v63, %v3968_v15  ;;  %v4962_v63 = vld [vmem:[%s5177_s5] sm:$0xff] }
 0xd1b   : > { %v1965_v18 = vpop.f32.mrf.mxu0  ;;  %v1985_v34 = vpop.f32.mrf.mxu1 }
 0xd1c   : > { %v1966_v20 = vadd.f32 %v1965_v18, %v3961_v44  ;;  %v1986_v24 = vadd.f32 %v1985_v34, %v3970_v9  ;;  %v4956_v34 = vld [vmem:[%s5174_s2 + $0x8] sm:$0xff] }
 0xd1e   : > { %v2033_v22 = vadd.f32 %v2011_v19, %v1966_v20  ;;  %v4884_v20 = vld [vmem:[%s5174_s2 + $0x38] sm:$0xff] }
 0xd20   : > { %v2034_v23 = vsub.f32 0.0, %v2033_v22  ;;  %v4890_v22 = vld [vmem:[%s5177_s5 + $0x30] sm:$0xff] }
 0xd22   : > { %v2035_v43 = vmul.f32 1.442695, %v2034_v23  ;;  %v4896_v23 = vld [vmem:[%s5177_s5 + $0x38] sm:$0xff] }
 0xd23   : > { %v2067_v57 = vpop.f32.mrf.mxu0  ;;  %v2087_v36 = vpop.f32.mrf.mxu1 }
 0xd24   : > { %3111 = vpow2.f32 %v2035_v43  ;;  %v2068_v3 = vadd.f32 %v2067_v57, %v5316_v2  ;;  %v2088_v39 = vadd.f32 %v2087_v36, %v3725_v48  ;;  %v4902_v43 = vld [vmem:[%s5174_s2 + $0x20] sm:$0xff]  ;;  %v4908_v57 = vld [vmem:[%s5174_s2 + $0x28] sm:$0xff] }
 0xd26   : > { %v2093_v25 = vadd.f32 %v2091_v52, %v2068_v3  ;;  %v4914_v3 = vld [vmem:[%s5177_s5 + $0x20] sm:$0xff]  ;;  %v4920_v52 = vld [vmem:[%s5177_s5 + $0x28] sm:$0xff] }
 0xd28   : > { %v2094_v28 = vsub.f32 0.0, %v2093_v25  ;;  %v4926_v25 = vld [vmem:[%s5174_s2 + $0x10] sm:$0xff] }
 0xd2a   : > { %v3112_v6 = vpop.eup %3111  ;;  %v2095_v7 = vmul.f32 1.442695, %v2094_v28  ;;  %v4932_v28 = vld [vmem:[%s5174_s2 + $0x18] sm:$0xff] }
 0xd2b   : > { %v2037_v31 = vadd.f32 1.0, %v3112_v6  ;;  %v4938_v6 = vld [vmem:[%s5177_s5 + $0x10] sm:$0xff] }
 0xd2c   : > { %3113 = vpow2.f32 %v2095_v7  ;;  %v4944_v7 = vld [vmem:[%s5177_s5 + $0x18] sm:$0xff] }
 0xd2d   : > { %3115 = vrcp.f32 %v2037_v31  ;;  %v4950_v31 = vld [vmem:[%s5174_s2] sm:$0xff] }
 0xd32   : > { %v3114_v58 = vpop.eup %3113 }
 0xd33   : > { %v3116_v30 = vpop.eup %3115  ;;  %v2097_v29 = vadd.f32 1.0, %v3114_v58  ;;  %v4968_v58 = vld [vmem:[%s5177_s5 + $0x8] sm:$0xff] }
 0xd34   : > { %v2039_v40 = vmul.f32 %v3116_v30, %v2031_v61  ;;  %v2042_v4 = vsub.f32 1.0, %v3116_v30  ;;  %v2048_v37 = vmul.f32 %v3116_v30, %v4681_v60  ;;  %v4878_v60 = vld [vmem:[%s5174_s2 + $0x30] sm:$0xff] }
 0xd35   : > { %3117 = vrcp.f32 %v2097_v29 }
 0xd36   : > { %v2040_v59 = vadd.f32 %v2039_v40, %v1986_v24  ;;  %v2258_v24 = vld [vmem:[#allocation2 + $0x90] sm:$0xff] }
 0xd38   : > { %3119 = vtanh.f32 %v2040_v59 }
 0xd3b   : > { %v3118_v54 = vpop.eup %3117 }
 0xd3c   : > { %v2099_v42 = vmul.f32 %v3118_v54, %v2088_v39  ;;  %v2102_v12 = vsub.f32 1.0, %v3118_v54  ;;  %v2108_v14 = vmul.f32 %v3118_v54, %v4676_v56  ;;  %v4872_v56 = vld [vmem:[%s5177_s5 + $0x48] sm:$0xff] }
 0xd3e   : > { %v3120_v62 = vpop.eup %3119  ;;  %v2100_v38 = vadd.f32 %v2099_v42, %v2092_v53 }
 0xd3f   : > { %2044 = vrot.lane.b32.xlu1 %v3120_v62, %s3429_s28 }
 0xd40   : > { %3121 = vtanh.f32 %v2100_v38 }
 0xd46   : > { %v3122_v1 = vpop.eup %3121 }
 0xd47   : > { %2104 = vrot.lane.b32.xlu0 %v3122_v1, %s3429_s28 }
 0xdb1   : > { %v2045_v51 = vpop.permute.xlu1 %2044 }
 0xdb2   : > { %v2047_v5 = vmul.f32 %v2045_v51, %v2042_v4 }
 0xdb4   : > { %v4748_v8 = vadd.f32 %v2048_v37, %v2047_v5 }
 0xdb6   : > { %2156 = vrot.lane.b32.xlu0 %v4748_v8, %s3429_s28 }
 0xdb9   : > { %v2105_v13 = vpop.permute.xlu0 %2104 }
 0xdba   : > { %v2107_v17 = vmul.f32 %v2105_v13, %v2102_v12 }
 0xdbc   : > { %v4753_v18 = vadd.f32 %v2108_v14, %v2107_v17 }
 0xdbe   : > { %2111 = vrot.lane.b32.xlu2 %v4753_v18, %s3429_s28 }
 0xe18   : > { %v2112_v19 = vpop.permute.xlu2 %2111 }
 0xe19   : > { %2919 = vmatmul.msk.f32.vlgmr.msrb.gmra.mxu2 %vm627_vm2, %v2112_v19  ;;  %2920 = vmatmul.msk.f32.vlgmr.msrb.gmra.mxu3 %vm627_vm2, %v2112_v19 }
 0xe1a   : > { %2335 = vmatpush.msrb.mxu2 %v4437_v26  ;;  %2355 = vmatpush.msrb.mxu3 %v4440_v49  ;;  %v4782_v49 = vld [vmem:[%s5174_s2 + $0x70] sm:$0xff] }
 0xe1c   : > { %2336 = vmatpush.msrb.mxu2 %v4443_v50  ;;  %2356 = vmatpush.msrb.mxu3 %v4446_v35  ;;  %v4788_v50 = vld [vmem:[%s5174_s2 + $0x78] sm:$0xff]  ;;  %v4794_v35 = vld [vmem:[%s5177_s5 + $0x70] sm:$0xff] }
 0xe1e   : > { %2337 = vmatpush.msrb.mxu2 %v4449_v47  ;;  %2357 = vmatpush.msrb.mxu3 %v4452_v27  ;;  %v4800_v47 = vld [vmem:[%s5177_s5 + $0x78] sm:$0xff]  ;;  %v4806_v27 = vld [vmem:[%s5174_s2 + $0x60] sm:$0xff] }
 0xe20   : > { %2338 = vmatpush.msrb.mxu2 %v4455_v0  ;;  %2358 = vmatpush.msrb.mxu3 %v4458_v10  ;;  %v4812_v0 = vld [vmem:[%s5174_s2 + $0x68] sm:$0xff]  ;;  %v4818_v10 = vld [vmem:[%s5177_s5 + $0x60] sm:$0xff] }
 0xe21   : > { %2923 = vmatmul.msk.f32.vlgmr.msra.gmra.mxu2 %vm627_vm2, %v2112_v19  ;;  %2924 = vmatmul.msk.f32.vlgmr.msra.gmra.mxu3 %vm627_vm2, %v2112_v19 }
 0xe22   : > { %2339 = vmatpush.msrb.mxu2 %v4463_v11  ;;  %2359 = vmatpush.msrb.mxu3 %v4466_v21  ;;  %v4824_v11 = vld [vmem:[%s5177_s5 + $0x68] sm:$0xff]  ;;  %v4830_v21 = vld [vmem:[%s5174_s2 + $0x50] sm:$0xff] }
 0xe24   : > { %2340 = vmatpush.msrb.mxu2 %v4469_v32  ;;  %2360 = vmatpush.msrb.mxu3 %v4472_v16  ;;  %v4836_v32 = vld [vmem:[%s5174_s2 + $0x58] sm:$0xff]  ;;  %v4842_v16 = vld [vmem:[%s5177_s5 + $0x50] sm:$0xff] }
 0xe26   : > { %2341 = vmatpush.msrb.mxu2 %v4475_v41  ;;  %2361 = vmatpush.msrb.mxu3 %v4478_v55  ;;  %v4848_v41 = vld [vmem:[%s5177_s5 + $0x58] sm:$0xff]  ;;  %v4854_v55 = vld [vmem:[%s5174_s2 + $0x40] sm:$0xff] }
 0xe28   : > { %v2157_v26 = vpop.permute.xlu0 %2156  ;;  %2342 = vmatpush.msrb.mxu2 %v4485_v33  ;;  %2362 = vmatpush.msrb.mxu3 %v4488_v46  ;;  %v4860_v33 = vld [vmem:[%s5174_s2 + $0x48] sm:$0xff]  ;;  %v4866_v46 = vld [vmem:[%s5177_s5 + $0x40] sm:$0xff] }
 0xe29   : > { %2921 = vmatmul.msk.f32.vlgmr.msrb.gmra.mxu0 %vm627_vm2, %v2157_v26  ;;  %2922 = vmatmul.msk.f32.vlgmr.msrb.gmra.mxu1 %vm627_vm2, %v2157_v26 }
 0xe2a   : > { %2392 = vmatpush.msrb.mxu0 %v4782_v49  ;;  %2412 = vmatpush.msrb.mxu1 %v4788_v50 }
 0xe2b   : > { %2457 = vmatpush.msra.mxu2 %v4794_v35  ;;  %2477 = vmatpush.msra.mxu3 %v4800_v47 }
 0xe2c   : > { %2393 = vmatpush.msrb.mxu0 %v4806_v27  ;;  %2413 = vmatpush.msrb.mxu1 %v4812_v0 }
 0xe2d   : > { %2458 = vmatpush.msra.mxu2 %v4818_v10  ;;  %2478 = vmatpush.msra.mxu3 %v4824_v11 }
 0xe2e   : > { %2394 = vmatpush.msrb.mxu0 %v4830_v21  ;;  %2414 = vmatpush.msrb.mxu1 %v4836_v32 }
 0xe2f   : > { %2459 = vmatpush.msra.mxu2 %v4842_v16  ;;  %2479 = vmatpush.msra.mxu3 %v4848_v41 }
 0xe30   : > { %2395 = vmatpush.msrb.mxu0 %v4854_v55  ;;  %2415 = vmatpush.msrb.mxu1 %v4860_v33 }
 0xe31   : > { %2460 = vmatpush.msra.mxu2 %v4866_v46  ;;  %2480 = vmatpush.msra.mxu3 %v4872_v56 }
 0xe32   : > { %2396 = vmatpush.msrb.mxu0 %v4878_v60  ;;  %2416 = vmatpush.msrb.mxu1 %v4884_v20 }
 0xe33   : > { %2461 = vmatpush.msra.mxu2 %v4890_v22  ;;  %2481 = vmatpush.msra.mxu3 %v4896_v23 }
 0xe34   : > { %2397 = vmatpush.msrb.mxu0 %v4902_v43  ;;  %2417 = vmatpush.msrb.mxu1 %v4908_v57 }
 0xe35   : > { %2462 = vmatpush.msra.mxu2 %v4914_v3  ;;  %2482 = vmatpush.msra.mxu3 %v4920_v52 }
 0xe36   : > { %2398 = vmatpush.msrb.mxu0 %v4926_v25  ;;  %2418 = vmatpush.msrb.mxu1 %v4932_v28 }
 0xe37   : > { %2463 = vmatpush.msra.mxu2 %v4938_v6  ;;  %2483 = vmatpush.msra.mxu3 %v4944_v7 }
 0xe38   : > { %2399 = vmatpush.msrb.mxu0 %v4950_v31  ;;  %2419 = vmatpush.msrb.mxu1 %v4956_v34 }
 0xe39   : > { %2464 = vmatpush.msra.mxu2 %v4962_v63  ;;  %2484 = vmatpush.msra.mxu3 %v4968_v58 }
 0xe9c   : > { %v2132_v61 = vpop.f32.mrf.mxu2  ;;  %v2152_v1 = vpop.f32.mrf.mxu3 }
 0xe9d   : > { %v2133_v59 = vadd.f32 %v2132_v61, %v3961_v44 }
 0xea4   : > { %v2234_v30 = vpop.f32.mrf.mxu2  ;;  %v2254_v12 = vpop.f32.mrf.mxu3 }
 0xea5   : > { %v2235_v29 = vadd.f32 %v2234_v30, %v5316_v2  ;;  %v2255_v14 = vadd.f32 %v2254_v12, %v3725_v48  ;;  %v2259_v30 = vld [vmem:[#allocation2 + $0x98] sm:$0xff] }
 0xea6   : > { %v2177_v40 = vpop.f32.mrf.mxu0  ;;  %v2197_v13 = vpop.f32.mrf.mxu1 }
 0xea7   : > { %v2260_v36 = vadd.f32 %v2258_v24, %v2235_v29  ;;  %v2178_v39 = vadd.f32 %v2177_v40, %v3963_v45  ;;  %v2198_v26 = vadd.f32 %v2197_v13, %v3968_v15  ;;  %v2153_v29 = vadd.f32 %v2152_v1, %v3970_v9 }
 0xea9   : > { %v2261_v54 = vsub.f32 0.0, %v2260_v36  ;;  %v2200_v42 = vadd.f32 %v2178_v39, %v2133_v59 }
 0xeab   : > { %v2262_v53 = vmul.f32 1.442695, %v2261_v54  ;;  %v2201_v62 = vsub.f32 0.0, %v2200_v42 }
 0xead   : > { %3123 = vpow2.f32 %v2262_v53  ;;  %v2202_v38 = vmul.f32 1.442695, %v2201_v62 }
 0xeaf   : > { %3125 = vpow2.f32 %v2202_v38 }
 0xeb3   : > { %v3124_v4 = vpop.eup %3123 }
 0xeb4   : > { %v2264_v51 = vadd.f32 1.0, %v3124_v4 }
 0xeb5   : > { %v3126_v37 = vpop.eup %3125 }
 0xeb6   : > { %3127 = vrcp.f32 %v2264_v51  ;;  %v2204_v5 = vadd.f32 1.0, %v3126_v37 }
 0xeb8   : > { %3129 = vrcp.f32 %v2204_v5 }
 0xebc   : > { %v3128_v17 = vpop.eup %3127 }
 0xebd   : > { %v2266_v19 = vmul.f32 %v3128_v17, %v2255_v14  ;;  %v2269_v1 = vsub.f32 1.0, %v3128_v17  ;;  %v2275_v51 = vmul.f32 %v3128_v17, %v4753_v18  ;;  %v5009_v18 = vld [vmem:[#allocation7 + $0x70] sm:$0xff] }
 0xebe   : > { %v3130_v61 = vpop.eup %3129 }
 0xebf   : > { %v2267_v24 = vadd.f32 %v2266_v19, %v2259_v30  ;;  %v2206_v40 = vmul.f32 %v3130_v61, %v2198_v26  ;;  %v2209_v54 = vsub.f32 1.0, %v3130_v61  ;;  %v2215_v53 = vmul.f32 %v3130_v61, %v4748_v8 }
 0xec1   : > { %3131 = vtanh.f32 %v2267_v24  ;;  %v2207_v59 = vadd.f32 %v2206_v40, %v2153_v29 }
 0xec3   : > { %3133 = vtanh.f32 %v2207_v59 }
 0xec7   : > { %v3132_v36 = vpop.eup %3131 }
 0xec8   : > { %2271 = vrot.lane.b32.xlu1 %v3132_v36, %s3429_s28  ;;  %v2426_v36 = vld [vmem:[#allocation2 + $0xa8] sm:$0xff] }
 0xec9   : > { %v3134_v39 = vpop.eup %3133 }
 0xeca   : > { %2211 = vrot.lane.b32.xlu2 %v3134_v39, %s3429_s28 }
 0xf24   : > { %v2212_v42 = vpop.permute.xlu2 %2211 }
 0xf25   : > { %v2214_v62 = vmul.f32 %v2212_v42, %v2209_v54 }
 0xf27   : > { %v4980_v38 = vadd.f32 %v2215_v53, %v2214_v62 }
 0xf29   : > { %2323 = vrot.lane.b32.xlu1 %v4980_v38, %s3429_s28 }
 0xf3a   : > { %v2272_v4 = vpop.permute.xlu1 %2271 }
 0xf3b   : > { %v2274_v37 = vmul.f32 %v2272_v4, %v2269_v1 }
 0xf3d   : > { %v4985_v5 = vadd.f32 %v2275_v51, %v2274_v37 }
 0xf3f   : > { %2278 = vrot.lane.b32.xlu0 %v4985_v5, %s3429_s28 }
 0xf9b   : > { %v2324_v12 = vpop.permute.xlu1 %2323 }
 0xf9c   : > { %2927 = vmatmul.msk.f32.vlgmr.msrb.gmra.mxu2 %vm627_vm2, %v2324_v12  ;;  %2928 = vmatmul.msk.f32.vlgmr.msrb.gmra.mxu3 %vm627_vm2, %v2324_v12 }
 0xf9d   : > { %2559 = vmatpush.msrb.mxu2 %v4782_v49  ;;  %2579 = vmatpush.msrb.mxu3 %v4788_v50  ;;  %v5012_v49 = vld [vmem:[#allocation7 + $0x78] sm:$0xff]  ;;  %v5015_v50 = vld [vmem:[#allocation7 + $0x60] sm:$0xff] }
 0xf9f   : > { %2560 = vmatpush.msrb.mxu2 %v4806_v27  ;;  %2580 = vmatpush.msrb.mxu3 %v4812_v0  ;;  %v5018_v27 = vld [vmem:[#allocation7 + $0x68] sm:$0xff]  ;;  %v5021_v0 = vld [vmem:[#allocation7 + $0x50] sm:$0xff] }
 0xfa1   : > { %2561 = vmatpush.msrb.mxu2 %v4830_v21  ;;  %2581 = vmatpush.msrb.mxu3 %v4836_v32  ;;  %v5024_v21 = vld [vmem:[#allocation7 + $0x58] sm:$0xff]  ;;  %v5027_v32 = vld [vmem:[#allocation7 + $0x40] sm:$0xff] }
 0xfa3   : > { %2562 = vmatpush.msrb.mxu2 %v4854_v55  ;;  %2582 = vmatpush.msrb.mxu3 %v4860_v33  ;;  %v5030_v55 = vld [vmem:[#allocation7 + $0x48] sm:$0xff]  ;;  %v5035_v33 = vld [vmem:[#allocation7 + $0x30] sm:$0xff] }
 0xfa5   : > { %2563 = vmatpush.msrb.mxu2 %v4878_v60  ;;  %2583 = vmatpush.msrb.mxu3 %v4884_v20  ;;  %v5038_v60 = vld [vmem:[#allocation7 + $0x38] sm:$0xff]  ;;  %v5041_v20 = vld [vmem:[#allocation7 + $0x20] sm:$0xff] }
 0xfa7   : > { %2564 = vmatpush.msrb.mxu2 %v4902_v43  ;;  %2584 = vmatpush.msrb.mxu3 %v4908_v57  ;;  %v5044_v43 = vld [vmem:[#allocation7 + $0x28] sm:$0xff]  ;;  %v5047_v57 = vld [vmem:[#allocation7 + $0x10] sm:$0xff] }
 0xfa9   : > { %2565 = vmatpush.msrb.mxu2 %v4926_v25  ;;  %2585 = vmatpush.msrb.mxu3 %v4932_v28  ;;  %v5050_v25 = vld [vmem:[#allocation7 + $0x18] sm:$0xff]  ;;  %v5053_v28 = vld [vmem:[#allocation7] sm:$0xff] }
 0xfab   : > { %2566 = vmatpush.msrb.mxu2 %v4950_v31  ;;  %2586 = vmatpush.msrb.mxu3 %v4956_v34  ;;  %v5056_v31 = vld [vmem:[#allocation7 + $0x8] sm:$0xff] }
 0xfb1   : > { %v2279_v8 = vpop.permute.xlu0 %2278 }
 0xfb2   : > { %2925 = vmatmul.msk.f32.vlgmr.msra.gmra.mxu0 %vm627_vm2, %v2279_v8  ;;  %2926 = vmatmul.msk.f32.vlgmr.msra.gmra.mxu1 %vm627_vm2, %v2279_v8 }
 0xfb3   : > { %2502 = vmatpush.msra.mxu0 %v5009_v18  ;;  %2522 = vmatpush.msra.mxu1 %v5012_v49 }
 0xfb5   : > { %2503 = vmatpush.msra.mxu0 %v5015_v50  ;;  %2523 = vmatpush.msra.mxu1 %v5018_v27 }
 0xfb7   : > { %2504 = vmatpush.msra.mxu0 %v5021_v0  ;;  %2524 = vmatpush.msra.mxu1 %v5024_v21 }
 0xfb9   : > { %2505 = vmatpush.msra.mxu0 %v5027_v32  ;;  %2525 = vmatpush.msra.mxu1 %v5030_v55 }
 0xfba   : > { %2929 = vmatmul.msk.f32.vlgmr.msrb.gmra.mxu0 %vm627_vm2, %v2279_v8  ;;  %2930 = vmatmul.msk.f32.vlgmr.msrb.gmra.mxu1 %vm627_vm2, %v2279_v8 }
 0xfbb   : > { %2506 = vmatpush.msra.mxu0 %v5035_v33  ;;  %2526 = vmatpush.msra.mxu1 %v5038_v60 }
 0xfbd   : > { %2507 = vmatpush.msra.mxu0 %v5041_v20  ;;  %2527 = vmatpush.msra.mxu1 %v5044_v43 }
 0xfbf   : > { %2508 = vmatpush.msra.mxu0 %v5047_v57  ;;  %2528 = vmatpush.msra.mxu1 %v5050_v25 }
 0xfc1   : > { %2509 = vmatpush.msra.mxu0 %v5053_v28  ;;  %2529 = vmatpush.msra.mxu1 %v5056_v31 }
 0xfc3   : > { %2624 = vmatpush.msrb.mxu0 %v4794_v35  ;;  %2644 = vmatpush.msrb.mxu1 %v4800_v47 }
 0xfc5   : > { %2625 = vmatpush.msrb.mxu0 %v4818_v10  ;;  %2645 = vmatpush.msrb.mxu1 %v4824_v11 }
 0xfc7   : > { %2626 = vmatpush.msrb.mxu0 %v4842_v16  ;;  %2646 = vmatpush.msrb.mxu1 %v4848_v41 }
 0xfc9   : > { %2627 = vmatpush.msrb.mxu0 %v4866_v46  ;;  %2647 = vmatpush.msrb.mxu1 %v4872_v56 }
 0xfcb   : > { %2628 = vmatpush.msrb.mxu0 %v4890_v22  ;;  %2648 = vmatpush.msrb.mxu1 %v4896_v23  ;;  %v2425_v23 = vld [vmem:[#allocation2 + $0xa0] sm:$0xff] }
 0xfcd   : > { %2629 = vmatpush.msrb.mxu0 %v4914_v3  ;;  %2649 = vmatpush.msrb.mxu1 %v4920_v52 }
 0xfcf   : > { %2630 = vmatpush.msrb.mxu0 %v4938_v6  ;;  %2650 = vmatpush.msrb.mxu1 %v4944_v7 }
 0xfd1   : > { %2631 = vmatpush.msrb.mxu0 %v4962_v63  ;;  %2651 = vmatpush.msrb.mxu1 %v4968_v58 }
0x101f   : > { %v2344_v35 = vpop.f32.mrf.mxu2  ;;  %v2364_v58 = vpop.f32.mrf.mxu3 }
0x1020   : > { %v2345_v10 = vadd.f32 %v2344_v35, %v3963_v45  ;;  %v2365_v14 = vadd.f32 %v2364_v58, %v3968_v15 }
0x102f   : > { %v2299_v47 = vpop.f32.mrf.mxu0  ;;  %v2319_v63 = vpop.f32.mrf.mxu1 }
0x1030   : > { %v2300_v11 = vadd.f32 %v2299_v47, %v3961_v44  ;;  %v2320_v26 = vadd.f32 %v2319_v63, %v3970_v9 }
0x1032   : > { %v2367_v16 = vadd.f32 %v2345_v10, %v2300_v11 }
0x1034   : > { %v2368_v41 = vsub.f32 0.0, %v2367_v16 }
0x1036   : > { %v2369_v46 = vmul.f32 1.442695, %v2368_v41 }
0x1037   : > { %v2401_v56 = vpop.f32.mrf.mxu0  ;;  %v2421_v29 = vpop.f32.mrf.mxu1 }
0x1038   : > { %3135 = vpow2.f32 %v2369_v46  ;;  %v2402_v22 = vadd.f32 %v2401_v56, %v5316_v2  ;;  %v2422_v24 = vadd.f32 %v2421_v29, %v3725_v48 }
0x103a   : > { %v2427_v3 = vadd.f32 %v2425_v23, %v2402_v22 }
0x103c   : > { %v2428_v52 = vsub.f32 0.0, %v2427_v3 }
0x103e   : > { %v3136_v6 = vpop.eup %3135  ;;  %v2429_v7 = vmul.f32 1.442695, %v2428_v52 }
0x103f   : > { %v2371_v34 = vadd.f32 1.0, %v3136_v6 }
0x1040   : > { %3137 = vpow2.f32 %v2429_v7  ;;  %v2593_v7 = vld [vmem:[#allocation2 + $0xb8] sm:$0xff] }
0x1041   : > { %3139 = vrcp.f32 %v2371_v34 }
0x1046   : > { %v3138_v13 = vpop.eup %3137 }
0x1047   : > { %v3140_v17 = vpop.eup %3139  ;;  %v2431_v19 = vadd.f32 1.0, %v3138_v13 }
0x1048   : > { %v2373_v61 = vmul.f32 %v3140_v17, %v2365_v14  ;;  %v2376_v37 = vsub.f32 1.0, %v3140_v17  ;;  %v2382_v8 = vmul.f32 %v3140_v17, %v4980_v38 }
0x1049   : > { %3141 = vrcp.f32 %v2431_v19 }
0x104a   : > { %v2374_v30 = vadd.f32 %v2373_v61, %v2320_v26 }
0x104c   : > { %3143 = vtanh.f32 %v2374_v30 }
0x104f   : > { %v3142_v40 = vpop.eup %3141 }
0x1050   : > { %v2433_v59 = vmul.f32 %v3142_v40, %v2422_v24  ;;  %v2436_v53 = vsub.f32 1.0, %v3142_v40  ;;  %v2442_v1 = vmul.f32 %v3142_v40, %v4985_v5 }
0x1052   : > { %v3144_v39 = vpop.eup %3143  ;;  %v2434_v54 = vadd.f32 %v2433_v59, %v2426_v36 }
0x1053   : > { %2378 = vrot.lane.b32.xlu0 %v3144_v39, %s3429_s28 }
0x1054   : > { %3145 = vtanh.f32 %v2434_v54 }
0x105a   : > { %v3146_v42 = vpop.eup %3145 }
0x105b   : > { %2438 = vrot.lane.b32.xlu2 %v3146_v42, %s3429_s28 }
0x10b5   : > { %v2439_v62 = vpop.permute.xlu2 %2438 }
0x10b6   : > { %v2441_v4 = vmul.f32 %v2439_v62, %v2436_v53 }
0x10b8   : > { %v5084_v51 = vadd.f32 %v2442_v1, %v2441_v4 }
0x10ba   : > { %2445 = vrot.lane.b32.xlu1 %v5084_v51, %s3429_s28 }
0x10c5   : > { %v2379_v12 = vpop.permute.xlu0 %2378 }
0x10c6   : > { %v2381_v35 = vmul.f32 %v2379_v12, %v2376_v37 }
0x10c8   : > { %v5089_v47 = vadd.f32 %v2382_v8, %v2381_v35 }
0x10ca   : > { %2490 = vrot.lane.b32.xlu2 %v5089_v47, %s3429_s28 }
0x1124   : > { %v2491_v10 = vpop.permute.xlu2 %2490 }
0x1125   : > { %2933 = vmatmul.msk.f32.vlgmr.msra.gmra.mxu0 %vm627_vm2, %v2491_v10  ;;  %2934 = vmatmul.msk.f32.vlgmr.msra.gmra.mxu1 %vm627_vm2, %v2491_v10 }
0x112c   : > { %v2446_v5 = vpop.permute.xlu1 %2445 }
0x112d   : > { %2931 = vmatmul.msk.f32.vlgmr.msra.gmra.mxu2 %vm627_vm2, %v2446_v5  ;;  %2932 = vmatmul.msk.f32.vlgmr.msra.gmra.mxu3 %vm627_vm2, %v2446_v5 }
0x112e   : > { %2669 = vmatpush.msra.mxu2 %v5009_v18  ;;  %2689 = vmatpush.msra.mxu3 %v5012_v49 }
0x1130   : > { %2670 = vmatpush.msra.mxu2 %v5015_v50  ;;  %2690 = vmatpush.msra.mxu3 %v5018_v27 }
0x1132   : > { %2671 = vmatpush.msra.mxu2 %v5021_v0  ;;  %2691 = vmatpush.msra.mxu3 %v5024_v21 }
0x1134   : > { %2672 = vmatpush.msra.mxu2 %v5027_v32  ;;  %2692 = vmatpush.msra.mxu3 %v5030_v55 }
0x1135   : > { %2935 = vmatmul.msk.f32.vlgmr.msrb.gmra.mxu2 %vm627_vm2, %v2446_v5  ;;  %2936 = vmatmul.msk.f32.vlgmr.msrb.gmra.mxu3 %vm627_vm2, %v2446_v5 }
0x1136   : > { %2673 = vmatpush.msra.mxu2 %v5035_v33  ;;  %2693 = vmatpush.msra.mxu3 %v5038_v60  ;;  %v2592_v33 = vld [vmem:[#allocation2 + $0xb0] sm:$0xff] }
0x1138   : > { %2674 = vmatpush.msra.mxu2 %v5041_v20  ;;  %2694 = vmatpush.msra.mxu3 %v5044_v43 }
0x113a   : > { %2675 = vmatpush.msra.mxu2 %v5047_v57  ;;  %2695 = vmatpush.msra.mxu3 %v5050_v25 }
0x113c   : > { %2676 = vmatpush.msra.mxu2 %v5053_v28  ;;  %2696 = vmatpush.msra.mxu3 %v5056_v31 }
0x11a2   : > { %v2511_v38 = vpop.f32.mrf.mxu0  ;;  %v2531_v31 = vpop.f32.mrf.mxu1 }
0x11a3   : > { %v2512_v49 = vadd.f32 %v2511_v38, %v3963_v45  ;;  %v2532_v16 = vadd.f32 %v2531_v31, %v3968_v15 }
0x11b0   : > { %v2466_v18 = vpop.f32.mrf.mxu2  ;;  %v2486_v28 = vpop.f32.mrf.mxu3 }
0x11b1   : > { %v2467_v50 = vadd.f32 %v2466_v18, %v3961_v44  ;;  %v2487_v56 = vadd.f32 %v2486_v28, %v3970_v9 }
0x11b3   : > { %v2534_v27 = vadd.f32 %v2512_v49, %v2467_v50 }
0x11b5   : > { %v2535_v0 = vsub.f32 0.0, %v2534_v27 }
0x11b7   : > { %v2536_v21 = vmul.f32 1.442695, %v2535_v0 }
0x11b8   : > { %v2568_v32 = vpop.f32.mrf.mxu2  ;;  %v2588_v23 = vpop.f32.mrf.mxu3 }
0x11b9   : > { %3147 = vpow2.f32 %v2536_v21  ;;  %v2569_v55 = vadd.f32 %v2568_v32, %v5316_v2  ;;  %v2589_v3 = vadd.f32 %v2588_v23, %v3725_v48 }
0x11bb   : > { %v2594_v60 = vadd.f32 %v2592_v33, %v2569_v55 }
0x11bd   : > { %v2595_v20 = vsub.f32 0.0, %v2594_v60 }
0x11bf   : > { %v3148_v43 = vpop.eup %3147  ;;  %v2596_v57 = vmul.f32 1.442695, %v2595_v20 }
0x11c0   : > { %v2538_v25 = vadd.f32 1.0, %v3148_v43 }
0x11c1   : > { %3149 = vpow2.f32 %v2596_v57 }
0x11c2   : > { %3151 = vrcp.f32 %v2538_v25 }
0x11c7   : > { %v3150_v11 = vpop.eup %3149 }
0x11c8   : > { %v3152_v41 = vpop.eup %3151  ;;  %v2598_v46 = vadd.f32 1.0, %v3150_v11 }
0x11c9   : > { %v2540_v22 = vmul.f32 %v3152_v41, %v2532_v16  ;;  %v2543_v13 = vsub.f32 1.0, %v3152_v41  ;;  %v2549_v17 = vmul.f32 %v3152_v41, %v5089_v47 }
0x11ca   : > { %3153 = vrcp.f32 %v2598_v46 }
0x11cb   : > { %v2541_v2 = vadd.f32 %v2540_v22, %v2487_v56 }
0x11cd   : > { %3155 = vtanh.f32 %v2541_v2 }
0x11d0   : > { %v3154_v52 = vpop.eup %3153 }
0x11d1   : > { %v2600_v6 = vmul.f32 %v3154_v52, %v2589_v3  ;;  %v2603_v48 = vsub.f32 1.0, %v3154_v52  ;;  %v2609_v30 = vmul.f32 %v3154_v52, %v5084_v51 }
0x11d3   : > { %v3156_v34 = vpop.eup %3155  ;;  %v2601_v63 = vadd.f32 %v2600_v6, %v2593_v7 }
0x11d4   : > { %2545 = vrot.lane.b32.xlu0 %v3156_v34, %s3429_s28 }
0x11d5   : > { %3157 = vtanh.f32 %v2601_v63 }
0x11db   : > { %v3158_v58 = vpop.eup %3157 }
0x11dc   : > { %2605 = vrot.lane.b32.xlu1 %v3158_v58, %s3429_s28 }
0x1246   : > { %v2546_v14 = vpop.permute.xlu0 %2545 }
0x1247   : > { %v2548_v19 = vmul.f32 %v2546_v14, %v2543_v13 }
0x1249   : > { %v2550_v26 = vadd.f32 %v2549_v17, %v2548_v19 }
0x124b   : > { %2657 = vrot.lane.b32.xlu2 %v2550_v26, %s3429_s28 }
0x124e   : > { %v2606_v61 = vpop.permute.xlu1 %2605 }
0x124f   : > { %v2608_v29 = vmul.f32 %v2606_v61, %v2603_v48 }
0x1251   : > { %v2610_v24 = vadd.f32 %v2609_v30, %v2608_v29 }
0x1253   : > { %2612 = vrot.lane.b32.xlu0 %v2610_v24, %s3429_s28 }
0x12a5   : > { %v2658_v40 = vpop.permute.xlu2 %2657 }
0x12a6   : > { %2939 = vmatmul.msk.f32.vlgmr.msra.gmra.mxu2 %vm627_vm2, %v2658_v40  ;;  %2940 = vmatmul.msk.f32.vlgmr.msra.gmra.mxu3 %vm627_vm2, %v2658_v40 }
0x12c5   : > { %v2613_v59 = vpop.permute.xlu0 %2612 }
0x12c6   : > { %2937 = vmatmul.msk.f32.vlgmr.msrb.gmra.mxu0 %vm627_vm2, %v2613_v59  ;;  %2938 = vmatmul.msk.f32.vlgmr.msrb.gmra.mxu1 %vm627_vm2, %v2613_v59 }
0x1329   : > { %v2678_v36 = vpop.f32.mrf.mxu2  ;;  %v2698_v37 = vpop.f32.mrf.mxu3 }
0x132a   : > { %v2679_v54 = vadd.f32 %v2678_v36, %v3963_v45  ;;  %v2699_v8 = vadd.f32 %v2698_v37, %v3968_v15 }
0x1343   : > { %v2633_v39 = vpop.f32.mrf.mxu0  ;;  %v2653_v12 = vpop.f32.mrf.mxu1 }
0x1344   : > { %v2634_v42 = vadd.f32 %v2633_v39, %v3961_v44  ;;  %v2654_v47 = vadd.f32 %v2653_v12, %v3970_v9 }
0x1346   : > { %v2701_v53 = vadd.f32 %v2679_v54, %v2634_v42 }
0x1348   : > { %v2702_v62 = vsub.f32 0.0, %v2701_v53 }
0x134a   : > { %v2703_v1 = vmul.f32 1.442695, %v2702_v62 }
0x134c   : > { %3159 = vpow2.f32 %v2703_v1 }
0x1352   : > { %v3160_v4 = vpop.eup %3159 }
0x1353   : > { %v2705_v51 = vadd.f32 1.0, %v3160_v4 }
0x1355   : > { %3161 = vrcp.f32 %v2705_v51 }
0x135b   : > { %v3162_v35 = vpop.eup %3161 }
0x135c   : > { %v2707_v10 = vmul.f32 %v3162_v35, %v2699_v8  ;;  %v2710_v5 = vsub.f32 1.0, %v3162_v35  ;;  %v2716_v18 = vmul.f32 %v3162_v35, %v2550_v26 }
0x135e   : > { %v2708_v45 = vadd.f32 %v2707_v10, %v2654_v47 }
0x1360   : > { %3163 = vtanh.f32 %v2708_v45 }
0x1366   : > { %v3164_v44 = vpop.eup %3163 }
0x1367   : > { %2712 = vrot.lane.b32.xlu1 %v3164_v44, %s3429_s28 }
0x13d9   : > { %v2713_v38 = vpop.permute.xlu1 %2712 }
0x13da   : > { %v2715_v49 = vmul.f32 %v2713_v38, %v2710_v5 }
0x13dc   : > { %v2717_v50 = vadd.f32 %v2716_v18, %v2715_v49 }
0x13de   : > { %2719 = vrot.lane.b32.xlu2 %v2717_v50, %s3429_s28 }
0x1438   : > { %v2720_v9 = vpop.permute.xlu2 %2719 }
0x1439   : > { %2722 = vst.msk [vmem:[%s455_s22] sm:$0xff] %vm627_vm2, %v2720_v9 }
0x143a   : > { %3378 = shalt.err (!%p3375_p9)
}
0x143b   : > { %2959 = dma.vmem_to_hbm [thread:$0]  (%p3523_p6), %s2737_s24, 128, %s2739_s26, %s2724_s29  }
0x143c PF: > { %s2750_s19 = sand.u32 1, %s3409_s30   ;;  %p2972_p11 = pnand %p2840_p1, %p3529_p10 }
0x143d   : > { %s2751_s16 = scalar_lea.sflag [#allocation6], %s2750_s19 }
0x143e   : > { %p2973_p12 = pneg %p2972_p11 }
0x1440   : > { %3404 = dma.done.wait (%p2973_p12), %s2751_s16, 128  }
0x1441   : > { %3406 = vsyncadd (%p2973_p12), %s2751_s16, 4294967168  ;;  %s5326_s12 = sld [smem:[#allocation14_spill]]  ;;  %s5328_s30 = smov %s3413_s10 }
0x1442   : > { %s5327_s23 = sld [smem:[#allocation15_spill]]  ;;  %s5329_s10 = smov %s3417_s11 }
0x1447   : > { %p21_p13 = scmp.ge.s32.totalorder %s5326_s12, 4  }
0x1448   : > { %s5330_s11 = smov %s5327_s23 }
0x1449   :  { %23 = sbr.rel (!%p21_p13) target bundleno = 7 (0x7), region = 158 }
0x144e   :  { %2757 = vsyncpa [#allocation5], 1 }
0x144f   :  { %2759 = vsyncpa [#allocation5 + $0x1], 1 }
0x1450   :  { %2760 = vsyncpa [#allocation8], 1 }
0x1451   :  { %2761 = vsyncpa [#allocation6], 1 }
0x1452   :  { %2763 = vsyncpa [#allocation6 + $0x1], 1 }

</bundles_post_ra>
